<compile_context>
chip_gen: v6e
topology: v6e:2x2x1
jax: 0.10.0
libtpu: 0.0.40
codegen_flags: <defaults>
</compile_context>

<pallas_src>
import jax
import jax.numpy as jnp
from jax.experimental import pallas as pl
from jax.experimental.pallas import tpu as pltpu


# ----------------------------- in-kernel helpers ------------------------------

def _conv3x3_padded(pad_ref, src, w9_ref, b_ref):
    """3x3 conv (stride 1, pad 1) via a zero-padded VMEM scratch.

    Zero-pads `src` spatially into `pad_ref`, then accumulates 9 shifted-tap bf16 MXU
    matmuls in an f32 register accumulator and adds the bias.

    src    : (h, w, c) or (n, h, w, c) f32 value
    pad_ref: VMEM scratch of the same rank with spatial dims h+2, w+2 (f32)
    w9_ref : (9, c, cout) bf16, tap-major (== weight.reshape(9, c, cout))
    b_ref  : (1, cout) f32
    returns: (rows, cout) f32, rows = prod(src.shape[:-1]), row order = row-major spatial
    """
    batched = len(pad_ref.shape) == 4
    h = pad_ref.shape[-3] - 2
    w = pad_ref.shape[-2] - 2
    c = pad_ref.shape[-1]
    cout = w9_ref.shape[-1]
    m = 1
    for d in src.shape[:-1]:
        m *= d

    # Zero the scratch (borders = conv padding) and write the interior.
    pad_ref[...] = jnp.zeros(pad_ref.shape, pad_ref.dtype)
    if batched:
        pad_ref[:, pl.ds(1, h), pl.ds(1, w), :] = src
    else:
        pad_ref[pl.ds(1, h), pl.ds(1, w), :] = src

    acc = jnp.zeros((m, cout), jnp.float32)
    for t in range(9):                      # 9 back-to-back MXU matmuls, one launch
        dy, dx = t // 3, t % 3
        if batched:
            tap = pad_ref[:, pl.ds(dy, h), pl.ds(dx, w), :]
        else:
            tap = pad_ref[pl.ds(dy, h), pl.ds(dx, w), :]
        acc = acc + jnp.dot(tap.reshape(m, c).astype(jnp.bfloat16), w9_ref[t],
                            preferred_element_type=jnp.float32)
    return acc + b_ref[...]


# ----------------------------- Pallas kernels ------------------------------

def _pool_conv_conv_kernel(x_ref, w1_ref, b1_ref, w2_ref, b2_ref, o_ref,
                           pad1_ref, pad2_ref):
    """Per-sample fused MaxPool2d(2) -> conv3x3+ReLU -> conv3x3+ReLU (grid axis = batch)."""
    x = x_ref[...]                                         # (h, 2, w, 2, cin): one sample
    h, _, w, _, _ = x.shape
    cmid = o_ref.shape[-1]

    # 2x2 max pool, stride 2 (pure VPU maxes on the pre-split layout).
    a = jnp.maximum(x[:, 0], x[:, 1])                      # (h, w, 2, cin)
    pooled = jnp.maximum(a[:, :, 0, :], a[:, :, 1, :])     # (h, w, cin)

    y = jnp.maximum(_conv3x3_padded(pad1_ref, pooled, w1_ref, b1_ref), 0.0)        # (h*w, cmid)
    y = jnp.maximum(_conv3x3_padded(pad2_ref, y.reshape(h, w, cmid), w2_ref, b2_ref), 0.0)
    o_ref[...] = y.reshape(1, h, w, cmid)


def _seblock_kernel(x_ref, wsc1_ref, bsc1_ref, g1_ref, be1_ref,
                    wsc2_ref, bsc2_ref, g2_ref, be2_ref,
                    sw1_ref, sb1_ref, sw2_ref, sb2_ref,
                    o_ref, pad_ref):
    """Fused SeBlock: shortcut (conv->BN->ReLU->conv->BN), SE gate, scale, residual add.

    The whole batch is resident in one block so the training-mode BatchNorm statistics
    (over N,H,W per channel) are exact.
    """
    eps = 1e-5
    x = x_ref[...]                                         # (n, h, w, c) f32: conv input AND residual
    n, h, w, c = x.shape
    m = n * h * w

    def batchnorm(v, g_ref, b_ref):
        # Training-mode BatchNorm2d: biased batch statistics per channel. v: (m, c).
        mean = jnp.sum(v, axis=0, keepdims=True) * (1.0 / m)
        var = jnp.sum((v - mean) ** 2, axis=0, keepdims=True) * (1.0 / m)
        return (v - mean) * jax.lax.rsqrt(var + eps) * g_ref[...] + b_ref[...]

    # Shortcut branch: conv -> BN -> ReLU -> conv -> BN.
    y = _conv3x3_padded(pad_ref, x, wsc1_ref, bsc1_ref)                            # (m, c)
    y = jnp.maximum(batchnorm(y, g1_ref, be1_ref), 0.0)
    y = _conv3x3_padded(pad_ref, y.reshape(n, h, w, c), wsc2_ref, bsc2_ref)
    xs = batchnorm(y, g2_ref, be2_ref)                                             # (m, c)

    # SE gate: per-sample GAP -> 1x1 conv (FC) -> ReLU -> 1x1 conv (FC) -> sigmoid.
    xs3 = xs.reshape(n, h * w, c)
    s = jnp.sum(xs3, axis=1) * (1.0 / (h * w))                                     # (n, c)
    hid = jnp.maximum(
        jnp.dot(s, sw1_ref[...], preferred_element_type=jnp.float32) + sb1_ref[...], 0.0)
    gate = jax.nn.sigmoid(
        jnp.dot(hid, sw2_ref[...], preferred_element_type=jnp.float32) + sb2_ref[...])  # (n, c)

    out = xs3 * gate.reshape(n, 1, c) + x.reshape(n, h * w, c)
    o_ref[...] = out.reshape(n, h, w, c)


# ----------------------------- wrappers (glue) ------------------------------

def down_forward(x_nchw, params):
    """Down(use_pool=True, norm_layer=identity): x (N,Cin,H,W) -> (N,Cout,H//2,W//2)."""
    x = jnp.transpose(x_nchw, (0, 2, 3, 1)).astype(jnp.float32)   # NCHW -> NHWC
    n, hh, ww, cin = x.shape
    assert hh % 2 == 0 and ww % 2 == 0, "MaxPool2d(2) needs even spatial dims"
    cout = params["w1"].shape[-1]
    h, w = hh // 2, ww // 2

    # ---- kernel A: MaxPool2d(2) -> conv3x3+ReLU -> conv3x3+ReLU (one launch, grid over batch).
    x5 = x.reshape(n * h, 2, w, 2, cin)        # free bitcast feeding the in-kernel 2x2 max
    cw1 = params["w1"].reshape(9, cin, cout).astype(jnp.bfloat16)
    cw2 = params["w2"].reshape(9, cout, cout).astype(jnp.bfloat16)
    y = pl.pallas_call(
        _pool_conv_conv_kernel,
        out_shape=jax.ShapeDtypeStruct((n, h, w, cout), jnp.float32),
        grid_spec=pltpu.PrefetchScalarGridSpec(
            num_scalar_prefetch=0,
            grid=(n,),
            in_specs=[
                pl.BlockSpec((h, 2, w, 2, cin), lambda i: (i, 0, 0, 0, 0)),
                pl.BlockSpec((9, cin, cout), lambda i: (0, 0, 0)),
                pl.BlockSpec((1, cout), lambda i: (0, 0)),
                pl.BlockSpec((9, cout, cout), lambda i: (0, 0, 0)),
                pl.BlockSpec((1, cout), lambda i: (0, 0)),
            ],
            out_specs=pl.BlockSpec((1, h, w, cout), lambda i: (i, 0, 0, 0)),
            scratch_shapes=[pltpu.VMEM((h + 2, w + 2, cin), jnp.float32),
                            pltpu.VMEM((h + 2, w + 2, cout), jnp.float32)]),
        compiler_params=pltpu.CompilerParams(dimension_semantics=("parallel",)),
    )(x5, cw1, params["b1"].reshape(1, cout), cw2, params["b2"].reshape(1, cout))

    # ---- kernel B: fused SeBlock (conv->BN->ReLU->conv->BN -> SE gate -> scale -> +residual).
    # TODO(synk): whole batch lives in one VMEM block so BN batch stats are exact; for large
    #             N*H*W switch to a two-pass (sum / sum-of-squares) BN over an M-tiled grid.
    cr = params["se_w1"].shape[-1]
    wsc1 = params["sc_w1"].reshape(9, cout, cout).astype(jnp.bfloat16)
    wsc2 = params["sc_w2"].reshape(9, cout, cout).astype(jnp.bfloat16)
    out = pl.pallas_call(
        _seblock_kernel,
        out_shape=jax.ShapeDtypeStruct((n, h, w, cout), jnp.float32),
        scratch_shapes=[pltpu.VMEM((n, h + 2, w + 2, cout), jnp.float32)],
    )(y, wsc1, params["sc_b1"].reshape(1, cout),
      params["bn1_g"].reshape(1, cout), params["bn1_b"].reshape(1, cout),
      wsc2, params["sc_b2"].reshape(1, cout),
      params["bn2_g"].reshape(1, cout), params["bn2_b"].reshape(1, cout),
      params["se_w1"], params["se_b1"].reshape(1, cr),
      params["se_w2"], params["se_b2"].reshape(1, cout))

    return jnp.transpose(out, (0, 3, 1, 2))   # NHWC -> NCHW


# ----------------------------- pure-JAX reference ------------------------------

def _down_reference(x_nchw, params):
    """Pure-JAX (f32, HIGHEST precision) reference of the same Down forward."""
    x = jnp.transpose(x_nchw, (0, 2, 3, 1)).astype(jnp.float32)
    n, hh, ww, _ = x.shape
    h, w = hh // 2, ww // 2
    x = jnp.max(x.reshape(n, h, 2, w, 2, -1), axis=(2, 4))          # MaxPool2d(2)

    def conv(v, wgt, b):
        o = jax.lax.conv_general_dilated(
            v, wgt, window_strides=(1, 1), padding="SAME",
            dimension_numbers=("NHWC", "HWIO", "NHWC"),
            precision=jax.lax.Precision.HIGHEST)
        return o + b.reshape(1, 1, 1, -1)

    def bn(v, g, b, eps=1e-5):
        mean = jnp.mean(v, axis=(0, 1, 2), keepdims=True)
        var = jnp.mean((v - mean) ** 2, axis=(0, 1, 2), keepdims=True)
        return (v - mean) * jax.lax.rsqrt(var + eps) * g.reshape(1, 1, 1, -1) + b.reshape(1, 1, 1, -1)

    v = jax.nn.relu(conv(x, params["w1"], params["b1"]))
    v = jax.nn.relu(conv(v, params["w2"], params["b2"]))
    xs = conv(v, params["sc_w1"], params["sc_b1"])
    xs = jax.nn.relu(bn(xs, params["bn1_g"], params["bn1_b"]))
    xs = conv(xs, params["sc_w2"], params["sc_b2"])
    xs = bn(xs, params["bn2_g"], params["bn2_b"])
    s = jnp.mean(xs, axis=(1, 2))
    hid = jax.nn.relu(s @ params["se_w1"] + params["se_b1"])
    gate = jax.nn.sigmoid(hid @ params["se_w2"] + params["se_b2"])
    y = xs * gate[:, None, None, :] + v
    return jnp.transpose(y, (0, 3, 1, 2))


# ----------------------------- parameters ------------------------------

def _uniform(key, shape, bound):
    return jax.random.uniform(key, shape, jnp.float32, -bound, bound)


def _conv3x3_params(key, cin, cout):
    kw, kb = jax.random.split(key)
    bound = 1.0 / ((cin * 9) ** 0.5)
    return _uniform(kw, (3, 3, cin, cout), bound), _uniform(kb, (cout,), bound)


def init_down_params(key, in_channels, out_channels, reduce=16):
    assert out_channels // reduce >= 1, "SE reduction would give zero channels"
    ks = jax.random.split(key, 8)
    p = {}
    p["w1"], p["b1"] = _conv3x3_params(ks[0], in_channels, out_channels)
    p["w2"], p["b2"] = _conv3x3_params(ks[1], out_channels, out_channels)
    p["sc_w1"], p["sc_b1"] = _conv3x3_params(ks[2], out_channels, out_channels)
    p["sc_w2"], p["sc_b2"] = _conv3x3_params(ks[3], out_channels, out_channels)
    p["bn1_g"] = jnp.ones((out_channels,), jnp.float32)
    p["bn1_b"] = jnp.zeros((out_channels,), jnp.float32)
    p["bn2_g"] = jnp.ones((out_channels,), jnp.float32)
    p["bn2_b"] = jnp.zeros((out_channels,), jnp.float32)
    cr = out_channels // reduce
    b1 = 1.0 / (out_channels ** 0.5)
    p["se_w1"] = _uniform(ks[4], (out_channels, cr), b1)
    p["se_b1"] = _uniform(ks[5], (cr,), b1)
    b2 = 1.0 / (cr ** 0.5)
    p["se_w2"] = _uniform(ks[6], (cr, out_channels), b2)
    p["se_b2"] = _uniform(ks[7], (out_channels,), b2)
    return p


# ----------------------------- main ------------------------------

if __name__ == "__main__":
    key = jax.random.PRNGKey(0)
    kx, kp = jax.random.split(key)

    N, Cin, H, W = 2, 4, 16, 16
    Cout = 32                      # SeBlock reduce=16 -> squeeze width 2

    x = jax.random.normal(kx, (N, Cin, H, W), jnp.float32)
    params = init_down_params(kp, Cin, Cout)

    fwd = jax.jit(down_forward)
    y = jax.block_until_ready(fwd(x, params))

    assert y.shape == (N, Cout, H // 2, W // 2), y.shape
    assert bool(jnp.all(jnp.isfinite(y)))

    # Sanity-check against a pure-JAX f32 reference (tolerance covers the bf16 MXU inputs).
    y_ref = _down_reference(x, params)
    max_err = float(jnp.max(jnp.abs(y - y_ref)))
    scale = max(float(jnp.max(jnp.abs(y_ref))), 1.0)
    assert max_err <= 0.05 * scale, (max_err, scale)

    print("KERNEL_OK")
</pallas_src>

<mosaic_0001>
module attributes {stable_mosaic.version = 11 : i64} {
  func.func @_pool_conv_conv_kernel(%arg0: i32, %arg1: memref<8x2x8x2x4xf32, #tpu.memory_space<vmem>>, %arg2: memref<9x4x32xbf16, #tpu.memory_space<vmem>>, %arg3: memref<1x32xf32, #tpu.memory_space<vmem>>, %arg4: memref<9x32x32xbf16, #tpu.memory_space<vmem>>, %arg5: memref<1x32xf32, #tpu.memory_space<vmem>>, %arg6: memref<1x8x8x32xf32, #tpu.memory_space<vmem>>, %arg7: memref<10x10x4xf32, #tpu.memory_space<vmem>>, %arg8: memref<10x10x32xf32, #tpu.memory_space<vmem>>) attributes {dimension_semantics = [#tpu.dimension_semantics<parallel>], iteration_bounds = array<i64: 2>, scalar_prefetch = 0 : i64, scratch_operands = 2 : i64, tpu.core_type = #tpu.core_type<tc>, window_params = [{transform_indices = @transform_0, window_bounds = array<i64: 8, 2, 8, 2, 4>}, {pipeline_mode = #tpu.pipeline_mode<synchronous>, transform_indices = @transform_1, window_bounds = array<i64: 9, 4, 32>}, {pipeline_mode = #tpu.pipeline_mode<synchronous>, transform_indices = @transform_2, window_bounds = array<i64: 1, 32>}, {pipeline_mode = #tpu.pipeline_mode<synchronous>, transform_indices = @transform_3, window_bounds = array<i64: 9, 32, 32>}, {pipeline_mode = #tpu.pipeline_mode<synchronous>, transform_indices = @transform_4, window_bounds = array<i64: 1, 32>}, {transform_indices = @transform_5, window_bounds = array<i64: 1, 8, 8, 32>}]} {
    %c0 = arith.constant 0 : index
    %c0_0 = arith.constant 0 : index
    %c0_1 = arith.constant 0 : index
    %c0_2 = arith.constant 0 : index
    %c0_3 = arith.constant 0 : index
    %0 = vector.load %arg1[%c0, %c0_0, %c0_1, %c0_2, %c0_3] : memref<8x2x8x2x4xf32, #tpu.memory_space<vmem>>, vector<8x2x8x2x4xf32>
    %1 = vector.extract_strided_slice %0 {offsets = [0, 0, 0, 0, 0], sizes = [8, 1, 8, 2, 4], strides = [1, 1, 1, 1, 1]} : vector<8x2x8x2x4xf32> to vector<8x1x8x2x4xf32>
    %2 = vector.shape_cast %1 : vector<8x1x8x2x4xf32> to vector<8x8x2x4xf32>
    %3 = vector.extract_strided_slice %0 {offsets = [0, 1, 0, 0, 0], sizes = [8, 1, 8, 2, 4], strides = [1, 1, 1, 1, 1]} : vector<8x2x8x2x4xf32> to vector<8x1x8x2x4xf32>
    %4 = vector.shape_cast %3 : vector<8x1x8x2x4xf32> to vector<8x8x2x4xf32>
    %5 = arith.maximumf %2, %4 : vector<8x8x2x4xf32>
    %6 = vector.extract_strided_slice %5 {offsets = [0, 0, 0, 0], sizes = [8, 8, 1, 4], strides = [1, 1, 1, 1]} : vector<8x8x2x4xf32> to vector<8x8x1x4xf32>
    %7 = vector.shape_cast %6 : vector<8x8x1x4xf32> to vector<8x8x4xf32>
    %8 = vector.extract_strided_slice %5 {offsets = [0, 0, 1, 0], sizes = [8, 8, 1, 4], strides = [1, 1, 1, 1]} : vector<8x8x2x4xf32> to vector<8x8x1x4xf32>
    %9 = vector.shape_cast %8 : vector<8x8x1x4xf32> to vector<8x8x4xf32>
    %10 = arith.maximumf %7, %9 : vector<8x8x4xf32>
    %cst = arith.constant 0.000000e+00 : f32
    %11 = vector.broadcast %cst : f32 to vector<10x10x4xf32>
    %c0_4 = arith.constant 0 : index
    %c0_5 = arith.constant 0 : index
    %c0_6 = arith.constant 0 : index
    %12 = vector.load %arg7[%c0_4, %c0_5, %c0_6] : memref<10x10x4xf32, #tpu.memory_space<vmem>>, vector<10x10x4xf32>
    tpu.vector_store %arg7[%c0_4, %c0_5, %c0_6], %11 {strides = array<i32>} : memref<10x10x4xf32, #tpu.memory_space<vmem>>, vector<10x10x4xf32>,
    %c1 = arith.constant 1 : index
    %c1_7 = arith.constant 1 : index
    %c0_8 = arith.constant 0 : index
    %13 = vector.load %arg7[%c1, %c1_7, %c0_8] : memref<10x10x4xf32, #tpu.memory_space<vmem>>, vector<8x8x4xf32>
    tpu.vector_store %arg7[%c1, %c1_7, %c0_8], %10 {strides = array<i32>} : memref<10x10x4xf32, #tpu.memory_space<vmem>>, vector<8x8x4xf32>,
    %cst_9 = arith.constant 0.000000e+00 : f32
    %14 = vector.broadcast %cst_9 : f32 to vector<64x32xf32>
    %c0_10 = arith.constant 0 : index
    %c0_11 = arith.constant 0 : index
    %c0_12 = arith.constant 0 : index
    %15 = vector.load %arg7[%c0_10, %c0_11, %c0_12] : memref<10x10x4xf32, #tpu.memory_space<vmem>>, vector<8x8x4xf32>
    %16 = vector.shape_cast %15 : vector<8x8x4xf32> to vector<64x4xf32>
    %17 = arith.truncf %16 : vector<64x4xf32> to vector<64x4xbf16>
    %c0_13 = arith.constant 0 : index
    %c0_14 = arith.constant 0 : index
    %c0_15 = arith.constant 0 : index
    %18 = vector.load %arg2[%c0_13, %c0_14, %c0_15] : memref<9x4x32xbf16, #tpu.memory_space<vmem>>, vector<1x4x32xbf16>
    %19 = vector.shape_cast %18 : vector<1x4x32xbf16> to vector<4x32xbf16>
    %cst_16 = arith.constant dense<0.000000e+00> : vector<64x32xf32>
    %20 = tpu.matmul %17, %19, %cst_16 {dimension_numbers = #tpu.dot_dimension_numbers<[1], [0], [0], [1], [0, 0, 1, 1], [], []>} : vector<64x4xbf16>, vector<4x32xbf16>, vector<64x32xf32> -> vector<64x32xf32>
    %21 = arith.addf %14, %20 : vector<64x32xf32>
    %c0_17 = arith.constant 0 : index
    %c1_18 = arith.constant 1 : index
    %c0_19 = arith.constant 0 : index
    %22 = vector.load %arg7[%c0_17, %c1_18, %c0_19] : memref<10x10x4xf32, #tpu.memory_space<vmem>>, vector<8x8x4xf32>
    %23 = vector.shape_cast %22 : vector<8x8x4xf32> to vector<64x4xf32>
    %24 = arith.truncf %23 : vector<64x4xf32> to vector<64x4xbf16>
    %c1_20 = arith.constant 1 : index
    %c0_21 = arith.constant 0 : index
    %c0_22 = arith.constant 0 : index
    %25 = vector.load %arg2[%c1_20, %c0_21, %c0_22] : memref<9x4x32xbf16, #tpu.memory_space<vmem>>, vector<1x4x32xbf16>
    %26 = vector.shape_cast %25 : vector<1x4x32xbf16> to vector<4x32xbf16>
    %cst_23 = arith.constant dense<0.000000e+00> : vector<64x32xf32>
    %27 = tpu.matmul %24, %26, %cst_23 {dimension_numbers = #tpu.dot_dimension_numbers<[1], [0], [0], [1], [0, 0, 1, 1], [], []>} : vector<64x4xbf16>, vector<4x32xbf16>, vector<64x32xf32> -> vector<64x32xf32>
    %28 = arith.addf %21, %27 : vector<64x32xf32>
    %c0_24 = arith.constant 0 : index
    %c2 = arith.constant 2 : index
    %c0_25 = arith.constant 0 : index
    %29 = vector.load %arg7[%c0_24, %c2, %c0_25] : memref<10x10x4xf32, #tpu.memory_space<vmem>>, vector<8x8x4xf32>
    %30 = vector.shape_cast %29 : vector<8x8x4xf32> to vector<64x4xf32>
    %31 = arith.truncf %30 : vector<64x4xf32> to vector<64x4xbf16>
    %c2_26 = arith.constant 2 : index
    %c0_27 = arith.constant 0 : index
    %c0_28 = arith.constant 0 : index
    %32 = vector.load %arg2[%c2_26, %c0_27, %c0_28] : memref<9x4x32xbf16, #tpu.memory_space<vmem>>, vector<1x4x32xbf16>
    %33 = vector.shape_cast %32 : vector<1x4x32xbf16> to vector<4x32xbf16>
    %cst_29 = arith.constant dense<0.000000e+00> : vector<64x32xf32>
    %34 = tpu.matmul %31, %33, %cst_29 {dimension_numbers = #tpu.dot_dimension_numbers<[1], [0], [0], [1], [0, 0, 1, 1], [], []>} : vector<64x4xbf16>, vector<4x32xbf16>, vector<64x32xf32> -> vector<64x32xf32>
    %35 = arith.addf %28, %34 : vector<64x32xf32>
    %c1_30 = arith.constant 1 : index
    %c0_31 = arith.constant 0 : index
    %c0_32 = arith.constant 0 : index
    %36 = vector.load %arg7[%c1_30, %c0_31, %c0_32] : memref<10x10x4xf32, #tpu.memory_space<vmem>>, vector<8x8x4xf32>
    %37 = vector.shape_cast %36 : vector<8x8x4xf32> to vector<64x4xf32>
    %38 = arith.truncf %37 : vector<64x4xf32> to vector<64x4xbf16>
    %c3 = arith.constant 3 : index
    %c0_33 = arith.constant 0 : index
    %c0_34 = arith.constant 0 : index
    %39 = vector.load %arg2[%c3, %c0_33, %c0_34] : memref<9x4x32xbf16, #tpu.memory_space<vmem>>, vector<1x4x32xbf16>
    %40 = vector.shape_cast %39 : vector<1x4x32xbf16> to vector<4x32xbf16>
    %cst_35 = arith.constant dense<0.000000e+00> : vector<64x32xf32>
    %41 = tpu.matmul %38, %40, %cst_35 {dimension_numbers = #tpu.dot_dimension_numbers<[1], [0], [0], [1], [0, 0, 1, 1], [], []>} : vector<64x4xbf16>, vector<4x32xbf16>, vector<64x32xf32> -> vector<64x32xf32>
    %42 = arith.addf %35, %41 : vector<64x32xf32>
    %c1_36 = arith.constant 1 : index
    %c1_37 = arith.constant 1 : index
    %c0_38 = arith.constant 0 : index
    %43 = vector.load %arg7[%c1_36, %c1_37, %c0_38] : memref<10x10x4xf32, #tpu.memory_space<vmem>>, vector<8x8x4xf32>
    %44 = vector.shape_cast %43 : vector<8x8x4xf32> to vector<64x4xf32>
    %45 = arith.truncf %44 : vector<64x4xf32> to vector<64x4xbf16>
    %c4 = arith.constant 4 : index
    %c0_39 = arith.constant 0 : index
    %c0_40 = arith.constant 0 : index
    %46 = vector.load %arg2[%c4, %c0_39, %c0_40] : memref<9x4x32xbf16, #tpu.memory_space<vmem>>, vector<1x4x32xbf16>
    %47 = vector.shape_cast %46 : vector<1x4x32xbf16> to vector<4x32xbf16>
    %cst_41 = arith.constant dense<0.000000e+00> : vector<64x32xf32>
    %48 = tpu.matmul %45, %47, %cst_41 {dimension_numbers = #tpu.dot_dimension_numbers<[1], [0], [0], [1], [0, 0, 1, 1], [], []>} : vector<64x4xbf16>, vector<4x32xbf16>, vector<64x32xf32> -> vector<64x32xf32>
    %49 = arith.addf %42, %48 : vector<64x32xf32>
    %c1_42 = arith.constant 1 : index
    %c2_43 = arith.constant 2 : index
    %c0_44 = arith.constant 0 : index
    %50 = vector.load %arg7[%c1_42, %c2_43, %c0_44] : memref<10x10x4xf32, #tpu.memory_space<vmem>>, vector<8x8x4xf32>
    %51 = vector.shape_cast %50 : vector<8x8x4xf32> to vector<64x4xf32>
    %52 = arith.truncf %51 : vector<64x4xf32> to vector<64x4xbf16>
    %c5 = arith.constant 5 : index
    %c0_45 = arith.constant 0 : index
    %c0_46 = arith.constant 0 : index
    %53 = vector.load %arg2[%c5, %c0_45, %c0_46] : memref<9x4x32xbf16, #tpu.memory_space<vmem>>, vector<1x4x32xbf16>
    %54 = vector.shape_cast %53 : vector<1x4x32xbf16> to vector<4x32xbf16>
    %cst_47 = arith.constant dense<0.000000e+00> : vector<64x32xf32>
    %55 = tpu.matmul %52, %54, %cst_47 {dimension_numbers = #tpu.dot_dimension_numbers<[1], [0], [0], [1], [0, 0, 1, 1], [], []>} : vector<64x4xbf16>, vector<4x32xbf16>, vector<64x32xf32> -> vector<64x32xf32>
    %56 = arith.addf %49, %55 : vector<64x32xf32>
    %c2_48 = arith.constant 2 : index
    %c0_49 = arith.constant 0 : index
    %c0_50 = arith.constant 0 : index
    %57 = vector.load %arg7[%c2_48, %c0_49, %c0_50] : memref<10x10x4xf32, #tpu.memory_space<vmem>>, vector<8x8x4xf32>
    %58 = vector.shape_cast %57 : vector<8x8x4xf32> to vector<64x4xf32>
    %59 = arith.truncf %58 : vector<64x4xf32> to vector<64x4xbf16>
    %c6 = arith.constant 6 : index
    %c0_51 = arith.constant 0 : index
    %c0_52 = arith.constant 0 : index
    %60 = vector.load %arg2[%c6, %c0_51, %c0_52] : memref<9x4x32xbf16, #tpu.memory_space<vmem>>, vector<1x4x32xbf16>
    %61 = vector.shape_cast %60 : vector<1x4x32xbf16> to vector<4x32xbf16>
    %cst_53 = arith.constant dense<0.000000e+00> : vector<64x32xf32>
    %62 = tpu.matmul %59, %61, %cst_53 {dimension_numbers = #tpu.dot_dimension_numbers<[1], [0], [0], [1], [0, 0, 1, 1], [], []>} : vector<64x4xbf16>, vector<4x32xbf16>, vector<64x32xf32> -> vector<64x32xf32>
    %63 = arith.addf %56, %62 : vector<64x32xf32>
    %c2_54 = arith.constant 2 : index
    %c1_55 = arith.constant 1 : index
    %c0_56 = arith.constant 0 : index
    %64 = vector.load %arg7[%c2_54, %c1_55, %c0_56] : memref<10x10x4xf32, #tpu.memory_space<vmem>>, vector<8x8x4xf32>
    %65 = vector.shape_cast %64 : vector<8x8x4xf32> to vector<64x4xf32>
    %66 = arith.truncf %65 : vector<64x4xf32> to vector<64x4xbf16>
    %c7 = arith.constant 7 : index
    %c0_57 = arith.constant 0 : index
    %c0_58 = arith.constant 0 : index
    %67 = vector.load %arg2[%c7, %c0_57, %c0_58] : memref<9x4x32xbf16, #tpu.memory_space<vmem>>, vector<1x4x32xbf16>
    %68 = vector.shape_cast %67 : vector<1x4x32xbf16> to vector<4x32xbf16>
    %cst_59 = arith.constant dense<0.000000e+00> : vector<64x32xf32>
    %69 = tpu.matmul %66, %68, %cst_59 {dimension_numbers = #tpu.dot_dimension_numbers<[1], [0], [0], [1], [0, 0, 1, 1], [], []>} : vector<64x4xbf16>, vector<4x32xbf16>, vector<64x32xf32> -> vector<64x32xf32>
    %70 = arith.addf %63, %69 : vector<64x32xf32>
    %c2_60 = arith.constant 2 : index
    %c2_61 = arith.constant 2 : index
    %c0_62 = arith.constant 0 : index
    %71 = vector.load %arg7[%c2_60, %c2_61, %c0_62] : memref<10x10x4xf32, #tpu.memory_space<vmem>>, vector<8x8x4xf32>
    %72 = vector.shape_cast %71 : vector<8x8x4xf32> to vector<64x4xf32>
    %73 = arith.truncf %72 : vector<64x4xf32> to vector<64x4xbf16>
    %c8 = arith.constant 8 : index
    %c0_63 = arith.constant 0 : index
    %c0_64 = arith.constant 0 : index
    %74 = vector.load %arg2[%c8, %c0_63, %c0_64] : memref<9x4x32xbf16, #tpu.memory_space<vmem>>, vector<1x4x32xbf16>
    %75 = vector.shape_cast %74 : vector<1x4x32xbf16> to vector<4x32xbf16>
    %cst_65 = arith.constant dense<0.000000e+00> : vector<64x32xf32>
    %76 = tpu.matmul %73, %75, %cst_65 {dimension_numbers = #tpu.dot_dimension_numbers<[1], [0], [0], [1], [0, 0, 1, 1], [], []>} : vector<64x4xbf16>, vector<4x32xbf16>, vector<64x32xf32> -> vector<64x32xf32>
    %77 = arith.addf %70, %76 : vector<64x32xf32>
    %c0_66 = arith.constant 0 : index
    %c0_67 = arith.constant 0 : index
    %78 = vector.load %arg3[%c0_66, %c0_67] : memref<1x32xf32, #tpu.memory_space<vmem>>, vector<1x32xf32>
    %79 = vector.broadcast %78 : vector<1x32xf32> to vector<64x32xf32>
    %80 = arith.addf %77, %79 : vector<64x32xf32>
    %cst_68 = arith.constant 0.000000e+00 : f32
    %81 = vector.broadcast %cst_68 : f32 to vector<64x32xf32>
    %82 = arith.maximumf %80, %81 : vector<64x32xf32>
    %83 = vector.shape_cast %82 : vector<64x32xf32> to vector<8x8x32xf32>
    %cst_69 = arith.constant 0.000000e+00 : f32
    %84 = vector.broadcast %cst_69 : f32 to vector<10x10x32xf32>
    %c0_70 = arith.constant 0 : index
    %c0_71 = arith.constant 0 : index
    %c0_72 = arith.constant 0 : index
    %85 = vector.load %arg8[%c0_70, %c0_71, %c0_72] : memref<10x10x32xf32, #tpu.memory_space<vmem>>, vector<10x10x32xf32>
    tpu.vector_store %arg8[%c0_70, %c0_71, %c0_72], %84 {strides = array<i32>} : memref<10x10x32xf32, #tpu.memory_space<vmem>>, vector<10x10x32xf32>,
    %c1_73 = arith.constant 1 : index
    %c1_74 = arith.constant 1 : index
    %c0_75 = arith.constant 0 : index
    %86 = vector.load %arg8[%c1_73, %c1_74, %c0_75] : memref<10x10x32xf32, #tpu.memory_space<vmem>>, vector<8x8x32xf32>
    tpu.vector_store %arg8[%c1_73, %c1_74, %c0_75], %83 {strides = array<i32>} : memref<10x10x32xf32, #tpu.memory_space<vmem>>, vector<8x8x32xf32>,
    %cst_76 = arith.constant 0.000000e+00 : f32
    %87 = vector.broadcast %cst_76 : f32 to vector<64x32xf32>
    %c0_77 = arith.constant 0 : index
    %c0_78 = arith.constant 0 : index
    %c0_79 = arith.constant 0 : index
    %88 = vector.load %arg8[%c0_77, %c0_78, %c0_79] : memref<10x10x32xf32, #tpu.memory_space<vmem>>, vector<8x8x32xf32>
    %89 = vector.shape_cast %88 : vector<8x8x32xf32> to vector<64x32xf32>
    %90 = arith.truncf %89 : vector<64x32xf32> to vector<64x32xbf16>
    %c0_80 = arith.constant 0 : index
    %c0_81 = arith.constant 0 : index
    %c0_82 = arith.constant 0 : index
    %91 = vector.load %arg4[%c0_80, %c0_81, %c0_82] : memref<9x32x32xbf16, #tpu.memory_space<vmem>>, vector<1x32x32xbf16>
    %92 = vector.shape_cast %91 : vector<1x32x32xbf16> to vector<32x32xbf16>
    %cst_83 = arith.constant dense<0.000000e+00> : vector<64x32xf32>
    %93 = tpu.matmul %90, %92, %cst_83 {dimension_numbers = #tpu.dot_dimension_numbers<[1], [0], [0], [1], [0, 0, 1, 1], [], []>} : vector<64x32xbf16>, vector<32x32xbf16>, vector<64x32xf32> -> vector<64x32xf32>
    %94 = arith.addf %87, %93 : vector<64x32xf32>
    %c0_84 = arith.constant 0 : index
    %c1_85 = arith.constant 1 : index
    %c0_86 = arith.constant 0 : index
    %95 = vector.load %arg8[%c0_84, %c1_85, %c0_86] : memref<10x10x32xf32, #tpu.memory_space<vmem>>, vector<8x8x32xf32>
    %96 = vector.shape_cast %95 : vector<8x8x32xf32> to vector<64x32xf32>
    %97 = arith.truncf %96 : vector<64x32xf32> to vector<64x32xbf16>
    %c1_87 = arith.constant 1 : index
    %c0_88 = arith.constant 0 : index
    %c0_89 = arith.constant 0 : index
    %98 = vector.load %arg4[%c1_87, %c0_88, %c0_89] : memref<9x32x32xbf16, #tpu.memory_space<vmem>>, vector<1x32x32xbf16>
    %99 = vector.shape_cast %98 : vector<1x32x32xbf16> to vector<32x32xbf16>
    %cst_90 = arith.constant dense<0.000000e+00> : vector<64x32xf32>
    %100 = tpu.matmul %97, %99, %cst_90 {dimension_numbers = #tpu.dot_dimension_numbers<[1], [0], [0], [1], [0, 0, 1, 1], [], []>} : vector<64x32xbf16>, vector<32x32xbf16>, vector<64x32xf32> -> vector<64x32xf32>
    %101 = arith.addf %94, %100 : vector<64x32xf32>
    %c0_91 = arith.constant 0 : index
    %c2_92 = arith.constant 2 : index
    %c0_93 = arith.constant 0 : index
    %102 = vector.load %arg8[%c0_91, %c2_92, %c0_93] : memref<10x10x32xf32, #tpu.memory_space<vmem>>, vector<8x8x32xf32>
    %103 = vector.shape_cast %102 : vector<8x8x32xf32> to vector<64x32xf32>
    %104 = arith.truncf %103 : vector<64x32xf32> to vector<64x32xbf16>
    %c2_94 = arith.constant 2 : index
    %c0_95 = arith.constant 0 : index
    %c0_96 = arith.constant 0 : index
    %105 = vector.load %arg4[%c2_94, %c0_95, %c0_96] : memref<9x32x32xbf16, #tpu.memory_space<vmem>>, vector<1x32x32xbf16>
    %106 = vector.shape_cast %105 : vector<1x32x32xbf16> to vector<32x32xbf16>
    %cst_97 = arith.constant dense<0.000000e+00> : vector<64x32xf32>
    %107 = tpu.matmul %104, %106, %cst_97 {dimension_numbers = #tpu.dot_dimension_numbers<[1], [0], [0], [1], [0, 0, 1, 1], [], []>} : vector<64x32xbf16>, vector<32x32xbf16>, vector<64x32xf32> -> vector<64x32xf32>
    %108 = arith.addf %101, %107 : vector<64x32xf32>
    %c1_98 = arith.constant 1 : index
    %c0_99 = arith.constant 0 : index
    %c0_100 = arith.constant 0 : index
    %109 = vector.load %arg8[%c1_98, %c0_99, %c0_100] : memref<10x10x32xf32, #tpu.memory_space<vmem>>, vector<8x8x32xf32>
    %110 = vector.shape_cast %109 : vector<8x8x32xf32> to vector<64x32xf32>
    %111 = arith.truncf %110 : vector<64x32xf32> to vector<64x32xbf16>
    %c3_101 = arith.constant 3 : index
    %c0_102 = arith.constant 0 : index
    %c0_103 = arith.constant 0 : index
    %112 = vector.load %arg4[%c3_101, %c0_102, %c0_103] : memref<9x32x32xbf16, #tpu.memory_space<vmem>>, vector<1x32x32xbf16>
    %113 = vector.shape_cast %112 : vector<1x32x32xbf16> to vector<32x32xbf16>
    %cst_104 = arith.constant dense<0.000000e+00> : vector<64x32xf32>
    %114 = tpu.matmul %111, %113, %cst_104 {dimension_numbers = #tpu.dot_dimension_numbers<[1], [0], [0], [1], [0, 0, 1, 1], [], []>} : vector<64x32xbf16>, vector<32x32xbf16>, vector<64x32xf32> -> vector<64x32xf32>
    %115 = arith.addf %108, %114 : vector<64x32xf32>
    %c1_105 = arith.constant 1 : index
    %c1_106 = arith.constant 1 : index
    %c0_107 = arith.constant 0 : index
    %116 = vector.load %arg8[%c1_105, %c1_106, %c0_107] : memref<10x10x32xf32, #tpu.memory_space<vmem>>, vector<8x8x32xf32>
    %117 = vector.shape_cast %116 : vector<8x8x32xf32> to vector<64x32xf32>
    %118 = arith.truncf %117 : vector<64x32xf32> to vector<64x32xbf16>
    %c4_108 = arith.constant 4 : index
    %c0_109 = arith.constant 0 : index
    %c0_110 = arith.constant 0 : index
    %119 = vector.load %arg4[%c4_108, %c0_109, %c0_110] : memref<9x32x32xbf16, #tpu.memory_space<vmem>>, vector<1x32x32xbf16>
    %120 = vector.shape_cast %119 : vector<1x32x32xbf16> to vector<32x32xbf16>
    %cst_111 = arith.constant dense<0.000000e+00> : vector<64x32xf32>
    %121 = tpu.matmul %118, %120, %cst_111 {dimension_numbers = #tpu.dot_dimension_numbers<[1], [0], [0], [1], [0, 0, 1, 1], [], []>} : vector<64x32xbf16>, vector<32x32xbf16>, vector<64x32xf32> -> vector<64x32xf32>
    %122 = arith.addf %115, %121 : vector<64x32xf32>
    %c1_112 = arith.constant 1 : index
    %c2_113 = arith.constant 2 : index
    %c0_114 = arith.constant 0 : index
    %123 = vector.load %arg8[%c1_112, %c2_113, %c0_114] : memref<10x10x32xf32, #tpu.memory_space<vmem>>, vector<8x8x32xf32>
    %124 = vector.shape_cast %123 : vector<8x8x32xf32> to vector<64x32xf32>
    %125 = arith.truncf %124 : vector<64x32xf32> to vector<64x32xbf16>
    %c5_115 = arith.constant 5 : index
    %c0_116 = arith.constant 0 : index
    %c0_117 = arith.constant 0 : index
    %126 = vector.load %arg4[%c5_115, %c0_116, %c0_117] : memref<9x32x32xbf16, #tpu.memory_space<vmem>>, vector<1x32x32xbf16>
    %127 = vector.shape_cast %126 : vector<1x32x32xbf16> to vector<32x32xbf16>
    %cst_118 = arith.constant dense<0.000000e+00> : vector<64x32xf32>
    %128 = tpu.matmul %125, %127, %cst_118 {dimension_numbers = #tpu.dot_dimension_numbers<[1], [0], [0], [1], [0, 0, 1, 1], [], []>} : vector<64x32xbf16>, vector<32x32xbf16>, vector<64x32xf32> -> vector<64x32xf32>
    %129 = arith.addf %122, %128 : vector<64x32xf32>
    %c2_119 = arith.constant 2 : index
    %c0_120 = arith.constant 0 : index
    %c0_121 = arith.constant 0 : index
    %130 = vector.load %arg8[%c2_119, %c0_120, %c0_121] : memref<10x10x32xf32, #tpu.memory_space<vmem>>, vector<8x8x32xf32>
    %131 = vector.shape_cast %130 : vector<8x8x32xf32> to vector<64x32xf32>
    %132 = arith.truncf %131 : vector<64x32xf32> to vector<64x32xbf16>
    %c6_122 = arith.constant 6 : index
    %c0_123 = arith.constant 0 : index
    %c0_124 = arith.constant 0 : index
    %133 = vector.load %arg4[%c6_122, %c0_123, %c0_124] : memref<9x32x32xbf16, #tpu.memory_space<vmem>>, vector<1x32x32xbf16>
    %134 = vector.shape_cast %133 : vector<1x32x32xbf16> to vector<32x32xbf16>
    %cst_125 = arith.constant dense<0.000000e+00> : vector<64x32xf32>
    %135 = tpu.matmul %132, %134, %cst_125 {dimension_numbers = #tpu.dot_dimension_numbers<[1], [0], [0], [1], [0, 0, 1, 1], [], []>} : vector<64x32xbf16>, vector<32x32xbf16>, vector<64x32xf32> -> vector<64x32xf32>
    %136 = arith.addf %129, %135 : vector<64x32xf32>
    %c2_126 = arith.constant 2 : index
    %c1_127 = arith.constant 1 : index
    %c0_128 = arith.constant 0 : index
    %137 = vector.load %arg8[%c2_126, %c1_127, %c0_128] : memref<10x10x32xf32, #tpu.memory_space<vmem>>, vector<8x8x32xf32>
    %138 = vector.shape_cast %137 : vector<8x8x32xf32> to vector<64x32xf32>
    %139 = arith.truncf %138 : vector<64x32xf32> to vector<64x32xbf16>
    %c7_129 = arith.constant 7 : index
    %c0_130 = arith.constant 0 : index
    %c0_131 = arith.constant 0 : index
    %140 = vector.load %arg4[%c7_129, %c0_130, %c0_131] : memref<9x32x32xbf16, #tpu.memory_space<vmem>>, vector<1x32x32xbf16>
    %141 = vector.shape_cast %140 : vector<1x32x32xbf16> to vector<32x32xbf16>
    %cst_132 = arith.constant dense<0.000000e+00> : vector<64x32xf32>
    %142 = tpu.matmul %139, %141, %cst_132 {dimension_numbers = #tpu.dot_dimension_numbers<[1], [0], [0], [1], [0, 0, 1, 1], [], []>} : vector<64x32xbf16>, vector<32x32xbf16>, vector<64x32xf32> -> vector<64x32xf32>
    %143 = arith.addf %136, %142 : vector<64x32xf32>
    %c2_133 = arith.constant 2 : index
    %c2_134 = arith.constant 2 : index
    %c0_135 = arith.constant 0 : index
    %144 = vector.load %arg8[%c2_133, %c2_134, %c0_135] : memref<10x10x32xf32, #tpu.memory_space<vmem>>, vector<8x8x32xf32>
    %145 = vector.shape_cast %144 : vector<8x8x32xf32> to vector<64x32xf32>
    %146 = arith.truncf %145 : vector<64x32xf32> to vector<64x32xbf16>
    %c8_136 = arith.constant 8 : index
    %c0_137 = arith.constant 0 : index
    %c0_138 = arith.constant 0 : index
    %147 = vector.load %arg4[%c8_136, %c0_137, %c0_138] : memref<9x32x32xbf16, #tpu.memory_space<vmem>>, vector<1x32x32xbf16>
    %148 = vector.shape_cast %147 : vector<1x32x32xbf16> to vector<32x32xbf16>
    %cst_139 = arith.constant dense<0.000000e+00> : vector<64x32xf32>
    %149 = tpu.matmul %146, %148, %cst_139 {dimension_numbers = #tpu.dot_dimension_numbers<[1], [0], [0], [1], [0, 0, 1, 1], [], []>} : vector<64x32xbf16>, vector<32x32xbf16>, vector<64x32xf32> -> vector<64x32xf32>
    %150 = arith.addf %143, %149 : vector<64x32xf32>
    %c0_140 = arith.constant 0 : index
    %c0_141 = arith.constant 0 : index
    %151 = vector.load %arg5[%c0_140, %c0_141] : memref<1x32xf32, #tpu.memory_space<vmem>>, vector<1x32xf32>
    %152 = vector.broadcast %151 : vector<1x32xf32> to vector<64x32xf32>
    %153 = arith.addf %150, %152 : vector<64x32xf32>
    %cst_142 = arith.constant 0.000000e+00 : f32
    %154 = vector.broadcast %cst_142 : f32 to vector<64x32xf32>
    %155 = arith.maximumf %153, %154 : vector<64x32xf32>
    %156 = vector.shape_cast %155 : vector<64x32xf32> to vector<1x8x8x32xf32>
    %c0_143 = arith.constant 0 : index
    %c0_144 = arith.constant 0 : index
    %c0_145 = arith.constant 0 : index
    %c0_146 = arith.constant 0 : index
    %157 = vector.load %arg6[%c0_143, %c0_144, %c0_145, %c0_146] : memref<1x8x8x32xf32, #tpu.memory_space<vmem>>, vector<1x8x8x32xf32>
    tpu.vector_store %arg6[%c0_143, %c0_144, %c0_145, %c0_146], %156 {strides = array<i32>} : memref<1x8x8x32xf32, #tpu.memory_space<vmem>>, vector<1x8x8x32xf32>,
    return
  }
  func.func @transform_0(%arg0: i32) -> (i32, i32, i32, i32, i32) {
    %c0_i32 = arith.constant 0 : i32
    %c0_i32_0 = arith.constant 0 : i32
    %c0_i32_1 = arith.constant 0 : i32
    %c0_i32_2 = arith.constant 0 : i32
    %c0_i32_3 = arith.constant 0 : i32
    return %arg0, %c0_i32, %c0_i32_0, %c0_i32_1, %c0_i32_2 : i32, i32, i32, i32, i32
  }
  func.func @transform_1(%arg0: i32) -> (i32, i32, i32) {
    %c0_i32 = arith.constant 0 : i32
    %c0_i32_0 = arith.constant 0 : i32
    %c0_i32_1 = arith.constant 0 : i32
    %c0_i32_2 = arith.constant 0 : i32
    return %c0_i32, %c0_i32_0, %c0_i32_1 : i32, i32, i32
  }
  func.func @transform_2(%arg0: i32) -> (i32, i32) {
    %c0_i32 = arith.constant 0 : i32
    %c0_i32_0 = arith.constant 0 : i32
    %c0_i32_1 = arith.constant 0 : i32
    return %c0_i32, %c0_i32_0 : i32, i32
  }
  func.func @transform_3(%arg0: i32) -> (i32, i32, i32) {
    %c0_i32 = arith.constant 0 : i32
    %c0_i32_0 = arith.constant 0 : i32
    %c0_i32_1 = arith.constant 0 : i32
    %c0_i32_2 = arith.constant 0 : i32
    return %c0_i32, %c0_i32_0, %c0_i32_1 : i32, i32, i32
  }
  func.func @transform_4(%arg0: i32) -> (i32, i32) {
    %c0_i32 = arith.constant 0 : i32
    %c0_i32_0 = arith.constant 0 : i32
    %c0_i32_1 = arith.constant 0 : i32
    return %c0_i32, %c0_i32_0 : i32, i32
  }
  func.func @transform_5(%arg0: i32) -> (i32, i32, i32, i32) {
    %c0_i32 = arith.constant 0 : i32
    %c0_i32_0 = arith.constant 0 : i32
    %c0_i32_1 = arith.constant 0 : i32
    %c0_i32_2 = arith.constant 0 : i32
    return %arg0, %c0_i32, %c0_i32_0, %c0_i32_1 : i32, i32, i32, i32
  }
}

module attributes {stable_mosaic.version = 11 : i64} {
  func.func @_seblock_kernel(%arg0: memref<2x8x8x32xf32, #tpu.memory_space<vmem>>, %arg1: memref<9x32x32xbf16, #tpu.memory_space<vmem>>, %arg2: memref<1x32xf32, #tpu.memory_space<vmem>>, %arg3: memref<1x32xf32, #tpu.memory_space<vmem>>, %arg4: memref<1x32xf32, #tpu.memory_space<vmem>>, %arg5: memref<9x32x32xbf16, #tpu.memory_space<vmem>>, %arg6: memref<1x32xf32, #tpu.memory_space<vmem>>, %arg7: memref<1x32xf32, #tpu.memory_space<vmem>>, %arg8: memref<1x32xf32, #tpu.memory_space<vmem>>, %arg9: memref<32x2xf32, #tpu.memory_space<vmem>>, %arg10: memref<1x2xf32, #tpu.memory_space<vmem>>, %arg11: memref<2x32xf32, #tpu.memory_space<vmem>>, %arg12: memref<1x32xf32, #tpu.memory_space<vmem>>, %arg13: memref<2x8x8x32xf32, #tpu.memory_space<vmem>>, %arg14: memref<2x10x10x32xf32, #tpu.memory_space<vmem>>) attributes {dimension_semantics = [], scalar_prefetch = 0 : i64, scratch_operands = 1 : i64, tpu.core_type = #tpu.core_type<tc>} {
    %c0 = arith.constant 0 : index
    %c0_0 = arith.constant 0 : index
    %c0_1 = arith.constant 0 : index
    %c0_2 = arith.constant 0 : index
    %0 = vector.load %arg0[%c0, %c0_0, %c0_1, %c0_2] : memref<2x8x8x32xf32, #tpu.memory_space<vmem>>, vector<2x8x8x32xf32>
    %cst = arith.constant 0.000000e+00 : f32
    %1 = vector.broadcast %cst : f32 to vector<2x10x10x32xf32>
    %c0_3 = arith.constant 0 : index
    %c0_4 = arith.constant 0 : index
    %c0_5 = arith.constant 0 : index
    %c0_6 = arith.constant 0 : index
    %2 = vector.load %arg14[%c0_3, %c0_4, %c0_5, %c0_6] : memref<2x10x10x32xf32, #tpu.memory_space<vmem>>, vector<2x10x10x32xf32>
    tpu.vector_store %arg14[%c0_3, %c0_4, %c0_5, %c0_6], %1 {strides = array<i32>} : memref<2x10x10x32xf32, #tpu.memory_space<vmem>>, vector<2x10x10x32xf32>,
    %c0_7 = arith.constant 0 : index
    %c1 = arith.constant 1 : index
    %c1_8 = arith.constant 1 : index
    %c0_9 = arith.constant 0 : index
    %3 = vector.load %arg14[%c0_7, %c1, %c1_8, %c0_9] : memref<2x10x10x32xf32, #tpu.memory_space<vmem>>, vector<2x8x8x32xf32>
    tpu.vector_store %arg14[%c0_7, %c1, %c1_8, %c0_9], %0 {strides = array<i32>} : memref<2x10x10x32xf32, #tpu.memory_space<vmem>>, vector<2x8x8x32xf32>,
    %cst_10 = arith.constant 0.000000e+00 : f32
    %4 = vector.broadcast %cst_10 : f32 to vector<128x32xf32>
    %c0_11 = arith.constant 0 : index
    %c0_12 = arith.constant 0 : index
    %c0_13 = arith.constant 0 : index
    %c0_14 = arith.constant 0 : index
    %5 = vector.load %arg14[%c0_11, %c0_12, %c0_13, %c0_14] : memref<2x10x10x32xf32, #tpu.memory_space<vmem>>, vector<2x8x8x32xf32>
    %6 = vector.shape_cast %5 : vector<2x8x8x32xf32> to vector<128x32xf32>
    %7 = arith.truncf %6 : vector<128x32xf32> to vector<128x32xbf16>
    %c0_15 = arith.constant 0 : index
    %c0_16 = arith.constant 0 : index
    %c0_17 = arith.constant 0 : index
    %8 = vector.load %arg1[%c0_15, %c0_16, %c0_17] : memref<9x32x32xbf16, #tpu.memory_space<vmem>>, vector<1x32x32xbf16>
    %9 = vector.shape_cast %8 : vector<1x32x32xbf16> to vector<32x32xbf16>
    %cst_18 = arith.constant dense<0.000000e+00> : vector<128x32xf32>
    %10 = tpu.matmul %7, %9, %cst_18 {dimension_numbers = #tpu.dot_dimension_numbers<[1], [0], [0], [1], [0, 0, 1, 1], [], []>} : vector<128x32xbf16>, vector<32x32xbf16>, vector<128x32xf32> -> vector<128x32xf32>
    %11 = arith.addf %4, %10 : vector<128x32xf32>
    %c0_19 = arith.constant 0 : index
    %c0_20 = arith.constant 0 : index
    %c1_21 = arith.constant 1 : index
    %c0_22 = arith.constant 0 : index
    %12 = vector.load %arg14[%c0_19, %c0_20, %c1_21, %c0_22] : memref<2x10x10x32xf32, #tpu.memory_space<vmem>>, vector<2x8x8x32xf32>
    %13 = vector.shape_cast %12 : vector<2x8x8x32xf32> to vector<128x32xf32>
    %14 = arith.truncf %13 : vector<128x32xf32> to vector<128x32xbf16>
    %c1_23 = arith.constant 1 : index
    %c0_24 = arith.constant 0 : index
    %c0_25 = arith.constant 0 : index
    %15 = vector.load %arg1[%c1_23, %c0_24, %c0_25] : memref<9x32x32xbf16, #tpu.memory_space<vmem>>, vector<1x32x32xbf16>
    %16 = vector.shape_cast %15 : vector<1x32x32xbf16> to vector<32x32xbf16>
    %cst_26 = arith.constant dense<0.000000e+00> : vector<128x32xf32>
    %17 = tpu.matmul %14, %16, %cst_26 {dimension_numbers = #tpu.dot_dimension_numbers<[1], [0], [0], [1], [0, 0, 1, 1], [], []>} : vector<128x32xbf16>, vector<32x32xbf16>, vector<128x32xf32> -> vector<128x32xf32>
    %18 = arith.addf %11, %17 : vector<128x32xf32>
    %c0_27 = arith.constant 0 : index
    %c0_28 = arith.constant 0 : index
    %c2 = arith.constant 2 : index
    %c0_29 = arith.constant 0 : index
    %19 = vector.load %arg14[%c0_27, %c0_28, %c2, %c0_29] : memref<2x10x10x32xf32, #tpu.memory_space<vmem>>, vector<2x8x8x32xf32>
    %20 = vector.shape_cast %19 : vector<2x8x8x32xf32> to vector<128x32xf32>
    %21 = arith.truncf %20 : vector<128x32xf32> to vector<128x32xbf16>
    %c2_30 = arith.constant 2 : index
    %c0_31 = arith.constant 0 : index
    %c0_32 = arith.constant 0 : index
    %22 = vector.load %arg1[%c2_30, %c0_31, %c0_32] : memref<9x32x32xbf16, #tpu.memory_space<vmem>>, vector<1x32x32xbf16>
    %23 = vector.shape_cast %22 : vector<1x32x32xbf16> to vector<32x32xbf16>
    %cst_33 = arith.constant dense<0.000000e+00> : vector<128x32xf32>
    %24 = tpu.matmul %21, %23, %cst_33 {dimension_numbers = #tpu.dot_dimension_numbers<[1], [0], [0], [1], [0, 0, 1, 1], [], []>} : vector<128x32xbf16>, vector<32x32xbf16>, vector<128x32xf32> -> vector<128x32xf32>
    %25 = arith.addf %18, %24 : vector<128x32xf32>
    %c0_34 = arith.constant 0 : index
    %c1_35 = arith.constant 1 : index
    %c0_36 = arith.constant 0 : index
    %c0_37 = arith.constant 0 : index
    %26 = vector.load %arg14[%c0_34, %c1_35, %c0_36, %c0_37] : memref<2x10x10x32xf32, #tpu.memory_space<vmem>>, vector<2x8x8x32xf32>
    %27 = vector.shape_cast %26 : vector<2x8x8x32xf32> to vector<128x32xf32>
    %28 = arith.truncf %27 : vector<128x32xf32> to vector<128x32xbf16>
    %c3 = arith.constant 3 : index
    %c0_38 = arith.constant 0 : index
    %c0_39 = arith.constant 0 : index
    %29 = vector.load %arg1[%c3, %c0_38, %c0_39] : memref<9x32x32xbf16, #tpu.memory_space<vmem>>, vector<1x32x32xbf16>
    %30 = vector.shape_cast %29 : vector<1x32x32xbf16> to vector<32x32xbf16>
    %cst_40 = arith.constant dense<0.000000e+00> : vector<128x32xf32>
    %31 = tpu.matmul %28, %30, %cst_40 {dimension_numbers = #tpu.dot_dimension_numbers<[1], [0], [0], [1], [0, 0, 1, 1], [], []>} : vector<128x32xbf16>, vector<32x32xbf16>, vector<128x32xf32> -> vector<128x32xf32>
    %32 = arith.addf %25, %31 : vector<128x32xf32>
    %c0_41 = arith.constant 0 : index
    %c1_42 = arith.constant 1 : index
    %c1_43 = arith.constant 1 : index
    %c0_44 = arith.constant 0 : index
    %33 = vector.load %arg14[%c0_41, %c1_42, %c1_43, %c0_44] : memref<2x10x10x32xf32, #tpu.memory_space<vmem>>, vector<2x8x8x32xf32>
    %34 = vector.shape_cast %33 : vector<2x8x8x32xf32> to vector<128x32xf32>
    %35 = arith.truncf %34 : vector<128x32xf32> to vector<128x32xbf16>
    %c4 = arith.constant 4 : index
    %c0_45 = arith.constant 0 : index
    %c0_46 = arith.constant 0 : index
    %36 = vector.load %arg1[%c4, %c0_45, %c0_46] : memref<9x32x32xbf16, #tpu.memory_space<vmem>>, vector<1x32x32xbf16>
    %37 = vector.shape_cast %36 : vector<1x32x32xbf16> to vector<32x32xbf16>
    %cst_47 = arith.constant dense<0.000000e+00> : vector<128x32xf32>
    %38 = tpu.matmul %35, %37, %cst_47 {dimension_numbers = #tpu.dot_dimension_numbers<[1], [0], [0], [1], [0, 0, 1, 1], [], []>} : vector<128x32xbf16>, vector<32x32xbf16>, vector<128x32xf32> -> vector<128x32xf32>
    %39 = arith.addf %32, %38 : vector<128x32xf32>
    %c0_48 = arith.constant 0 : index
    %c1_49 = arith.constant 1 : index
    %c2_50 = arith.constant 2 : index
    %c0_51 = arith.constant 0 : index
    %40 = vector.load %arg14[%c0_48, %c1_49, %c2_50, %c0_51] : memref<2x10x10x32xf32, #tpu.memory_space<vmem>>, vector<2x8x8x32xf32>
    %41 = vector.shape_cast %40 : vector<2x8x8x32xf32> to vector<128x32xf32>
    %42 = arith.truncf %41 : vector<128x32xf32> to vector<128x32xbf16>
    %c5 = arith.constant 5 : index
    %c0_52 = arith.constant 0 : index
    %c0_53 = arith.constant 0 : index
    %43 = vector.load %arg1[%c5, %c0_52, %c0_53] : memref<9x32x32xbf16, #tpu.memory_space<vmem>>, vector<1x32x32xbf16>
    %44 = vector.shape_cast %43 : vector<1x32x32xbf16> to vector<32x32xbf16>
    %cst_54 = arith.constant dense<0.000000e+00> : vector<128x32xf32>
    %45 = tpu.matmul %42, %44, %cst_54 {dimension_numbers = #tpu.dot_dimension_numbers<[1], [0], [0], [1], [0, 0, 1, 1], [], []>} : vector<128x32xbf16>, vector<32x32xbf16>, vector<128x32xf32> -> vector<128x32xf32>
    %46 = arith.addf %39, %45 : vector<128x32xf32>
    %c0_55 = arith.constant 0 : index
    %c2_56 = arith.constant 2 : index
    %c0_57 = arith.constant 0 : index
    %c0_58 = arith.constant 0 : index
    %47 = vector.load %arg14[%c0_55, %c2_56, %c0_57, %c0_58] : memref<2x10x10x32xf32, #tpu.memory_space<vmem>>, vector<2x8x8x32xf32>
    %48 = vector.shape_cast %47 : vector<2x8x8x32xf32> to vector<128x32xf32>
    %49 = arith.truncf %48 : vector<128x32xf32> to vector<128x32xbf16>
    %c6 = arith.constant 6 : index
    %c0_59 = arith.constant 0 : index
    %c0_60 = arith.constant 0 : index
    %50 = vector.load %arg1[%c6, %c0_59, %c0_60] : memref<9x32x32xbf16, #tpu.memory_space<vmem>>, vector<1x32x32xbf16>
    %51 = vector.shape_cast %50 : vector<1x32x32xbf16> to vector<32x32xbf16>
    %cst_61 = arith.constant dense<0.000000e+00> : vector<128x32xf32>
    %52 = tpu.matmul %49, %51, %cst_61 {dimension_numbers = #tpu.dot_dimension_numbers<[1], [0], [0], [1], [0, 0, 1, 1], [], []>} : vector<128x32xbf16>, vector<32x32xbf16>, vector<128x32xf32> -> vector<128x32xf32>
    %53 = arith.addf %46, %52 : vector<128x32xf32>
    %c0_62 = arith.constant 0 : index
    %c2_63 = arith.constant 2 : index
    %c1_64 = arith.constant 1 : index
    %c0_65 = arith.constant 0 : index
    %54 = vector.load %arg14[%c0_62, %c2_63, %c1_64, %c0_65] : memref<2x10x10x32xf32, #tpu.memory_space<vmem>>, vector<2x8x8x32xf32>
    %55 = vector.shape_cast %54 : vector<2x8x8x32xf32> to vector<128x32xf32>
    %56 = arith.truncf %55 : vector<128x32xf32> to vector<128x32xbf16>
    %c7 = arith.constant 7 : index
    %c0_66 = arith.constant 0 : index
    %c0_67 = arith.constant 0 : index
    %57 = vector.load %arg1[%c7, %c0_66, %c0_67] : memref<9x32x32xbf16, #tpu.memory_space<vmem>>, vector<1x32x32xbf16>
    %58 = vector.shape_cast %57 : vector<1x32x32xbf16> to vector<32x32xbf16>
    %cst_68 = arith.constant dense<0.000000e+00> : vector<128x32xf32>
    %59 = tpu.matmul %56, %58, %cst_68 {dimension_numbers = #tpu.dot_dimension_numbers<[1], [0], [0], [1], [0, 0, 1, 1], [], []>} : vector<128x32xbf16>, vector<32x32xbf16>, vector<128x32xf32> -> vector<128x32xf32>
    %60 = arith.addf %53, %59 : vector<128x32xf32>
    %c0_69 = arith.constant 0 : index
    %c2_70 = arith.constant 2 : index
    %c2_71 = arith.constant 2 : index
    %c0_72 = arith.constant 0 : index
    %61 = vector.load %arg14[%c0_69, %c2_70, %c2_71, %c0_72] : memref<2x10x10x32xf32, #tpu.memory_space<vmem>>, vector<2x8x8x32xf32>
    %62 = vector.shape_cast %61 : vector<2x8x8x32xf32> to vector<128x32xf32>
    %63 = arith.truncf %62 : vector<128x32xf32> to vector<128x32xbf16>
    %c8 = arith.constant 8 : index
    %c0_73 = arith.constant 0 : index
    %c0_74 = arith.constant 0 : index
    %64 = vector.load %arg1[%c8, %c0_73, %c0_74] : memref<9x32x32xbf16, #tpu.memory_space<vmem>>, vector<1x32x32xbf16>
    %65 = vector.shape_cast %64 : vector<1x32x32xbf16> to vector<32x32xbf16>
    %cst_75 = arith.constant dense<0.000000e+00> : vector<128x32xf32>
    %66 = tpu.matmul %63, %65, %cst_75 {dimension_numbers = #tpu.dot_dimension_numbers<[1], [0], [0], [1], [0, 0, 1, 1], [], []>} : vector<128x32xbf16>, vector<32x32xbf16>, vector<128x32xf32> -> vector<128x32xf32>
    %67 = arith.addf %60, %66 : vector<128x32xf32>
    %c0_76 = arith.constant 0 : index
    %c0_77 = arith.constant 0 : index
    %68 = vector.load %arg2[%c0_76, %c0_77] : memref<1x32xf32, #tpu.memory_space<vmem>>, vector<1x32xf32>
    %69 = vector.broadcast %68 : vector<1x32xf32> to vector<128x32xf32>
    %70 = arith.addf %67, %69 : vector<128x32xf32>
    %cst_78 = arith.constant dense<0.000000e+00> : vector<32xf32>
    %71 = vector.multi_reduction <add>, %70, %cst_78 [0] : vector<128x32xf32> to vector<32xf32>
    %72 = vector.shape_cast %71 : vector<32xf32> to vector<1x32xf32>
    %cst_79 = arith.constant 7.812500e-03 : f32
    %73 = vector.broadcast %cst_79 : f32 to vector<1x32xf32>
    %74 = arith.mulf %72, %73 : vector<1x32xf32>
    %75 = vector.broadcast %74 : vector<1x32xf32> to vector<128x32xf32>
    %76 = arith.subf %70, %75 : vector<128x32xf32>
    %77 = arith.mulf %76, %76 : vector<128x32xf32>
    %cst_80 = arith.constant dense<0.000000e+00> : vector<32xf32>
    %78 = vector.multi_reduction <add>, %77, %cst_80 [0] : vector<128x32xf32> to vector<32xf32>
    %79 = vector.shape_cast %78 : vector<32xf32> to vector<1x32xf32>
    %cst_81 = arith.constant 7.812500e-03 : f32
    %80 = vector.broadcast %cst_81 : f32 to vector<1x32xf32>
    %81 = arith.mulf %79, %80 : vector<1x32xf32>
    %82 = vector.broadcast %74 : vector<1x32xf32> to vector<128x32xf32>
    %83 = arith.subf %70, %82 : vector<128x32xf32>
    %cst_82 = arith.constant 9.99999974E-6 : f32
    %84 = vector.broadcast %cst_82 : f32 to vector<1x32xf32>
    %85 = arith.addf %81, %84 : vector<1x32xf32>
    %86 = math.rsqrt %85 : vector<1x32xf32>
    %87 = vector.broadcast %86 : vector<1x32xf32> to vector<128x32xf32>
    %88 = arith.mulf %83, %87 : vector<128x32xf32>
    %c0_83 = arith.constant 0 : index
    %c0_84 = arith.constant 0 : index
    %89 = vector.load %arg3[%c0_83, %c0_84] : memref<1x32xf32, #tpu.memory_space<vmem>>, vector<1x32xf32>
    %90 = vector.broadcast %89 : vector<1x32xf32> to vector<128x32xf32>
    %91 = arith.mulf %88, %90 : vector<128x32xf32>
    %c0_85 = arith.constant 0 : index
    %c0_86 = arith.constant 0 : index
    %92 = vector.load %arg4[%c0_85, %c0_86] : memref<1x32xf32, #tpu.memory_space<vmem>>, vector<1x32xf32>
    %93 = vector.broadcast %92 : vector<1x32xf32> to vector<128x32xf32>
    %94 = arith.addf %91, %93 : vector<128x32xf32>
    %cst_87 = arith.constant 0.000000e+00 : f32
    %95 = vector.broadcast %cst_87 : f32 to vector<128x32xf32>
    %96 = arith.maximumf %94, %95 : vector<128x32xf32>
    %97 = vector.shape_cast %96 : vector<128x32xf32> to vector<2x8x8x32xf32>
    %cst_88 = arith.constant 0.000000e+00 : f32
    %98 = vector.broadcast %cst_88 : f32 to vector<2x10x10x32xf32>
    %c0_89 = arith.constant 0 : index
    %c0_90 = arith.constant 0 : index
    %c0_91 = arith.constant 0 : index
    %c0_92 = arith.constant 0 : index
    %99 = vector.load %arg14[%c0_89, %c0_90, %c0_91, %c0_92] : memref<2x10x10x32xf32, #tpu.memory_space<vmem>>, vector<2x10x10x32xf32>
    tpu.vector_store %arg14[%c0_89, %c0_90, %c0_91, %c0_92], %98 {strides = array<i32>} : memref<2x10x10x32xf32, #tpu.memory_space<vmem>>, vector<2x10x10x32xf32>,
    %c0_93 = arith.constant 0 : index
    %c1_94 = arith.constant 1 : index
    %c1_95 = arith.constant 1 : index
    %c0_96 = arith.constant 0 : index
    %100 = vector.load %arg14[%c0_93, %c1_94, %c1_95, %c0_96] : memref<2x10x10x32xf32, #tpu.memory_space<vmem>>, vector<2x8x8x32xf32>
    tpu.vector_store %arg14[%c0_93, %c1_94, %c1_95, %c0_96], %97 {strides = array<i32>} : memref<2x10x10x32xf32, #tpu.memory_space<vmem>>, vector<2x8x8x32xf32>,
    %cst_97 = arith.constant 0.000000e+00 : f32
    %101 = vector.broadcast %cst_97 : f32 to vector<128x32xf32>
    %c0_98 = arith.constant 0 : index
    %c0_99 = arith.constant 0 : index
    %c0_100 = arith.constant 0 : index
    %c0_101 = arith.constant 0 : index
    %102 = vector.load %arg14[%c0_98, %c0_99, %c0_100, %c0_101] : memref<2x10x10x32xf32, #tpu.memory_space<vmem>>, vector<2x8x8x32xf32>
    %103 = vector.shape_cast %102 : vector<2x8x8x32xf32> to vector<128x32xf32>
    %104 = arith.truncf %103 : vector<128x32xf32> to vector<128x32xbf16>
    %c0_102 = arith.constant 0 : index
    %c0_103 = arith.constant 0 : index
    %c0_104 = arith.constant 0 : index
    %105 = vector.load %arg5[%c0_102, %c0_103, %c0_104] : memref<9x32x32xbf16, #tpu.memory_space<vmem>>, vector<1x32x32xbf16>
    %106 = vector.shape_cast %105 : vector<1x32x32xbf16> to vector<32x32xbf16>
    %cst_105 = arith.constant dense<0.000000e+00> : vector<128x32xf32>
    %107 = tpu.matmul %104, %106, %cst_105 {dimension_numbers = #tpu.dot_dimension_numbers<[1], [0], [0], [1], [0, 0, 1, 1], [], []>} : vector<128x32xbf16>, vector<32x32xbf16>, vector<128x32xf32> -> vector<128x32xf32>
    %108 = arith.addf %101, %107 : vector<128x32xf32>
    %c0_106 = arith.constant 0 : index
    %c0_107 = arith.constant 0 : index
    %c1_108 = arith.constant 1 : index
    %c0_109 = arith.constant 0 : index
    %109 = vector.load %arg14[%c0_106, %c0_107, %c1_108, %c0_109] : memref<2x10x10x32xf32, #tpu.memory_space<vmem>>, vector<2x8x8x32xf32>
    %110 = vector.shape_cast %109 : vector<2x8x8x32xf32> to vector<128x32xf32>
    %111 = arith.truncf %110 : vector<128x32xf32> to vector<128x32xbf16>
    %c1_110 = arith.constant 1 : index
    %c0_111 = arith.constant 0 : index
    %c0_112 = arith.constant 0 : index
    %112 = vector.load %arg5[%c1_110, %c0_111, %c0_112] : memref<9x32x32xbf16, #tpu.memory_space<vmem>>, vector<1x32x32xbf16>
    %113 = vector.shape_cast %112 : vector<1x32x32xbf16> to vector<32x32xbf16>
    %cst_113 = arith.constant dense<0.000000e+00> : vector<128x32xf32>
    %114 = tpu.matmul %111, %113, %cst_113 {dimension_numbers = #tpu.dot_dimension_numbers<[1], [0], [0], [1], [0, 0, 1, 1], [], []>} : vector<128x32xbf16>, vector<32x32xbf16>, vector<128x32xf32> -> vector<128x32xf32>
    %115 = arith.addf %108, %114 : vector<128x32xf32>
    %c0_114 = arith.constant 0 : index
    %c0_115 = arith.constant 0 : index
    %c2_116 = arith.constant 2 : index
    %c0_117 = arith.constant 0 : index
    %116 = vector.load %arg14[%c0_114, %c0_115, %c2_116, %c0_117] : memref<2x10x10x32xf32, #tpu.memory_space<vmem>>, vector<2x8x8x32xf32>
    %117 = vector.shape_cast %116 : vector<2x8x8x32xf32> to vector<128x32xf32>
    %118 = arith.truncf %117 : vector<128x32xf32> to vector<128x32xbf16>
    %c2_118 = arith.constant 2 : index
    %c0_119 = arith.constant 0 : index
    %c0_120 = arith.constant 0 : index
    %119 = vector.load %arg5[%c2_118, %c0_119, %c0_120] : memref<9x32x32xbf16, #tpu.memory_space<vmem>>, vector<1x32x32xbf16>
    %120 = vector.shape_cast %119 : vector<1x32x32xbf16> to vector<32x32xbf16>
    %cst_121 = arith.constant dense<0.000000e+00> : vector<128x32xf32>
    %121 = tpu.matmul %118, %120, %cst_121 {dimension_numbers = #tpu.dot_dimension_numbers<[1], [0], [0], [1], [0, 0, 1, 1], [], []>} : vector<128x32xbf16>, vector<32x32xbf16>, vector<128x32xf32> -> vector<128x32xf32>
    %122 = arith.addf %115, %121 : vector<128x32xf32>
    %c0_122 = arith.constant 0 : index
    %c1_123 = arith.constant 1 : index
    %c0_124 = arith.constant 0 : index
    %c0_125 = arith.constant 0 : index
    %123 = vector.load %arg14[%c0_122, %c1_123, %c0_124, %c0_125] : memref<2x10x10x32xf32, #tpu.memory_space<vmem>>, vector<2x8x8x32xf32>
    %124 = vector.shape_cast %123 : vector<2x8x8x32xf32> to vector<128x32xf32>
    %125 = arith.truncf %124 : vector<128x32xf32> to vector<128x32xbf16>
    %c3_126 = arith.constant 3 : index
    %c0_127 = arith.constant 0 : index
    %c0_128 = arith.constant 0 : index
    %126 = vector.load %arg5[%c3_126, %c0_127, %c0_128] : memref<9x32x32xbf16, #tpu.memory_space<vmem>>, vector<1x32x32xbf16>
    %127 = vector.shape_cast %126 : vector<1x32x32xbf16> to vector<32x32xbf16>
    %cst_129 = arith.constant dense<0.000000e+00> : vector<128x32xf32>
    %128 = tpu.matmul %125, %127, %cst_129 {dimension_numbers = #tpu.dot_dimension_numbers<[1], [0], [0], [1], [0, 0, 1, 1], [], []>} : vector<128x32xbf16>, vector<32x32xbf16>, vector<128x32xf32> -> vector<128x32xf32>
    %129 = arith.addf %122, %128 : vector<128x32xf32>
    %c0_130 = arith.constant 0 : index
    %c1_131 = arith.constant 1 : index
    %c1_132 = arith.constant 1 : index
    %c0_133 = arith.constant 0 : index
    %130 = vector.load %arg14[%c0_130, %c1_131, %c1_132, %c0_133] : memref<2x10x10x32xf32, #tpu.memory_space<vmem>>, vector<2x8x8x32xf32>
    %131 = vector.shape_cast %130 : vector<2x8x8x32xf32> to vector<128x32xf32>
    %132 = arith.truncf %131 : vector<128x32xf32> to vector<128x32xbf16>
    %c4_134 = arith.constant 4 : index
    %c0_135 = arith.constant 0 : index
    %c0_136 = arith.constant 0 : index
    %133 = vector.load %arg5[%c4_134, %c0_135, %c0_136] : memref<9x32x32xbf16, #tpu.memory_space<vmem>>, vector<1x32x32xbf16>
    %134 = vector.shape_cast %133 : vector<1x32x32xbf16> to vector<32x32xbf16>
    %cst_137 = arith.constant dense<0.000000e+00> : vector<128x32xf32>
    %135 = tpu.matmul %132, %134, %cst_137 {dimension_numbers = #tpu.dot_dimension_numbers<[1], [0], [0], [1], [0, 0, 1, 1], [], []>} : vector<128x32xbf16>, vector<32x32xbf16>, vector<128x32xf32> -> vector<128x32xf32>
    %136 = arith.addf %129, %135 : vector<128x32xf32>
    %c0_138 = arith.constant 0 : index
    %c1_139 = arith.constant 1 : index
    %c2_140 = arith.constant 2 : index
    %c0_141 = arith.constant 0 : index
    %137 = vector.load %arg14[%c0_138, %c1_139, %c2_140, %c0_141] : memref<2x10x10x32xf32, #tpu.memory_space<vmem>>, vector<2x8x8x32xf32>
    %138 = vector.shape_cast %137 : vector<2x8x8x32xf32> to vector<128x32xf32>
    %139 = arith.truncf %138 : vector<128x32xf32> to vector<128x32xbf16>
    %c5_142 = arith.constant 5 : index
    %c0_143 = arith.constant 0 : index
    %c0_144 = arith.constant 0 : index
    %140 = vector.load %arg5[%c5_142, %c0_143, %c0_144] : memref<9x32x32xbf16, #tpu.memory_space<vmem>>, vector<1x32x32xbf16>
    %141 = vector.shape_cast %140 : vector<1x32x32xbf16> to vector<32x32xbf16>
    %cst_145 = arith.constant dense<0.000000e+00> : vector<128x32xf32>
    %142 = tpu.matmul %139, %141, %cst_145 {dimension_numbers = #tpu.dot_dimension_numbers<[1], [0], [0], [1], [0, 0, 1, 1], [], []>} : vector<128x32xbf16>, vector<32x32xbf16>, vector<128x32xf32> -> vector<128x32xf32>
    %143 = arith.addf %136, %142 : vector<128x32xf32>
    %c0_146 = arith.constant 0 : index
    %c2_147 = arith.constant 2 : index
    %c0_148 = arith.constant 0 : index
    %c0_149 = arith.constant 0 : index
    %144 = vector.load %arg14[%c0_146, %c2_147, %c0_148, %c0_149] : memref<2x10x10x32xf32, #tpu.memory_space<vmem>>, vector<2x8x8x32xf32>
    %145 = vector.shape_cast %144 : vector<2x8x8x32xf32> to vector<128x32xf32>
    %146 = arith.truncf %145 : vector<128x32xf32> to vector<128x32xbf16>
    %c6_150 = arith.constant 6 : index
    %c0_151 = arith.constant 0 : index
    %c0_152 = arith.constant 0 : index
    %147 = vector.load %arg5[%c6_150, %c0_151, %c0_152] : memref<9x32x32xbf16, #tpu.memory_space<vmem>>, vector<1x32x32xbf16>
    %148 = vector.shape_cast %147 : vector<1x32x32xbf16> to vector<32x32xbf16>
    %cst_153 = arith.constant dense<0.000000e+00> : vector<128x32xf32>
    %149 = tpu.matmul %146, %148, %cst_153 {dimension_numbers = #tpu.dot_dimension_numbers<[1], [0], [0], [1], [0, 0, 1, 1], [], []>} : vector<128x32xbf16>, vector<32x32xbf16>, vector<128x32xf32> -> vector<128x32xf32>
    %150 = arith.addf %143, %149 : vector<128x32xf32>
    %c0_154 = arith.constant 0 : index
    %c2_155 = arith.constant 2 : index
    %c1_156 = arith.constant 1 : index
    %c0_157 = arith.constant 0 : index
    %151 = vector.load %arg14[%c0_154, %c2_155, %c1_156, %c0_157] : memref<2x10x10x32xf32, #tpu.memory_space<vmem>>, vector<2x8x8x32xf32>
    %152 = vector.shape_cast %151 : vector<2x8x8x32xf32> to vector<128x32xf32>
    %153 = arith.truncf %152 : vector<128x32xf32> to vector<128x32xbf16>
    %c7_158 = arith.constant 7 : index
    %c0_159 = arith.constant 0 : index
    %c0_160 = arith.constant 0 : index
    %154 = vector.load %arg5[%c7_158, %c0_159, %c0_160] : memref<9x32x32xbf16, #tpu.memory_space<vmem>>, vector<1x32x32xbf16>
    %155 = vector.shape_cast %154 : vector<1x32x32xbf16> to vector<32x32xbf16>
    %cst_161 = arith.constant dense<0.000000e+00> : vector<128x32xf32>
    %156 = tpu.matmul %153, %155, %cst_161 {dimension_numbers = #tpu.dot_dimension_numbers<[1], [0], [0], [1], [0, 0, 1, 1], [], []>} : vector<128x32xbf16>, vector<32x32xbf16>, vector<128x32xf32> -> vector<128x32xf32>
    %157 = arith.addf %150, %156 : vector<128x32xf32>
    %c0_162 = arith.constant 0 : index
    %c2_163 = arith.constant 2 : index
    %c2_164 = arith.constant 2 : index
    %c0_165 = arith.constant 0 : index
    %158 = vector.load %arg14[%c0_162, %c2_163, %c2_164, %c0_165] : memref<2x10x10x32xf32, #tpu.memory_space<vmem>>, vector<2x8x8x32xf32>
    %159 = vector.shape_cast %158 : vector<2x8x8x32xf32> to vector<128x32xf32>
    %160 = arith.truncf %159 : vector<128x32xf32> to vector<128x32xbf16>
    %c8_166 = arith.constant 8 : index
    %c0_167 = arith.constant 0 : index
    %c0_168 = arith.constant 0 : index
    %161 = vector.load %arg5[%c8_166, %c0_167, %c0_168] : memref<9x32x32xbf16, #tpu.memory_space<vmem>>, vector<1x32x32xbf16>
    %162 = vector.shape_cast %161 : vector<1x32x32xbf16> to vector<32x32xbf16>
    %cst_169 = arith.constant dense<0.000000e+00> : vector<128x32xf32>
    %163 = tpu.matmul %160, %162, %cst_169 {dimension_numbers = #tpu.dot_dimension_numbers<[1], [0], [0], [1], [0, 0, 1, 1], [], []>} : vector<128x32xbf16>, vector<32x32xbf16>, vector<128x32xf32> -> vector<128x32xf32>
    %164 = arith.addf %157, %163 : vector<128x32xf32>
    %c0_170 = arith.constant 0 : index
    %c0_171 = arith.constant 0 : index
    %165 = vector.load %arg6[%c0_170, %c0_171] : memref<1x32xf32, #tpu.memory_space<vmem>>, vector<1x32xf32>
    %166 = vector.broadcast %165 : vector<1x32xf32> to vector<128x32xf32>
    %167 = arith.addf %164, %166 : vector<128x32xf32>
    %cst_172 = arith.constant dense<0.000000e+00> : vector<32xf32>
    %168 = vector.multi_reduction <add>, %167, %cst_172 [0] : vector<128x32xf32> to vector<32xf32>
    %169 = vector.shape_cast %168 : vector<32xf32> to vector<1x32xf32>
    %cst_173 = arith.constant 7.812500e-03 : f32
    %170 = vector.broadcast %cst_173 : f32 to vector<1x32xf32>
    %171 = arith.mulf %169, %170 : vector<1x32xf32>
    %172 = vector.broadcast %171 : vector<1x32xf32> to vector<128x32xf32>
    %173 = arith.subf %167, %172 : vector<128x32xf32>
    %174 = arith.mulf %173, %173 : vector<128x32xf32>
    %cst_174 = arith.constant dense<0.000000e+00> : vector<32xf32>
    %175 = vector.multi_reduction <add>, %174, %cst_174 [0] : vector<128x32xf32> to vector<32xf32>
    %176 = vector.shape_cast %175 : vector<32xf32> to vector<1x32xf32>
    %cst_175 = arith.constant 7.812500e-03 : f32
    %177 = vector.broadcast %cst_175 : f32 to vector<1x32xf32>
    %178 = arith.mulf %176, %177 : vector<1x32xf32>
    %179 = vector.broadcast %171 : vector<1x32xf32> to vector<128x32xf32>
    %180 = arith.subf %167, %179 : vector<128x32xf32>
    %cst_176 = arith.constant 9.99999974E-6 : f32
    %181 = vector.broadcast %cst_176 : f32 to vector<1x32xf32>
    %182 = arith.addf %178, %181 : vector<1x32xf32>
    %183 = math.rsqrt %182 : vector<1x32xf32>
    %184 = vector.broadcast %183 : vector<1x32xf32> to vector<128x32xf32>
    %185 = arith.mulf %180, %184 : vector<128x32xf32>
    %c0_177 = arith.constant 0 : index
    %c0_178 = arith.constant 0 : index
    %186 = vector.load %arg7[%c0_177, %c0_178] : memref<1x32xf32, #tpu.memory_space<vmem>>, vector<1x32xf32>
    %187 = vector.broadcast %186 : vector<1x32xf32> to vector<128x32xf32>
    %188 = arith.mulf %185, %187 : vector<128x32xf32>
    %c0_179 = arith.constant 0 : index
    %c0_180 = arith.constant 0 : index
    %189 = vector.load %arg8[%c0_179, %c0_180] : memref<1x32xf32, #tpu.memory_space<vmem>>, vector<1x32xf32>
    %190 = vector.broadcast %189 : vector<1x32xf32> to vector<128x32xf32>
    %191 = arith.addf %188, %190 : vector<128x32xf32>
    %192 = vector.shape_cast %191 : vector<128x32xf32> to vector<2x64x32xf32>
    %cst_181 = arith.constant dense<0.000000e+00> : vector<2x32xf32>
    %193 = vector.multi_reduction <add>, %192, %cst_181 [1] : vector<2x64x32xf32> to vector<2x32xf32>
    %cst_182 = arith.constant 1.562500e-02 : f32
    %194 = vector.broadcast %cst_182 : f32 to vector<2x32xf32>
    %195 = arith.mulf %193, %194 : vector<2x32xf32>
    %c0_183 = arith.constant 0 : index
    %c0_184 = arith.constant 0 : index
    %196 = vector.load %arg9[%c0_183, %c0_184] : memref<32x2xf32, #tpu.memory_space<vmem>>, vector<32x2xf32>
    %cst_185 = arith.constant dense<0.000000e+00> : vector<2x2xf32>
    %197 = tpu.matmul %195, %196, %cst_185 {dimension_numbers = #tpu.dot_dimension_numbers<[1], [0], [0], [1], [0, 0, 1, 1], [], []>} : vector<2x32xf32>, vector<32x2xf32>, vector<2x2xf32> -> vector<2x2xf32>
    %c0_186 = arith.constant 0 : index
    %c0_187 = arith.constant 0 : index
    %198 = vector.load %arg10[%c0_186, %c0_187] : memref<1x2xf32, #tpu.memory_space<vmem>>, vector<1x2xf32>
    %199 = vector.broadcast %198 : vector<1x2xf32> to vector<2x2xf32>
    %200 = arith.addf %197, %199 : vector<2x2xf32>
    %cst_188 = arith.constant 0.000000e+00 : f32
    %201 = vector.broadcast %cst_188 : f32 to vector<2x2xf32>
    %202 = arith.maximumf %200, %201 : vector<2x2xf32>
    %c0_189 = arith.constant 0 : index
    %c0_190 = arith.constant 0 : index
    %203 = vector.load %arg11[%c0_189, %c0_190] : memref<2x32xf32, #tpu.memory_space<vmem>>, vector<2x32xf32>
    %cst_191 = arith.constant dense<0.000000e+00> : vector<2x32xf32>
    %204 = tpu.matmul %202, %203, %cst_191 {dimension_numbers = #tpu.dot_dimension_numbers<[1], [0], [0], [1], [0, 0, 1, 1], [], []>} : vector<2x2xf32>, vector<2x32xf32>, vector<2x32xf32> -> vector<2x32xf32>
    %c0_192 = arith.constant 0 : index
    %c0_193 = arith.constant 0 : index
    %205 = vector.load %arg12[%c0_192, %c0_193] : memref<1x32xf32, #tpu.memory_space<vmem>>, vector<1x32xf32>
    %206 = vector.broadcast %205 : vector<1x32xf32> to vector<2x32xf32>
    %207 = arith.addf %204, %206 : vector<2x32xf32>
    %208 = arith.negf %207 : vector<2x32xf32>
    %209 = math.exp %208 : vector<2x32xf32>
    %cst_194 = arith.constant 1.000000e+00 : f32
    %210 = vector.broadcast %cst_194 : f32 to vector<2x32xf32>
    %211 = arith.addf %210, %209 : vector<2x32xf32>
    %212 = arith.divf %210, %211 : vector<2x32xf32>
    %213 = vector.shape_cast %212 : vector<2x32xf32> to vector<2x1x32xf32>
    %214 = vector.broadcast %213 : vector<2x1x32xf32> to vector<2x64x32xf32>
    %215 = arith.mulf %192, %214 : vector<2x64x32xf32>
    %216 = vector.shape_cast %0 : vector<2x8x8x32xf32> to vector<2x64x32xf32>
    %217 = arith.addf %215, %216 : vector<2x64x32xf32>
    %218 = vector.shape_cast %217 : vector<2x64x32xf32> to vector<2x8x8x32xf32>
    %c0_195 = arith.constant 0 : index
    %c0_196 = arith.constant 0 : index
    %c0_197 = arith.constant 0 : index
    %c0_198 = arith.constant 0 : index
    %219 = vector.load %arg13[%c0_195, %c0_196, %c0_197, %c0_198] : memref<2x8x8x32xf32, #tpu.memory_space<vmem>>, vector<2x8x8x32xf32>
    tpu.vector_store %arg13[%c0_195, %c0_196, %c0_197, %c0_198], %218 {strides = array<i32>} : memref<2x8x8x32xf32, #tpu.memory_space<vmem>>, vector<2x8x8x32xf32>,
    return
  }
}

</mosaic_0001>

<bundles_post_ra>
// kernel: down_forward.2
= control target key start
LH: loop header
LB: loop body
LE: loop exit
PB: predicated region body
PF: predicated region fallthrough
CT: control target
= control target key end

     0   :  { %s3472_s18 = smov 0   ;;  %s4210_s0 = inlined_call_operand.vmem [shape: f32[16,2,8,2,4], index: 0, kind: input, shape index: {}]   ;;  %s4211_s1 = inlined_call_operand.vmem [shape: bf16[9,4,32], index: 1, kind: input, shape index: {}]   ;;  %s4212_s2 = inlined_call_operand.vmem [shape: f32[1,32], index: 2, kind: input, shape index: {}]   ;;  %s4213_s3 = inlined_call_operand.vmem [shape: bf16[9,32,32], index: 3, kind: input, shape index: {}]   ;;  %s4214_s4 = inlined_call_operand.vmem [shape: f32[1,32], index: 4, kind: input, shape index: {}]   ;;  %s4215_s5 = inlined_call_operand.vmem [shape: f32[2,8,8,32], index: 5, kind: output, shape index: {}]  }
   0x1 LB: > { %s3478_s19 = sadd.s32 4294967295, %s3439_s18   ;;  %p2958_p0 = scmp.ge.s32.totalorder %s3439_s18, 1  ;;  %s3439_s18 = sphi %s3472_s18, %s15_s18  }
   0x2   : > { %p189_p1 = scmp.lt.s32.totalorder %s3439_s18, 3 }
   0x4   : > { %p190_p2 = pnand %p2958_p0, %p189_p1 }
   0x6   : > { %193 = sbr.rel (%p190_p2) target bundleno = 658 (0x292), region = 40 }
   0xb   : > { %v2964_v0 = vld [vmem:[%s4211_s1 + $0x2] sm:$0x3]  ;;  %vm940_vm0 = vcmask 1041408   ;;  %v913_v1 = vld [vmem:[%s4211_s1] sm:$0x3]  ;;  %s2959_s24 = sshll.u32 %s3478_s19, 3 }
   0xc   : > { %3397 = vmatprep.subr.msk.bf16.mxu0 %vm940_vm0, %v2964_v0  ;;  %v942_v2 = vsel %vm940_vm0, %v2964_v0, 0  ;;  %3398 = vmatprep.subr.msk.bf16.mxu1 %vm940_vm0, %v913_v1  ;;  %v1022_v3 = vsel %vm940_vm0, %v913_v1, 0  ;;  %p3493_p3 = scmp.lt.s32.totalorder %s2959_s24, 15  ;;  %vm679_vm1 = vcmask 31744   ;;  %v3441_v4 = vmov 0.0   ;;  %p225_p4 = scmp.lt.s32.totalorder %s3478_s19, 1 }
   0xd   : > { %3200 = vmatpush3.bf16.msra.mxu0 %v942_v2  ;;  %3210 = vmatpush3.bf16.msra.mxu1 %v1022_v3  ;;  %680 = vst.msk [vmem:[#allocation2] sm:$0xff] %vm679_vm1, %v3441_v4  ;;  %vm681_vm2 = vcmask 25600   ;;  %683 = vst.msk [vmem:[#allocation2 + $0x10] sm:$0xff] %vm679_vm1, %v3441_v4  ;;  %v2973_v5 = vld [vmem:[%s4211_s1 + $0x4] sm:$0x3]  ;;  %vm766_vm3 = vcmask 1041409  }
   0xe   : > { %685 = vst.msk [vmem:[#allocation2 + $0x20] sm:$0xff] %vm679_vm1, %v3441_v4  ;;  %687 = vst.msk [vmem:[#allocation2 + $0x30] sm:$0xff] %vm679_vm1, %v3441_v4  ;;  %s4234_s24 = smov (!%p3493_p3, %s2959_s24), 15  ;;  %3399 = vmatprep.subr.msk.bf16.mxu0 %vm940_vm0, %v2973_v5  ;;  %v2978_v6 = vld [vmem:[%s4211_s1 + $0x6] sm:$0x3]  ;;  %v3553_v7 = vsel %vm940_vm0, %v2973_v5, 0 }
   0xf   : > { %689 = vst.msk [vmem:[#allocation2 + $0x40] sm:$0xff] %vm679_vm1, %v3441_v4  ;;  %691 = vst.msk [vmem:[#allocation2 + $0x50] sm:$0xff] %vm679_vm1, %v3441_v4  ;;  %s3098_s30 = sshll.u32 %s4234_s24, 5  ;;  %3400 = vmatprep.subr.msk.bf16.mxu1 %vm940_vm0, %v2978_v6  ;;  %vm769_vm4 = vcmask 1042434   ;;  %vm772_vm5 = vcmask 1043459   ;;  %vm775_vm6 = vcmask 1044484  }
  0x10   : > { %693 = vst.msk [vmem:[#allocation2 + $0x60] sm:$0xff] %vm679_vm1, %v3441_v4  ;;  %695 = vst.msk [vmem:[#allocation2 + $0x70] sm:$0xff] %vm679_vm1, %v3441_v4  ;;  %s3550_s8 = scalar_lea.vmem %s4210_s0, %s3098_s30  ;;  %vm778_vm7 = vcmask 1045509   ;;  %vm781_vm8 = vcmask 1046534   ;;  %vm784_vm9 = vcmask 1047559   ;;  %v3572_v47 = vsel %vm940_vm0, %v2978_v6, 0 }
  0x11   : > { %697 = vst.msk [vmem:[#allocation2 + $0x80] sm:$0xff] %vm679_vm1, %v3441_v4  ;;  %699 = vst.msk [vmem:[#allocation2 + $0x90] sm:$0xff] %vm679_vm1, %v3441_v4  ;;  %v231_v8 = vld [vmem:[%s3550_s8] sm:$0x3]  ;;  %v232_v9 = vld [vmem:[%s3550_s8 + $0x2] sm:$0x3] }
  0x12   : > { %682 = vst.msk [vmem:[#allocation2 + $0x8] sm:$0x3] %vm681_vm2, %v3441_v4  ;;  %684 = vst.msk [vmem:[#allocation2 + $0x18] sm:$0x3] %vm681_vm2, %v3441_v4  ;;  %v233_v10 = vld [vmem:[%s3550_s8 + $0x4] sm:$0x3] }
  0x13   : > { %686 = vst.msk [vmem:[#allocation2 + $0x28] sm:$0x3] %vm681_vm2, %v3441_v4  ;;  %688 = vst.msk [vmem:[#allocation2 + $0x38] sm:$0x3] %vm681_vm2, %v3441_v4  ;;  %v234_v11 = vld [vmem:[%s3550_s8 + $0x6] sm:$0x3] }
  0x14   : > { %690 = vst.msk [vmem:[#allocation2 + $0x48] sm:$0x3] %vm681_vm2, %v3441_v4  ;;  %692 = vst.msk [vmem:[#allocation2 + $0x58] sm:$0x3] %vm681_vm2, %v3441_v4  ;;  %v235_v12 = vld [vmem:[%s3550_s8 + $0x8] sm:$0x3] }
  0x15   : > { %694 = vst.msk [vmem:[#allocation2 + $0x68] sm:$0x3] %vm681_vm2, %v3441_v4  ;;  %696 = vst.msk [vmem:[#allocation2 + $0x78] sm:$0x3] %vm681_vm2, %v3441_v4  ;;  %v236_v13 = vld [vmem:[%s3550_s8 + $0xa] sm:$0x3] }
  0x16   : > { %698 = vst.msk [vmem:[#allocation2 + $0x88] sm:$0x3] %vm681_vm2, %v3441_v4  ;;  %700 = vst.msk [vmem:[#allocation2 + $0x98] sm:$0x3] %vm681_vm2, %v3441_v4  ;;  %v237_v14 = vld [vmem:[%s3550_s8 + $0xc] sm:$0x3] }
  0x17   : > { %v238_v15 = vld [vmem:[%s3550_s8 + $0xe] sm:$0x3]  ;;  %v239_v16 = vld [vmem:[%s3550_s8 + $0x10] sm:$0x3]  ;;  %v240_v17 = vld [vmem:[%s3550_s8 + $0x12] sm:$0x3] }
  0x18   : > { %v241_v18 = vld [vmem:[%s3550_s8 + $0x14] sm:$0x3]  ;;  %v242_v19 = vld [vmem:[%s3550_s8 + $0x16] sm:$0x3]  ;;  %v359_v20 = vmax.f32 %v231_v8, %v239_v16  ;;  %v243_v21 = vld [vmem:[%s3550_s8 + $0x18] sm:$0x3]  ;;  %v360_v24 = vmax.f32 %v232_v9, %v240_v17 }
  0x19   : > { %v244_v22 = vld [vmem:[%s3550_s8 + $0x1a] sm:$0x3]  ;;  %v245_v23 = vld [vmem:[%s3550_s8 + $0x1c] sm:$0x3]  ;;  %v361_v25 = vmax.f32 %v233_v10, %v241_v18  ;;  %v362_v26 = vmax.f32 %v234_v11, %v242_v19  ;;  %v246_v27 = vld [vmem:[%s3550_s8 + $0x1e] sm:$0x3]  ;;  %v363_v28 = vmax.f32 %v235_v12, %v243_v21 }
  0x1a   : > { %v364_v29 = vmax.f32 %v236_v13, %v244_v22  ;;  %v365_v30 = vmax.f32 %v237_v14, %v245_v23  ;;  %v487_v31 = vrot.slane %v359_v20, 1  ;;  %v366_v32 = vmax.f32 %v238_v15, %v246_v27  ;;  %v247_v54 = vld [vmem:[%s3550_s8 + $0x20] sm:$0x3]  ;;  %v248_v55 = vld [vmem:[%s3550_s8 + $0x22] sm:$0x3]  ;;  %s4236_s19 = smov (!%p225_p4, %s3478_s19), 1 }
  0x1b   : > { %v488_v33 = vrot.slane %v360_v24, 1  ;;  %v489_v34 = vrot.slane %v361_v25, 1  ;;  %v490_v35 = vrot.slane %v362_v26, 1  ;;  %v491_v36 = vrot.slane %v363_v28, 1  ;;  %v249_v56 = vld [vmem:[%s3550_s8 + $0x24] sm:$0x3] }
  0x1c   : > { %v492_v37 = vrot.slane %v364_v29, 1  ;;  %v493_v38 = vrot.slane %v365_v30, 1  ;;  %v615_v39 = vmax.f32 %v359_v20, %v487_v31  ;;  %v494_v40 = vrot.slane %v366_v32, 1  ;;  %v255_v57 = vld [vmem:[%s3550_s8 + $0x30] sm:$0x3]  ;;  %s3099_s13 = sshll.u32 %s4236_s19, 6 }
  0x1d   : > { %v616_v41 = vmax.f32 %v360_v24, %v488_v33  ;;  %v617_v42 = vmax.f32 %v361_v25, %v489_v34  ;;  %v618_v43 = vmax.f32 %v362_v26, %v490_v35  ;;  %v619_v44 = vmax.f32 %v363_v28, %v491_v36  ;;  %v250_v61 = vld [vmem:[%s3550_s8 + $0x26] sm:$0x3]  ;;  %v251_v62 = vld [vmem:[%s3550_s8 + $0x28] sm:$0x3]  ;;  %v252_v63 = vld [vmem:[%s3550_s8 + $0x2a] sm:$0x3]  ;;  %s4188_s16 = scalar_lea.vmem %s4215_s5, %s3099_s13 }
  0x1e   : > { %v620_v45 = vmax.f32 %v364_v29, %v492_v37  ;;  %v621_v46 = vmax.f32 %v365_v30, %v493_v38  ;;  %v622_v48 = vmax.f32 %v366_v32, %v494_v40  ;;  %v256_v0 = vld [vmem:[%s3550_s8 + $0x32] sm:$0x3]  ;;  %v257_v1 = vld [vmem:[%s3550_s8 + $0x34] sm:$0x3]  ;;  %v253_v3 = vld [vmem:[%s3550_s8 + $0x2c] sm:$0x3]  ;;  %v367_v22 = vmax.f32 %v247_v54, %v255_v57 }
  0x1f   : > { %v765_v49 = vrot.slane %v616_v41, 7  ;;  %v768_v50 = vrot.slane %v617_v42, 6  ;;  %v771_v51 = vrot.slane %v618_v43, 5  ;;  %v774_v52 = vrot.slane %v619_v44, 4  ;;  %v254_v5 = vld [vmem:[%s3550_s8 + $0x2e] sm:$0x3] }
  0x20   : > { %v777_v53 = vrot.slane %v620_v45, 3  ;;  %v780_v59 = vrot.slane %v621_v46, 2  ;;  %v783_v60 = vrot.slane %v622_v48, 1  ;;  %v258_v6 = vld [vmem:[%s3550_s8 + $0x36] sm:$0x3]  ;;  %v368_v23 = vmax.f32 %v248_v55, %v256_v0  ;;  %v901_v0 = vld [vmem:[#allocation2] sm:$0xff] }
  0x21   : > { %v767_v58 = vsel %vm766_vm3, %v765_v49, %v615_v39  ;;  %v259_v8 = vld [vmem:[%s3550_s8 + $0x38] sm:$0x3]  ;;  %v260_v9 = vld [vmem:[%s3550_s8 + $0x3a] sm:$0x3]  ;;  %v261_v11 = vld [vmem:[%s3550_s8 + $0x3c] sm:$0x3]  ;;  %v369_v24 = vmax.f32 %v249_v56, %v257_v1  ;;  %v370_v29 = vmax.f32 %v250_v61, %v258_v6 }
  0x22   : > { %v770_v2 = vsel %vm769_vm4, %v768_v50, %v767_v58  ;;  %v262_v12 = vld [vmem:[%s3550_s8 + $0x3e] sm:$0x3]  ;;  %v263_v13 = vld [vmem:[%s3550_s8 + $0x40] sm:$0x3]  ;;  %v264_v15 = vld [vmem:[%s3550_s8 + $0x42] sm:$0x3]  ;;  %v371_v30 = vmax.f32 %v251_v62, %v259_v8  ;;  %v372_v31 = vmax.f32 %v252_v63, %v260_v9  ;;  %v373_v36 = vmax.f32 %v253_v3, %v261_v11 }
  0x23   : > { %v773_v10 = vsel %vm772_vm5, %v771_v51, %v770_v2  ;;  %v265_v16 = vld [vmem:[%s3550_s8 + $0x44] sm:$0x3]  ;;  %v266_v17 = vld [vmem:[%s3550_s8 + $0x46] sm:$0x3]  ;;  %v267_v19 = vld [vmem:[%s3550_s8 + $0x48] sm:$0x3]  ;;  %v374_v37 = vmax.f32 %v254_v5, %v262_v12 }
  0x24   : > { %v776_v14 = vsel %vm775_vm6, %v774_v52, %v773_v10  ;;  %v268_v20 = vld [vmem:[%s3550_s8 + $0x4a] sm:$0x3]  ;;  %v269_v21 = vld [vmem:[%s3550_s8 + $0x4c] sm:$0x3]  ;;  %v270_v26 = vld [vmem:[%s3550_s8 + $0x4e] sm:$0x3] }
  0x25   : > { %v779_v18 = vsel %vm778_vm7, %v777_v53, %v776_v14  ;;  %v271_v27 = vld [vmem:[%s3550_s8 + $0x50] sm:$0x3]  ;;  %v272_v28 = vld [vmem:[%s3550_s8 + $0x52] sm:$0x3]  ;;  %v273_v33 = vld [vmem:[%s3550_s8 + $0x54] sm:$0x3] }
  0x26   : > { %v782_v25 = vsel %vm781_vm8, %v780_v59, %v779_v18  ;;  %v274_v34 = vld [vmem:[%s3550_s8 + $0x56] sm:$0x3]  ;;  %v275_v35 = vld [vmem:[%s3550_s8 + $0x58] sm:$0x3]  ;;  %v375_v38 = vmax.f32 %v263_v13, %v271_v27  ;;  %v276_v39 = vld [vmem:[%s3550_s8 + $0x5a] sm:$0x3]  ;;  %v376_v42 = vmax.f32 %v264_v15, %v272_v28  ;;  %v377_v43 = vmax.f32 %v265_v16, %v273_v33 }
  0x27   : > { %v785_v32 = vsel %vm784_vm9, %v783_v60, %v782_v25  ;;  %v277_v40 = vld [vmem:[%s3550_s8 + $0x5c] sm:$0x3]  ;;  %v278_v41 = vld [vmem:[%s3550_s8 + $0x5e] sm:$0x3]  ;;  %v378_v44 = vmax.f32 %v266_v17, %v274_v34  ;;  %v379_v45 = vmax.f32 %v267_v19, %v275_v35  ;;  %v380_v46 = vmax.f32 %v268_v20, %v276_v39  ;;  %v914_v63 = vld [vmem:[#allocation2 + $0x1] sm:$0xff] }
  0x28   : > { %893 = vst.msk [vmem:[#allocation2 + $0x11] sm:$0xff] %vm679_vm1, %v785_v32  ;;  %v381_v48 = vmax.f32 %v269_v21, %v277_v40  ;;  %v382_v49 = vmax.f32 %v270_v26, %v278_v41  ;;  %v495_v50 = vrot.slane %v367_v22, 1  ;;  %v496_v51 = vrot.slane %v368_v23, 1  ;;  %v279_v25 = vld [vmem:[%s3550_s8 + $0x60] sm:$0x3] }
  0x29   : > { %v497_v52 = vrot.slane %v369_v24, 1  ;;  %v498_v53 = vrot.slane %v370_v29, 1  ;;  %v499_v54 = vrot.slane %v371_v30, 1  ;;  %v500_v55 = vrot.slane %v372_v31, 1  ;;  %v287_v26 = vld [vmem:[%s3550_s8 + $0x70] sm:$0x3] }
  0x2a   : > { %v501_v56 = vrot.slane %v373_v36, 1  ;;  %v502_v57 = vrot.slane %v374_v37, 1  ;;  %v503_v58 = vrot.slane %v375_v38, 1  ;;  %v504_v59 = vrot.slane %v376_v42, 1  ;;  %v281_v32 = vld [vmem:[%s3550_s8 + $0x64] sm:$0x3] }
  0x2b   : > { %v505_v60 = vrot.slane %v377_v43, 1  ;;  %v506_v61 = vrot.slane %v378_v44, 1  ;;  %v507_v62 = vrot.slane %v379_v45, 1  ;;  %v508_v1 = vrot.slane %v380_v46, 1  ;;  %v288_v33 = vld [vmem:[%s3550_s8 + $0x72] sm:$0x3] }
  0x2c   : > { %v509_v2 = vrot.slane %v381_v48, 1  ;;  %v510_v3 = vrot.slane %v382_v49, 1  ;;  %v623_v5 = vmax.f32 %v367_v22, %v495_v50  ;;  %v624_v6 = vmax.f32 %v368_v23, %v496_v51  ;;  %v289_v34 = vld [vmem:[%s3550_s8 + $0x74] sm:$0x3]  ;;  %v282_v39 = vld [vmem:[%s3550_s8 + $0x66] sm:$0x3] }
  0x2d   : > { %v625_v8 = vmax.f32 %v369_v24, %v497_v52  ;;  %v626_v9 = vmax.f32 %v370_v29, %v498_v53  ;;  %v627_v10 = vmax.f32 %v371_v30, %v499_v54  ;;  %v3618_v13 = vmax.f32 %v372_v31, %v500_v55  ;;  %v280_v31 = vld [vmem:[%s3550_s8 + $0x62] sm:$0x3]  ;;  %v283_v40 = vld [vmem:[%s3550_s8 + $0x68] sm:$0x3]  ;;  %v290_v41 = vld [vmem:[%s3550_s8 + $0x76] sm:$0x3] }
  0x2e   : > { %v3620_v14 = vmax.f32 %v373_v36, %v501_v56  ;;  %v3622_v15 = vmax.f32 %v374_v37, %v502_v57  ;;  %v631_v16 = vmax.f32 %v375_v38, %v503_v58  ;;  %v632_v19 = vmax.f32 %v376_v42, %v504_v59  ;;  %v291_v42 = vld [vmem:[%s3550_s8 + $0x78] sm:$0x3]  ;;  %v292_v50 = vld [vmem:[%s3550_s8 + $0x7a] sm:$0x3]  ;;  %v293_v51 = vld [vmem:[%s3550_s8 + $0x7c] sm:$0x3] }
  0x2f   : > { %v3614_v11 = vld [vmem:[#allocation2 + $0x11] sm:$0xff]  ;;  %v633_v20 = vmax.f32 %v377_v43, %v505_v60  ;;  %v634_v21 = vmax.f32 %v378_v44, %v506_v61  ;;  %v3626_v22 = vmax.f32 %v379_v45, %v507_v62  ;;  %v3628_v23 = vmax.f32 %v380_v46, %v508_v1  ;;  %v286_v56 = vld [vmem:[%s3550_s8 + $0x6e] sm:$0x3]  ;;  %v294_v57 = vld [vmem:[%s3550_s8 + $0x7e] sm:$0x3] }
  0x30   : > { %v3616_v12 = vld [vmem:[#allocation2 + $0x10] sm:$0xff]  ;;  %v922_v17 = vpack.c.bf16 %v3614_v11, %v914_v63  ;;  %v3630_v24 = vmax.f32 %v381_v48, %v509_v2  ;;  %v3636_v27 = vmax.f32 %v382_v49, %v510_v3  ;;  %v786_v28 = vrot.slane %v624_v6, 7  ;;  %v284_v48 = vld [vmem:[%s3550_s8 + $0x6a] sm:$0x3]  ;;  %v285_v49 = vld [vmem:[%s3550_s8 + $0x6c] sm:$0x3] }
  0x31   : > { %v909_v18 = vpack.c.bf16 %v3616_v12, %v901_v0  ;;  %v788_v29 = vrot.slane %v625_v8, 6  ;;  %v790_v30 = vrot.slane %v626_v9, 5  ;;  %v792_v35 = vrot.slane %v627_v10, 4  ;;  %v295_v58 = vld [vmem:[%s3550_s8 + $0x80] sm:$0x3] }
  0x32   : > { %3201 = vmatprep.mubr.msk.bf16.mxu0 %vm679_vm1, %v922_v17  ;;  %v794_v36 = vrot.slane %v3618_v13, 3  ;;  %v796_v37 = vrot.slane %v3620_v14, 2  ;;  %v798_v38 = vrot.slane %v3622_v15, 1  ;;  %v787_v43 = vsel %vm766_vm3, %v786_v28, %v623_v5  ;;  %v296_v62 = vld [vmem:[%s3550_s8 + $0x82] sm:$0x3] }
  0x33   : > { %3211 = vmatprep.mubr.msk.bf16.mxu1 %vm679_vm1, %v909_v18  ;;  %v800_v44 = vrot.slane %v632_v19, 7  ;;  %v802_v45 = vrot.slane %v633_v20, 6  ;;  %v804_v46 = vrot.slane %v634_v21, 5  ;;  %v789_v52 = vsel %vm769_vm4, %v788_v29, %v787_v43  ;;  %v297_v63 = vld [vmem:[%s3550_s8 + $0x84] sm:$0x3] }
  0x34   : > { %v806_v53 = vrot.slane %v3626_v22, 4  ;;  %v808_v54 = vrot.slane %v3628_v23, 3  ;;  %v810_v55 = vrot.slane %v3630_v24, 2  ;;  %v791_v59 = vsel %vm772_vm5, %v790_v30, %v789_v52  ;;  %v298_v0 = vld [vmem:[%s3550_s8 + $0x86] sm:$0x3] }
  0x35   : > { %v801_v60 = vsel %vm766_vm3, %v800_v44, %v631_v16  ;;  %v812_v61 = vrot.slane %v3636_v27, 1  ;;  %v383_v1 = vmax.f32 %v279_v25, %v287_v26  ;;  %v793_v2 = vsel %vm775_vm6, %v792_v35, %v791_v59  ;;  %v299_v5 = vld [vmem:[%s3550_s8 + $0x88] sm:$0x3]  ;;  %v300_v6 = vld [vmem:[%s3550_s8 + $0x8a] sm:$0x3] }
  0x36   : > { %v803_v3 = vsel %vm769_vm4, %v802_v45, %v801_v60  ;;  %v301_v8 = vld [vmem:[%s3550_s8 + $0x8c] sm:$0x3]  ;;  %v303_v9 = vld [vmem:[%s3550_s8 + $0x90] sm:$0x3]  ;;  %v384_v10 = vmax.f32 %v280_v31, %v288_v33  ;;  %v385_v13 = vmax.f32 %v281_v32, %v289_v34  ;;  %v795_v14 = vsel %vm778_vm7, %v794_v36, %v793_v2  ;;  %v304_v16 = vld [vmem:[%s3550_s8 + $0x92] sm:$0x3] }
  0x37   : > { %v805_v15 = vsel %vm772_vm5, %v804_v46, %v803_v3  ;;  %v305_v17 = vld [vmem:[%s3550_s8 + $0x94] sm:$0x3]  ;;  %v306_v18 = vld [vmem:[%s3550_s8 + $0x96] sm:$0x3]  ;;  %v386_v19 = vmax.f32 %v282_v39, %v290_v41  ;;  %v387_v20 = vmax.f32 %v283_v40, %v291_v42  ;;  %v797_v21 = vsel %vm781_vm8, %v796_v37, %v795_v14  ;;  %v307_v23 = vld [vmem:[%s3550_s8 + $0x98] sm:$0x3] }
  0x38   : > { %v807_v22 = vsel %vm775_vm6, %v806_v53, %v805_v15  ;;  %v308_v24 = vld [vmem:[%s3550_s8 + $0x9a] sm:$0x3]  ;;  %v309_v25 = vld [vmem:[%s3550_s8 + $0x9c] sm:$0x3]  ;;  %v388_v26 = vmax.f32 %v284_v48, %v292_v50  ;;  %v389_v27 = vmax.f32 %v285_v49, %v293_v51  ;;  %v799_v28 = vsel %vm784_vm9, %v798_v38, %v797_v21  ;;  %v302_v30 = vld [vmem:[%s3550_s8 + $0x8e] sm:$0x3] }
  0x39   : > { %v809_v29 = vsel %vm778_vm7, %v808_v54, %v807_v22  ;;  %v310_v31 = vld [vmem:[%s3550_s8 + $0x9e] sm:$0x3]  ;;  %v390_v32 = vmax.f32 %v286_v56, %v294_v57  ;;  %v391_v33 = vmax.f32 %v295_v58, %v303_v9  ;;  %894 = vst.msk [vmem:[#allocation2 + $0x21] sm:$0xff] %vm679_vm1, %v799_v28  ;;  %v392_v35 = vmax.f32 %v296_v62, %v304_v16 }
  0x3a   : > { %v811_v34 = vsel %vm781_vm8, %v810_v55, %v809_v29  ;;  %v393_v36 = vmax.f32 %v297_v63, %v305_v17  ;;  %v394_v37 = vmax.f32 %v298_v0, %v306_v18  ;;  %v395_v40 = vmax.f32 %v299_v5, %v307_v23 }
  0x3b   : > { %v813_v39 = vsel %vm784_vm9, %v812_v61, %v811_v34  ;;  %v396_v41 = vmax.f32 %v300_v6, %v308_v24  ;;  %v397_v42 = vmax.f32 %v301_v8, %v309_v25  ;;  %v398_v38 = vmax.f32 %v302_v30, %v310_v31  ;;  %v311_v25 = vld [vmem:[%s3550_s8 + $0xa0] sm:$0x3]  ;;  %v312_v31 = vld [vmem:[%s3550_s8 + $0xa2] sm:$0x3]  ;;  %v321_v34 = vld [vmem:[%s3550_s8 + $0xb4] sm:$0x3] }
  0x3c   : > { %895 = vst.msk [vmem:[#allocation2 + $0x31] sm:$0xff] %vm679_vm1, %v813_v39  ;;  %v511_v43 = vrot.slane %v383_v1, 1  ;;  %v512_v44 = vrot.slane %v384_v10, 1  ;;  %v513_v45 = vrot.slane %v385_v13, 1  ;;  %v514_v46 = vrot.slane %v386_v19, 1 }
  0x3d   : > { %v515_v48 = vrot.slane %v387_v20, 1  ;;  %v516_v49 = vrot.slane %v388_v26, 1  ;;  %v517_v50 = vrot.slane %v389_v27, 1  ;;  %v518_v51 = vrot.slane %v390_v32, 1 }
  0x3e   : > { %v519_v52 = vrot.slane %v391_v33, 1  ;;  %v520_v53 = vrot.slane %v392_v35, 1  ;;  %v521_v54 = vrot.slane %v393_v36, 1  ;;  %v522_v55 = vrot.slane %v394_v37, 1 }
  0x3f   : > { %v523_v56 = vrot.slane %v395_v40, 1  ;;  %v524_v57 = vrot.slane %v396_v41, 1  ;;  %v525_v58 = vrot.slane %v397_v42, 1  ;;  %v526_v59 = vrot.slane %v398_v38, 1 }
  0x40   : > { %v639_v60 = vmax.f32 %v383_v1, %v511_v43  ;;  %v640_v61 = vmax.f32 %v384_v10, %v512_v44  ;;  %v641_v62 = vmax.f32 %v385_v13, %v513_v45  ;;  %v3691_v63 = vld [vmem:[#allocation2 + $0x21] sm:$0xff]  ;;  %v642_v2 = vmax.f32 %v386_v19, %v514_v46 }
  0x41   : > { %v3693_v0 = vld [vmem:[#allocation2 + $0x20] sm:$0xff]  ;;  %v643_v3 = vmax.f32 %v387_v20, %v515_v48  ;;  %v3695_v5 = vmax.f32 %v388_v26, %v516_v49  ;;  %v3697_v6 = vmax.f32 %v389_v27, %v517_v50  ;;  %v3699_v8 = vmax.f32 %v390_v32, %v518_v51  ;;  %v3714_v19 = vld [vmem:[%s4211_s1 + $0x8] sm:$0x3]  ;;  %v3719_v20 = vld [vmem:[%s4211_s1 + $0xa] sm:$0x3] }
  0x42   : > { %v647_v9 = vmax.f32 %v391_v33, %v519_v52  ;;  %v648_v14 = vmax.f32 %v392_v35, %v520_v53  ;;  %v649_v15 = vmax.f32 %v393_v36, %v521_v54  ;;  %v650_v13 = vmax.f32 %v394_v37, %v522_v55  ;;  %v319_v26 = vld [vmem:[%s3550_s8 + $0xb0] sm:$0x3]  ;;  %v313_v32 = vld [vmem:[%s3550_s8 + $0xa4] sm:$0x3]  ;;  %v320_v33 = vld [vmem:[%s3550_s8 + $0xb2] sm:$0x3] }
  0x43   : > { %v3701_v1 = vld [vmem:[#allocation2 + $0x31] sm:$0xff]  ;;  %v3705_v16 = vmax.f32 %v395_v40, %v523_v56  ;;  %v3707_v17 = vmax.f32 %v396_v41, %v524_v57  ;;  %v3709_v18 = vmax.f32 %v397_v42, %v525_v58  ;;  %v3729_v23 = vmax.f32 %v398_v38, %v526_v59  ;;  %v314_v40 = vld [vmem:[%s3550_s8 + $0xa6] sm:$0x3]  ;;  %v315_v41 = vld [vmem:[%s3550_s8 + $0xa8] sm:$0x3] }
  0x44   : > { %v3703_v10 = vld [vmem:[#allocation2 + $0x30] sm:$0xff]  ;;  %v3723_v21 = vpack.c.bf16 %v3701_v1, %v3691_v63  ;;  %v814_v24 = vrot.slane %v640_v61, 7  ;;  %v816_v27 = vrot.slane %v641_v62, 6  ;;  %v818_v28 = vrot.slane %v642_v2, 5  ;;  %v323_v38 = vld [vmem:[%s3550_s8 + $0xb8] sm:$0x3] }
  0x45   : > { %v3727_v22 = vpack.c.bf16 %v3703_v10, %v3693_v0  ;;  %v820_v29 = vrot.slane %v643_v3, 4  ;;  %v822_v30 = vrot.slane %v3695_v5, 3  ;;  %v824_v36 = vrot.slane %v3697_v6, 2  ;;  %v322_v42 = vld [vmem:[%s3550_s8 + $0xb6] sm:$0x3] }
  0x46   : > { %3202 = vmatmul.mubr.msk.bf16.vlgmr.msra.gmra.mxu0 %vm679_vm1, %v3723_v21  ;;  %v815_v35 = vsel %vm766_vm3, %v814_v24, %v639_v60  ;;  %v826_v37 = vrot.slane %v3699_v8, 1  ;;  %v828_v39 = vrot.slane %v648_v14, 7  ;;  %v830_v44 = vrot.slane %v649_v15, 6  ;;  %v316_v48 = vld [vmem:[%s3550_s8 + $0xaa] sm:$0x3] }
  0x47   : > { %3212 = vmatmul.mubr.msk.bf16.vlgmr.msra.gmra.mxu1 %vm679_vm1, %v3727_v22  ;;  %3220 = vmatpush3.bf16.msra.mxu0 %v3553_v7  ;;  %v817_v43 = vsel %vm769_vm4, %v816_v27, %v815_v35  ;;  %v832_v45 = vrot.slane %v650_v13, 5  ;;  %v834_v46 = vrot.slane %v3705_v16, 4  ;;  %v317_v49 = vld [vmem:[%s3550_s8 + $0xac] sm:$0x3]  ;;  %v324_v50 = vld [vmem:[%s3550_s8 + $0xba] sm:$0x3]  ;;  %v399_v3 = vmax.f32 %v311_v25, %v319_v26 }
  0x48   : > { %v325_v51 = vld [vmem:[%s3550_s8 + $0xbc] sm:$0x3]  ;;  %3230 = vmatpush3.bf16.msra.mxu1 %v3572_v47  ;;  %v819_v52 = vsel %vm772_vm5, %v818_v28, %v817_v43  ;;  %v829_v7 = vsel %vm766_vm3, %v828_v39, %v647_v9  ;;  %v836_v53 = vrot.slane %v3707_v17, 3  ;;  %v838_v54 = vrot.slane %v3709_v18, 2  ;;  %v318_v55 = vld [vmem:[%s3550_s8 + $0xae] sm:$0x3]  ;;  %3401 = vmatprep.subr.msk.bf16.mxu0 %vm940_vm0, %v3714_v19 }
  0x49   : > { %v326_v56 = vld [vmem:[%s3550_s8 + $0xbe] sm:$0x3]  ;;  %v327_v57 = vld [vmem:[%s3550_s8 + $0xc0] sm:$0x3]  ;;  %v328_v58 = vld [vmem:[%s3550_s8 + $0xc2] sm:$0x3]  ;;  %3402 = vmatprep.subr.msk.bf16.mxu1 %vm940_vm0, %v3719_v20  ;;  %v821_v47 = vsel %vm775_vm6, %v820_v29, %v819_v52  ;;  %v831_v59 = vsel %vm769_vm4, %v830_v44, %v829_v7  ;;  %v400_v16 = vmax.f32 %v312_v31, %v320_v33  ;;  %v401_v17 = vmax.f32 %v313_v32, %v321_v34 }
  0x4a   : > { %v840_v60 = vrot.slane %v3729_v23, 1  ;;  %v329_v61 = vld [vmem:[%s3550_s8 + $0xc4] sm:$0x3]  ;;  %v330_v62 = vld [vmem:[%s3550_s8 + $0xc6] sm:$0x3]  ;;  %v823_v5 = vsel %vm778_vm7, %v822_v30, %v821_v47  ;;  %v833_v6 = vsel %vm772_vm5, %v832_v45, %v831_v59  ;;  %v402_v27 = vmax.f32 %v314_v40, %v322_v42 }
  0x4b   : > { %v331_v2 = vld [vmem:[%s3550_s8 + $0xc8] sm:$0x3]  ;;  %v332_v8 = vld [vmem:[%s3550_s8 + $0xca] sm:$0x3]  ;;  %v333_v9 = vld [vmem:[%s3550_s8 + $0xcc] sm:$0x3]  ;;  %v825_v18 = vsel %vm781_vm8, %v824_v36, %v823_v5  ;;  %v835_v23 = vsel %vm775_vm6, %v834_v46, %v833_v6  ;;  %v403_v28 = vmax.f32 %v315_v41, %v323_v38  ;;  %v404_v44 = vmax.f32 %v316_v48, %v324_v50 }
  0x4c   : > { %v334_v14 = vld [vmem:[%s3550_s8 + $0xce] sm:$0x3]  ;;  %v335_v15 = vld [vmem:[%s3550_s8 + $0xd0] sm:$0x3]  ;;  %v336_v13 = vld [vmem:[%s3550_s8 + $0xd2] sm:$0x3]  ;;  %v827_v29 = vsel %vm784_vm9, %v826_v37, %v825_v18  ;;  %v837_v30 = vsel %vm778_vm7, %v836_v53, %v835_v23  ;;  %v405_v45 = vmax.f32 %v317_v49, %v325_v51  ;;  %v406_v32 = vmax.f32 %v318_v55, %v326_v56 }
  0x4d   : > { %v337_v24 = vld [vmem:[%s3550_s8 + $0xd4] sm:$0x3]  ;;  %v338_v25 = vld [vmem:[%s3550_s8 + $0xd6] sm:$0x3]  ;;  %v339_v26 = vld [vmem:[%s3550_s8 + $0xd8] sm:$0x3]  ;;  %v839_v31 = vsel %vm781_vm8, %v838_v54, %v837_v30  ;;  %v407_v33 = vmax.f32 %v327_v57, %v335_v15  ;;  %v408_v34 = vmax.f32 %v328_v58, %v336_v13 }
  0x4e   : > { %v340_v35 = vld [vmem:[%s3550_s8 + $0xda] sm:$0x3]  ;;  %v341_v39 = vld [vmem:[%s3550_s8 + $0xdc] sm:$0x3]  ;;  %v342_v43 = vld [vmem:[%s3550_s8 + $0xde] sm:$0x3]  ;;  %v841_v36 = vsel %vm784_vm9, %v840_v60, %v839_v31  ;;  %v409_v40 = vmax.f32 %v329_v61, %v337_v24  ;;  %v410_v41 = vmax.f32 %v330_v62, %v338_v25  ;;  %v411_v42 = vmax.f32 %v331_v2, %v339_v26 }
  0x4f   : > { %896 = vst.msk [vmem:[#allocation2 + $0x41] sm:$0xff] %vm679_vm1, %v827_v29  ;;  %897 = vst.msk [vmem:[#allocation2 + $0x51] sm:$0xff] %vm679_vm1, %v841_v36  ;;  %v412_v37 = vmax.f32 %v332_v8, %v340_v35  ;;  %v413_v38 = vmax.f32 %v333_v9, %v341_v39  ;;  %v414_v46 = vmax.f32 %v334_v14, %v342_v43  ;;  %v527_v52 = vrot.slane %v399_v3, 1 }
  0x50   : > { %v528_v48 = vrot.slane %v400_v16, 1  ;;  %v529_v49 = vrot.slane %v401_v17, 1  ;;  %v530_v50 = vrot.slane %v402_v27, 1  ;;  %v531_v51 = vrot.slane %v403_v28, 1 }
  0x51   : > { %v532_v7 = vrot.slane %v404_v44, 1  ;;  %v533_v53 = vrot.slane %v405_v45, 1  ;;  %v534_v54 = vrot.slane %v406_v32, 1  ;;  %v535_v55 = vrot.slane %v407_v33, 1 }
  0x52   : > { %v536_v56 = vrot.slane %v408_v34, 1  ;;  %v537_v57 = vrot.slane %v409_v40, 1  ;;  %v538_v58 = vrot.slane %v410_v41, 1  ;;  %v539_v47 = vrot.slane %v411_v42, 1 }
  0x53   : > { %v540_v59 = vrot.slane %v412_v37, 1  ;;  %v541_v60 = vrot.slane %v413_v38, 1  ;;  %v542_v61 = vrot.slane %v414_v46, 1  ;;  %v655_v62 = vmax.f32 %v399_v3, %v527_v52 }
  0x54   : > { %v656_v6 = vmax.f32 %v400_v16, %v528_v48  ;;  %v657_v8 = vmax.f32 %v401_v17, %v529_v49  ;;  %v658_v9 = vmax.f32 %v402_v27, %v530_v50  ;;  %v659_v14 = vmax.f32 %v403_v28, %v531_v51  ;;  %v345_v50 = vld [vmem:[%s3550_s8 + $0xe4] sm:$0x3]  ;;  %v346_v51 = vld [vmem:[%s3550_s8 + $0xe6] sm:$0x3] }
  0x55   : > { %v660_v15 = vmax.f32 %v404_v44, %v532_v7  ;;  %v661_v13 = vmax.f32 %v405_v45, %v533_v53  ;;  %v662_v18 = vmax.f32 %v406_v32, %v534_v54  ;;  %v663_v23 = vmax.f32 %v407_v33, %v535_v55  ;;  %v353_v7 = vld [vmem:[%s3550_s8 + $0xf4] sm:$0x3]  ;;  %v354_v53 = vld [vmem:[%s3550_s8 + $0xf6] sm:$0x3] }
  0x56   : > { %v3796_v2 = vld [vmem:[#allocation2 + $0x41] sm:$0xff]  ;;  %v3800_v24 = vld [vmem:[#allocation2 + $0x51] sm:$0xff]  ;;  %v664_v26 = vmax.f32 %v408_v34, %v536_v56  ;;  %v665_v29 = vmax.f32 %v409_v40, %v537_v57  ;;  %v666_v30 = vmax.f32 %v410_v41, %v538_v58  ;;  %v667_v3 = vmax.f32 %v411_v42, %v539_v47  ;;  %v348_v47 = vld [vmem:[%s3550_s8 + $0xea] sm:$0x3] }
  0x57   : > { %v3798_v5 = vld [vmem:[#allocation2 + $0x40] sm:$0xff]  ;;  %v3802_v25 = vld [vmem:[#allocation2 + $0x50] sm:$0xff]  ;;  %v3806_v35 = vpack.c.bf16 %v3800_v24, %v3796_v2  ;;  %v668_v17 = vmax.f32 %v412_v37, %v540_v59  ;;  %v669_v27 = vmax.f32 %v413_v38, %v541_v60  ;;  %v670_v28 = vmax.f32 %v414_v46, %v542_v61  ;;  %v347_v58 = vld [vmem:[%s3550_s8 + $0xe8] sm:$0x3] }
  0x58   : > { %v3810_v16 = vpack.c.bf16 %v3802_v25, %v3798_v5  ;;  %v842_v39 = vrot.slane %v656_v6, 7  ;;  %v844_v43 = vrot.slane %v657_v8, 6  ;;  %v846_v44 = vrot.slane %v658_v9, 5  ;;  %v343_v41 = vld [vmem:[%s3550_s8 + $0xe0] sm:$0x3] }
  0x59   : > { %3205 = vmatprep.mubr.msk.bf16.mxu0 %vm679_vm1, %v3806_v35  ;;  %v848_v45 = vrot.slane %v659_v14, 4  ;;  %v850_v31 = vrot.slane %v660_v15, 3  ;;  %v852_v32 = vrot.slane %v661_v13, 2  ;;  %v856_v34 = vrot.slane %v664_v26, 7  ;;  %v344_v42 = vld [vmem:[%s3550_s8 + $0xe2] sm:$0x3] }
  0x5a   : > { %3215 = vmatprep.mubr.msk.bf16.mxu1 %vm679_vm1, %v3810_v16  ;;  %v843_v33 = vsel %vm766_vm3, %v842_v39, %v655_v62  ;;  %v858_v36 = vrot.slane %v665_v29, 6  ;;  %v860_v40 = vrot.slane %v666_v30, 5  ;;  %v351_v37 = vld [vmem:[%s3550_s8 + $0xf0] sm:$0x3]  ;;  %v352_v38 = vld [vmem:[%s3550_s8 + $0xf2] sm:$0x3] }
  0x5b   : > { %v845_v46 = vsel %vm769_vm4, %v844_v43, %v843_v33  ;;  %v854_v52 = vrot.slane %v662_v18, 1  ;;  %v862_v48 = vrot.slane %v667_v3, 4  ;;  %v864_v49 = vrot.slane %v668_v17, 3  ;;  %v349_v59 = vld [vmem:[%s3550_s8 + $0xec] sm:$0x3] }
  0x5c   : > { %v847_v54 = vsel %vm772_vm5, %v846_v44, %v845_v46  ;;  %v857_v55 = vsel %vm766_vm3, %v856_v34, %v663_v23  ;;  %v866_v56 = vrot.slane %v669_v27, 2  ;;  %v868_v57 = vrot.slane %v670_v28, 1  ;;  %v355_v60 = vld [vmem:[%s3550_s8 + $0xf8] sm:$0x3]  ;;  %v356_v61 = vld [vmem:[%s3550_s8 + $0xfa] sm:$0x3] }
  0x5d   : > { %v357_v62 = vld [vmem:[%s3550_s8 + $0xfc] sm:$0x3]  ;;  %v849_v6 = vsel %vm775_vm6, %v848_v45, %v847_v54  ;;  %v859_v8 = vsel %vm769_vm4, %v858_v36, %v857_v55  ;;  %v350_v9 = vld [vmem:[%s3550_s8 + $0xee] sm:$0x3]  ;;  %v358_v14 = vld [vmem:[%s3550_s8 + $0xfe] sm:$0x3]  ;;  %v415_v26 = vmax.f32 %v343_v41, %v351_v37  ;;  %v416_v29 = vmax.f32 %v344_v42, %v352_v38 }
  0x5e   : > { %v851_v15 = vsel %vm778_vm7, %v850_v31, %v849_v6  ;;  %v861_v13 = vsel %vm772_vm5, %v860_v40, %v859_v8  ;;  %v417_v17 = vmax.f32 %v345_v50, %v353_v7  ;;  %v418_v27 = vmax.f32 %v346_v51, %v354_v53  ;;  %v1089_v54 = vld [vmem:[#allocation2 + $0x2] sm:$0xff]  ;;  %v1090_v55 = vld [vmem:[#allocation2 + $0x12] sm:$0xff] }
  0x5f   : > { %v853_v18 = vsel %vm781_vm8, %v852_v32, %v851_v15  ;;  %v863_v23 = vsel %vm775_vm6, %v862_v48, %v861_v13  ;;  %v419_v39 = vmax.f32 %v347_v58, %v355_v60  ;;  %v420_v43 = vmax.f32 %v348_v47, %v356_v61 }
  0x60   : > { %v855_v30 = vsel %vm784_vm9, %v854_v52, %v853_v18  ;;  %v865_v3 = vsel %vm778_vm7, %v864_v49, %v863_v23  ;;  %v421_v44 = vmax.f32 %v349_v59, %v357_v62  ;;  %v422_v31 = vmax.f32 %v350_v9, %v358_v14 }
  0x61   : > { %v867_v28 = vsel %vm781_vm8, %v866_v56, %v865_v3  ;;  %898 = vst.msk [vmem:[#allocation2 + $0x61] sm:$0xff] %vm679_vm1, %v855_v30  ;;  %v543_v32 = vrot.slane %v415_v26, 1  ;;  %v544_v33 = vrot.slane %v416_v29, 1  ;;  %v545_v34 = vrot.slane %v417_v17, 1  ;;  %v1092_v3 = vld [vmem:[#allocation2 + $0x32] sm:$0xff] }
  0x62   : > { %v869_v45 = vsel %vm784_vm9, %v868_v57, %v867_v28  ;;  %v546_v36 = vrot.slane %v418_v27, 1  ;;  %v547_v40 = vrot.slane %v419_v39, 1  ;;  %v548_v41 = vrot.slane %v420_v43, 1  ;;  %v1094_v28 = vld [vmem:[#allocation2 + $0x52] sm:$0xff] }
  0x63   : > { %899 = vst.msk [vmem:[#allocation2 + $0x71] sm:$0xff] %vm679_vm1, %v869_v45  ;;  %v549_v42 = vrot.slane %v421_v44, 1  ;;  %v550_v37 = vrot.slane %v422_v31, 1  ;;  %v671_v38 = vmax.f32 %v415_v26, %v543_v32  ;;  %v672_v46 = vmax.f32 %v416_v29, %v544_v33  ;;  %v2993_v33 = vld [vmem:[%s4211_s1 + $0xc] sm:$0x3] }
  0x64   : > { %v673_v52 = vmax.f32 %v417_v17, %v545_v34  ;;  %v674_v48 = vmax.f32 %v418_v27, %v546_v36  ;;  %v675_v49 = vmax.f32 %v419_v39, %v547_v40  ;;  %v676_v50 = vmax.f32 %v420_v43, %v548_v41  ;;  %v1093_v27 = vld [vmem:[#allocation2 + $0x42] sm:$0xff] }
  0x65   : > { %v677_v51 = vmax.f32 %v421_v44, %v549_v42  ;;  %v678_v7 = vmax.f32 %v422_v31, %v550_v37  ;;  %v870_v53 = vrot.slane %v672_v46, 7  ;;  %v1097_v14 = vpack.c.bf16 %v1090_v55, %v1089_v54  ;;  %v3990_v54 = vld [vmem:[%s4213_s3 + $0x28] sm:$0xff]  }
  0x66   : > { %v872_v56 = vrot.slane %v673_v52, 6  ;;  %v874_v57 = vrot.slane %v674_v48, 5  ;;  %v876_v58 = vrot.slane %v675_v49, 4  ;;  %v878_v61 = vrot.slane %v676_v50, 3  ;;  %v1505_v49 = vld [vmem:[#allocation2 + $0x90] sm:$0xff]  ;;  %4219 = vst [vmem:[#allocation4_spill] sm:$0xff] %v3990_v54 }
  0x67   : > { %v871_v60 = vsel %vm766_vm3, %v870_v53, %v671_v38  ;;  %v880_v6 = vrot.slane %v677_v51, 2  ;;  %v1199_v15 = vpack.c.bf16 %v3693_v0, %v3616_v12  ;;  %v882_v18 = vrot.slane %v678_v7, 1  ;;  %v1091_v0 = vld [vmem:[#allocation2 + $0x22] sm:$0xff]  ;;  %v1607_v50 = vld [vmem:[#allocation2 + $0x91] sm:$0xff] }
  0x68   : > { %v3848_v47 = vld [vmem:[#allocation2 + $0x61] sm:$0xff]  ;;  %v873_v62 = vsel %vm769_vm4, %v872_v56, %v871_v60  ;;  %v1098_v39 = vpack.c.bf16 %v1092_v3, %v1091_v0  ;;  %v1200_v43 = vpack.c.bf16 %v3798_v5, %v3703_v10  ;;  %v1099_v44 = vpack.c.bf16 %v1094_v28, %v1093_v27  ;;  %v2998_v10 = vld [vmem:[%s4211_s1 + $0xe] sm:$0x3]  ;;  %v3416_v53 = vld [vmem:[%s4213_s3 + $0x10] sm:$0xff]  }
  0x69   : > { %v907_v59 = vld [vmem:[#allocation2 + $0x60] sm:$0xff]  ;;  %v875_v13 = vsel %vm772_vm5, %v874_v57, %v873_v62  ;;  %v1320_v45 = vsel %vm940_vm0, %v3714_v19, 0  ;;  %v1422_v32 = vsel %vm940_vm0, %v3719_v20, 0  ;;  %v1301_v36 = vpack.c.bf16 %v3691_v63, %v3614_v11  ;;  %v3003_v63 = vld [vmem:[%s4211_s1 + $0x10] sm:$0x3]  ;;  %v3417_v7 = vld [vmem:[%s4213_s3 + $0x8] sm:$0xff]  }
  0x6a   : > { %v3852_v8 = vld [vmem:[#allocation2 + $0x71] sm:$0xff]  ;;  %v877_v29 = vsel %vm775_vm6, %v876_v58, %v875_v13  ;;  %v1201_v31 = vpack.c.bf16 %v907_v59, %v3802_v25  ;;  %v1095_v19 = vld [vmem:[#allocation2 + $0x62] sm:$0xff]  ;;  %v1403_v40 = vpack.c.bf16 %v1091_v0, %v1090_v55  ;;  %v1302_v41 = vpack.c.bf16 %v3796_v2, %v3701_v1 }
  0x6b   : > { %v908_v9 = vld [vmem:[#allocation2 + $0x70] sm:$0xff]  ;;  %v3859_v23 = vpack.c.bf16 %v3852_v8, %v3848_v47  ;;  %v879_v30 = vsel %vm778_vm7, %v878_v61, %v877_v29  ;;  %v1404_v42 = vpack.c.bf16 %v1093_v27, %v1092_v3  ;;  %v1303_v37 = vpack.c.bf16 %v3848_v47, %v3800_v24  ;;  %v3996_v55 = vld [vmem:[%s4213_s3 + $0x38] sm:$0xff]  }
  0x6c   : > { %v3861_v26 = vpack.c.bf16 %v908_v9, %v907_v59  ;;  %v881_v12 = vsel %vm781_vm8, %v880_v6, %v879_v30  ;;  %v1096_v5 = vld [vmem:[#allocation2 + $0x72] sm:$0xff]  ;;  %v1525_v38 = vsel %vm940_vm0, %v2993_v33, 0  ;;  %v1405_v46 = vpack.c.bf16 %v1095_v19, %v1094_v28  ;;  %4220 = vst [vmem:[#allocation5_spill] sm:$0xff] %v3996_v55 }
  0x6d   : > { %3206 = vmatmul.mubr.msk.bf16.gmra.mxu0 %vm679_vm1, %v3859_v23  ;;  %v883_v17 = vsel %vm784_vm9, %v882_v18, %v881_v12  ;;  %v1100_v20 = vpack.c.bf16 %v1096_v5, %v1095_v19  ;;  %v1627_v11 = vsel %vm940_vm0, %v2998_v10, 0  ;;  %v1729_v48 = vsel %vm940_vm0, %v3003_v63, 0 }
  0x6e   : > { %3216 = vmatmul.mubr.msk.bf16.gmra.mxu1 %vm679_vm1, %v3861_v26  ;;  %3221 = vmatprep.mubr.msk.bf16.mxu0 %vm679_vm1, %v1097_v14  ;;  %900 = vst.msk [vmem:[#allocation2 + $0x81] sm:$0xff] %vm679_vm1, %v883_v17  ;;  %vm1827_vm10 = vcmask 261120   ;;  %vm1829_vm11 = vcmask 254976  }
  0x6f   : > { %3231 = vmatprep.mubr.msk.bf16.mxu1 %vm679_vm1, %v1199_v15  ;;  %1835 = vst.msk [vmem:[#allocation3 + $0x30] sm:$0xff] %vm1827_vm10, %v3441_v4  ;;  %1828 = vst.msk [vmem:[#allocation3] sm:$0xff] %vm1827_vm10, %v3441_v4 }
  0x70   : > { %1836 = vst.msk [vmem:[#allocation3 + $0x38] sm:$0x3] %vm1829_vm11, %v3441_v4  ;;  %1830 = vst.msk [vmem:[#allocation3 + $0x8] sm:$0x3] %vm1829_vm11, %v3441_v4 }
  0x71   : > { %1831 = vst.msk [vmem:[#allocation3 + $0x10] sm:$0xff] %vm1827_vm10, %v3441_v4  ;;  %1833 = vst.msk [vmem:[#allocation3 + $0x20] sm:$0xff] %vm1827_vm10, %v3441_v4 }
  0x72   : > { %1832 = vst.msk [vmem:[#allocation3 + $0x18] sm:$0x3] %vm1829_vm11, %v3441_v4  ;;  %1834 = vst.msk [vmem:[#allocation3 + $0x28] sm:$0x3] %vm1829_vm11, %v3441_v4 }
  0x73   : > { %1837 = vst.msk [vmem:[#allocation3 + $0x40] sm:$0xff] %vm1827_vm10, %v3441_v4  ;;  %1839 = vst.msk [vmem:[#allocation3 + $0x50] sm:$0xff] %vm1827_vm10, %v3441_v4 }
  0x74   : > { %1838 = vst.msk [vmem:[#allocation3 + $0x48] sm:$0x3] %vm1829_vm11, %v3441_v4  ;;  %1840 = vst.msk [vmem:[#allocation3 + $0x58] sm:$0x3] %vm1829_vm11, %v3441_v4 }
  0x75   : > { %3222 = vmatmul.mubr.msk.bf16.vlgmr.msra.gmra.mxu0 %vm679_vm1, %v1098_v39  ;;  %v1198_v25 = vld [vmem:[#allocation2 + $0x80] sm:$0xff]  ;;  %1841 = vst.msk [vmem:[#allocation3 + $0x60] sm:$0xff] %vm1827_vm10, %v3441_v4  ;;  %1843 = vst.msk [vmem:[#allocation3 + $0x70] sm:$0xff] %vm1827_vm10, %v3441_v4 }
  0x76   : > { %3232 = vmatmul.mubr.msk.bf16.vlgmr.msra.gmra.mxu1 %vm679_vm1, %v1200_v43  ;;  %3240 = vmatpush3.bf16.msra.mxu0 %v1320_v45  ;;  %v1202_v34 = vpack.c.bf16 %v1198_v25, %v908_v9  ;;  %v1300_v1 = vld [vmem:[#allocation2 + $0x81] sm:$0xff]  ;;  %1842 = vst.msk [vmem:[#allocation3 + $0x68] sm:$0x3] %vm1829_vm11, %v3441_v4  ;;  %1844 = vst.msk [vmem:[#allocation3 + $0x78] sm:$0x3] %vm1829_vm11, %v3441_v4 }
  0x77   : > { %3225 = vmatprep.mubr.msk.bf16.mxu0 %vm679_vm1, %v1099_v44  ;;  %3235 = vmatprep.mubr.msk.bf16.mxu1 %vm679_vm1, %v1201_v31  ;;  %v1402_v2 = vld [vmem:[#allocation2 + $0x82] sm:$0xff]  ;;  %v1304_v24 = vpack.c.bf16 %v1300_v1, %v3852_v8  ;;  %v1611_v51 = vpack.c.bf16 %v1607_v50, %v1300_v1  ;;  %1845 = vst.msk [vmem:[#allocation3 + $0x80] sm:$0xff] %vm1827_vm10, %v3441_v4  ;;  %1847 = vst.msk [vmem:[#allocation3 + $0x90] sm:$0xff] %vm1827_vm10, %v3441_v4 }
  0x78   : > { %3250 = vmatpush3.bf16.msra.mxu1 %v1422_v32  ;;  %3403 = vmatprep.subr.msk.bf16.mxu0 %vm940_vm0, %v2993_v33  ;;  %v1406_v52 = vpack.c.bf16 %v1402_v2, %v1096_v5  ;;  %1846 = vst.msk [vmem:[#allocation3 + $0x88] sm:$0x3] %vm1829_vm11, %v3441_v4  ;;  %1848 = vst.msk [vmem:[#allocation3 + $0x98] sm:$0x3] %vm1829_vm11, %v3441_v4  ;;  %v3418_v4 = vld [vmem:[%s4213_s3] sm:$0xff]  }
  0x79   : > { %3404 = vmatprep.subr.msk.bf16.mxu1 %vm940_vm0, %v2998_v10 }
  0x7d   : > { %3226 = vmatmul.mubr.msk.bf16.gmra.mxu0 %vm679_vm1, %v1100_v20 }
  0x7e   : > { %3236 = vmatmul.mubr.msk.bf16.gmra.mxu1 %vm679_vm1, %v1202_v34  ;;  %3241 = vmatprep.mubr.msk.bf16.mxu0 %vm679_vm1, %v1301_v36 }
  0x7f   : > { %3251 = vmatprep.mubr.msk.bf16.mxu1 %vm679_vm1, %v1403_v40 }
  0x85   : > { %3242 = vmatmul.mubr.msk.bf16.vlgmr.msra.gmra.mxu0 %vm679_vm1, %v1302_v41 }
  0x86   : > { %3252 = vmatmul.mubr.msk.bf16.vlgmr.msra.gmra.mxu1 %vm679_vm1, %v1404_v42  ;;  %3260 = vmatpush3.bf16.msra.mxu0 %v1525_v38 }
  0x87   : > { %3245 = vmatprep.mubr.msk.bf16.mxu0 %vm679_vm1, %v1303_v37  ;;  %3255 = vmatprep.mubr.msk.bf16.mxu1 %vm679_vm1, %v1405_v46 }
  0x88   : > { %3270 = vmatpush3.bf16.msra.mxu1 %v1627_v11  ;;  %3405 = vmatprep.subr.msk.bf16.mxu0 %vm940_vm0, %v3003_v63 }
  0x8d   : > { %3246 = vmatmul.mubr.msk.bf16.gmra.mxu0 %vm679_vm1, %v1304_v24 }
  0x8e   : > { %3256 = vmatmul.mubr.msk.bf16.gmra.mxu1 %vm679_vm1, %v1406_v52  ;;  %3261 = vmatprep.mubr.msk.bf16.mxu0 %vm679_vm1, %v3727_v22  ;;  %v1509_v22 = vpack.c.bf16 %v1505_v49, %v1198_v25 }
  0x8f   : > { %3271 = vmatprep.mubr.msk.bf16.mxu1 %vm679_vm1, %v3723_v21  ;;  %v1709_v21 = vld [vmem:[#allocation2 + $0x92] sm:$0xff] }
  0x95   : > { %3262 = vmatmul.mubr.msk.bf16.vlgmr.msra.gmra.mxu0 %vm679_vm1, %v3810_v16  ;;  %v3415_v16 = vld [vmem:[%s4213_s3 + $0x18] sm:$0xff]  }
  0x96   : > { %3272 = vmatmul.mubr.msk.bf16.vlgmr.msra.gmra.mxu1 %vm679_vm1, %v3806_v35  ;;  %3280 = vmatpush3.bf16.msra.mxu0 %v1729_v48  ;;  %v1713_v35 = vpack.c.bf16 %v1709_v21, %v1402_v2 }
  0x97   : > { %3265 = vmatprep.mubr.msk.bf16.mxu0 %vm679_vm1, %v3861_v26  ;;  %3275 = vmatprep.mubr.msk.bf16.mxu1 %vm679_vm1, %v3859_v23 }
  0x98   : > { %3289 = vmatprep.subr.bf16.mxu1 %v3415_v16  ;;  %3301 = vmatprep.subr.bf16.mxu0 %v3417_v7 }
  0x99   : > { %3290 = vmatpush3.bf16.msra.mxu1 %v3415_v16 }
  0x9a   : > { %3291 = vmatprep.subr.bf16.mxu1 %v3416_v53 }
  0x9d   : > { %3266 = vmatmul.mubr.msk.bf16.gmra.mxu0 %vm679_vm1, %v1509_v22  ;;  %3292 = vmatpush3.bf16.msra.mxu1 %v3416_v53 }
  0x9e   : > { %3276 = vmatmul.mubr.msk.bf16.gmra.mxu1 %vm679_vm1, %v1611_v51  ;;  %3281 = vmatprep.mubr.msk.bf16.mxu0 %vm679_vm1, %v1098_v39 }
  0x9f   : > { %3313 = vmatprep.subr.bf16.mxu1 %v3990_v54 }
  0xa5   : > { %3282 = vmatmul.mubr.msk.bf16.vlgmr.msra.gmra.mxu0 %vm679_vm1, %v1099_v44 }
  0xa6   : > { %3285 = vmatprep.mubr.msk.bf16.mxu0 %vm679_vm1, %v1100_v20  ;;  %3302 = vmatpush3.bf16.msra.mxu0 %v3417_v7 }
  0xa7   : > { %3303 = vmatprep.subr.bf16.mxu0 %v3418_v4 }
  0xaa   : > { %3304 = vmatpush3.bf16.msra.mxu0 %v3418_v4 }
  0xab   : > { %3325 = vmatprep.subr.bf16.mxu0 %v3996_v55 }
  0xad   : > { %3286 = vmatmul.mubr.msk.bf16.gmra.mxu0 %vm679_vm1, %v1713_v35 }
 0x106   : > { %v3203_v56 = vpop.f32.mrf.mxu0 }
 0x107   : > { %v3213_v57 = vpop.f32.mrf.mxu1 }
 0x108   : > { %v978_v58 = vpop.f32.mrf.mxu0  ;;  %v1067_v63 = vadd.f32 %v3213_v57, %v3203_v56 }
 0x109   : > { %v1058_v47 = vpop.f32.mrf.mxu1 }
 0x10a   : > { %v3204_v59 = vpop.f32.mrf.mxu0  ;;  %v1059_v24 = vadd.f32 %v1058_v47, %v978_v58 }
 0x10b   : > { %v3214_v60 = vpop.f32.mrf.mxu1 }
 0x10c   : > { %v981_v61 = vpop.f32.mrf.mxu0  ;;  %v1070_v50 = vadd.f32 %v3214_v60, %v3204_v59 }
 0x10d   : > { %v1061_v62 = vpop.f32.mrf.mxu1 }
 0x10e   : > { %v1062_v35 = vadd.f32 %v1061_v62, %v981_v61 }
 0x12d   : > { %v3207_v6 = vpop.f32.mrf.mxu0 }
 0x12e   : > { %v3217_v8 = vpop.f32.mrf.mxu1 }
 0x12f   : > { %v994_v9 = vpop.f32.mrf.mxu0  ;;  %v1083_v53 = vadd.f32 %v3217_v8, %v3207_v6 }
 0x130   : > { %v1074_v14 = vpop.f32.mrf.mxu1 }
 0x131   : > { %v3208_v15 = vpop.f32.mrf.mxu0  ;;  %v1075_v56 = vadd.f32 %v1074_v14, %v994_v9 }
 0x132   : > { %v3218_v13 = vpop.f32.mrf.mxu1 }
 0x133   : > { %v3999_v18 = vpop.f32.mrf.mxu0 }
 0x134   : > { %v1077_v23 = vpop.f32.mrf.mxu1 }
 0x135   : > { %v3223_v26 = vpop.f32.mrf.mxu0  ;;  %v1078_v61 = vadd.f32 %v1077_v23, %v3999_v18 }
 0x136   : > { %v3233_v29 = vpop.f32.mrf.mxu1  ;;  %v1185_v52 = vadd.f32 %v3223_v26, %v1067_v63  ;;  %v1086_v26 = vadd.f32 %v3218_v13, %v3208_v15 }
 0x137   : > { %v1152_v30 = vpop.f32.mrf.mxu0 }
 0x138   : > { %v1254_v12 = vpop.f32.mrf.mxu1  ;;  %v1183_v22 = vadd.f32 %v1152_v30, %v1059_v24  ;;  %v1287_v16 = vadd.f32 %v3233_v29, %v1185_v52 }
 0x139   : > { %v3224_v0 = vpop.f32.mrf.mxu0 }
 0x13a   : > { %v3234_v3 = vpop.f32.mrf.mxu1  ;;  %v1186_v7 = vadd.f32 %v3224_v0, %v1070_v50  ;;  %v1285_v55 = vadd.f32 %v1254_v12, %v1183_v22 }
 0x13b   : > { %v1155_v17 = vpop.f32.mrf.mxu0 }
 0x13c   : > { %v1257_v27 = vpop.f32.mrf.mxu1  ;;  %v1184_v54 = vadd.f32 %v1155_v17, %v1062_v35  ;;  %v1288_v58 = vadd.f32 %v3234_v3, %v1186_v7 }
 0x13d   : > { %v3227_v28 = vpop.f32.mrf.mxu0 }
 0x13e   : > { %v3237_v39 = vpop.f32.mrf.mxu1  ;;  %v1189_v57 = vadd.f32 %v3227_v28, %v1083_v53  ;;  %v1286_v60 = vadd.f32 %v1257_v27, %v1184_v54 }
 0x13f   : > { %v1168_v43 = vpop.f32.mrf.mxu0 }
 0x140   : > { %v1270_v44 = vpop.f32.mrf.mxu1  ;;  %v1187_v63 = vadd.f32 %v1168_v43, %v1075_v56  ;;  %v1291_v62 = vadd.f32 %v3237_v39, %v1189_v57 }
 0x141   : > { %v3228_v45 = vpop.f32.mrf.mxu0 }
 0x142   : > { %v3238_v31 = vpop.f32.mrf.mxu1  ;;  %v1190_v6 = vadd.f32 %v3228_v45, %v1086_v26  ;;  %v1289_v14 = vadd.f32 %v1270_v44, %v1187_v63  ;;  %v3008_v44 = vld [vmem:[%s4212_s2] ss:$0 sm:$0xff] }
 0x143   : > { %v1171_v32 = vpop.f32.mrf.mxu0 }
 0x144   : > { %v4001_v33 = vpop.f32.mrf.mxu1  ;;  %v1188_v17 = vadd.f32 %v1171_v32, %v1078_v61  ;;  %v1292_v13 = vadd.f32 %v3238_v31, %v1190_v6 }
 0x145   : > { %v3243_v10 = vpop.f32.mrf.mxu0 }
 0x146   : > { %v3253_v19 = vpop.f32.mrf.mxu1  ;;  %v1290_v23 = vadd.f32 %v4001_v33, %v1188_v17  ;;  %v1874_v17 = vld [vmem:[#allocation3 + $0x1] sm:$0xff] }
 0x147   : > { %v1356_v5 = vpop.f32.mrf.mxu0 }
 0x148   : > { %v1458_v25 = vpop.f32.mrf.mxu1  ;;  %v1387_v47 = vadd.f32 %v1356_v5, %v1285_v55 }
 0x149   : > { %v3244_v20 = vpop.f32.mrf.mxu0 }
 0x14a   : > { %v3254_v34 = vpop.f32.mrf.mxu1  ;;  %v1390_v24 = vadd.f32 %v3244_v20, %v1288_v58  ;;  %v1489_v12 = vadd.f32 %v1458_v25, %v1387_v47 }
 0x14b   : > { %v1359_v36 = vpop.f32.mrf.mxu0 }
 0x14c   : > { %v1461_v40 = vpop.f32.mrf.mxu1  ;;  %v1388_v0 = vadd.f32 %v1359_v36, %v1286_v60  ;;  %v1492_v55 = vadd.f32 %v3254_v34, %v1390_v24 }
 0x14d   : > { %v3247_v41 = vpop.f32.mrf.mxu0 }
 0x14e   : > { %v3257_v42 = vpop.f32.mrf.mxu1  ;;  %v1393_v28 = vadd.f32 %v3247_v41, %v1291_v62 }
 0x14f   : > { %v1372_v37 = vpop.f32.mrf.mxu0 }
 0x150   : > { %v4003_v38 = vpop.f32.mrf.mxu1  ;;  %v1391_v43 = vadd.f32 %v1372_v37, %v1289_v14  ;;  %v1495_v39 = vadd.f32 %v3257_v42, %v1393_v28  ;;  %v1858_v28 = vld [vmem:[#allocation3] sm:$0xff] }
 0x151   : > { %4221 = vst [vmem:[#allocation6_spill] sm:$0xff] %v4003_v38  ;;  %v3248_v46 = vpop.f32.mrf.mxu0 }
 0x152   : > { %v4005_v11 = vpop.f32.mrf.mxu1  ;;  %v1394_v45 = vadd.f32 %v3248_v46, %v1292_v13 }
 0x153   : > { %4222 = vst [vmem:[#allocation7_spill] sm:$0xff] %v4005_v11  ;;  %v1375_v1 = vpop.f32.mrf.mxu0  ;;  %v1389_v11 = vadd.f32 %v3243_v10, %v1287_v16  ;;  %v1490_v10 = vadd.f32 %v1461_v40, %v1388_v0 }
 0x154   : > { %v4007_v2 = vpop.f32.mrf.mxu1  ;;  %v1392_v36 = vadd.f32 %v1375_v1, %v1290_v23 }
 0x155   : > { %4223 = vst [vmem:[#allocation8_spill] sm:$0xff] %v4007_v2  ;;  %v3263_v48 = vpop.f32.mrf.mxu0  ;;  %v1491_v30 = vadd.f32 %v3253_v19, %v1389_v11 }
 0x156   : > { %v3273_v49 = vpop.f32.mrf.mxu1 }
 0x157   : > { %v1561_v51 = vpop.f32.mrf.mxu0  ;;  %v1594_v9 = vadd.f32 %v3263_v48, %v1491_v30 }
 0x158   : > { %v1663_v21 = vpop.f32.mrf.mxu1  ;;  %v1592_v15 = vadd.f32 %v1561_v51, %v1489_v12  ;;  %v4224_v34 = vld [vmem:[#allocation6_spill] sm:$0xff] }
 0x159   : > { %v3264_v4 = vpop.f32.mrf.mxu0  ;;  %v1696_v19 = vadd.f32 %v3273_v49, %v1594_v9  ;;  %v1493_v31 = vadd.f32 %v4224_v34, %v1391_v43 }
 0x15a   : > { %v3274_v2 = vpop.f32.mrf.mxu1  ;;  %v1595_v18 = vadd.f32 %v3264_v4, %v1492_v55  ;;  %v1694_v32 = vadd.f32 %v1663_v21, %v1592_v15  ;;  %v4225_v33 = vld [vmem:[#allocation7_spill] sm:$0xff] }
 0x15b   : > { %v1564_v38 = vpop.f32.mrf.mxu0  ;;  %v1496_v42 = vadd.f32 %v4225_v33, %v1394_v45  ;;  %v3425_v33 = vld [vmem:[%s4213_s3 + $0x58] sm:$0xff]  }
 0x15c   : > { %v1666_v8 = vpop.f32.mrf.mxu1  ;;  %v1593_v25 = vadd.f32 %v1564_v38, %v1490_v10  ;;  %v1697_v11 = vadd.f32 %v3274_v2, %v1595_v18  ;;  %v4226_v21 = vld [vmem:[#allocation8_spill] sm:$0xff] }
 0x15d   : > { %v3267_v59 = vpop.f32.mrf.mxu0  ;;  %v1494_v38 = vadd.f32 %v4226_v21, %v1392_v36 }
 0x15e   : > { %v3277_v54 = vpop.f32.mrf.mxu1  ;;  %v1598_v41 = vadd.f32 %v3267_v59, %v1495_v39  ;;  %v1695_v50 = vadd.f32 %v1666_v8, %v1593_v25  ;;  %v3420_v25 = vld [vmem:[%s4213_s3 + $0x20] sm:$0xff]  }
 0x15f   : > { %v1577_v29 = vpop.f32.mrf.mxu0 }
 0x160   : > { %v1679_v37 = vpop.f32.mrf.mxu1  ;;  %v1596_v46 = vadd.f32 %v1577_v29, %v1493_v31  ;;  %v1700_v16 = vadd.f32 %v3277_v54, %v1598_v41  ;;  %v4227_v31 = vld [vmem:[#allocation4_spill] sm:$0xff] }
 0x161   : > { %v3268_v3 = vpop.f32.mrf.mxu0 }
 0x162   : > { %v3278_v7 = vpop.f32.mrf.mxu1  ;;  %v1599_v1 = vadd.f32 %v3268_v3, %v1496_v42  ;;  %v1698_v57 = vadd.f32 %v1679_v37, %v1596_v46  ;;  %v2069_v46 = vld [vmem:[#allocation3 + $0x2] sm:$0xff] }
 0x163   : > { %v1580_v27 = vpop.f32.mrf.mxu0 }
 0x164   : > { %v1597_v47 = vadd.f32 %v1580_v27, %v1494_v38  ;;  %v1682_v60 = vpop.f32.mrf.mxu1  ;;  %v1701_v24 = vadd.f32 %v3278_v7, %v1599_v1 }
 0x165   : > { %v3283_v5 = vpop.f32.mrf.mxu0 }
 0x166   : > { %v1798_v20 = vadd.f32 %v3283_v5, %v1696_v19  ;;  %v1699_v29 = vadd.f32 %v1682_v60, %v1597_v47 }
 0x167   : > { %v1765_v40 = vpop.f32.mrf.mxu0 }
 0x168   : > { %v1813_v52 = vadd.f32 %v3008_v44, %v1798_v20  ;;  %v1796_v48 = vadd.f32 %v1765_v40, %v1694_v32  ;;  %v3422_v20 = vld [vmem:[%s4213_s3 + $0x30] sm:$0xff]   ;;  %v4228_v40 = vld [vmem:[#allocation5_spill] sm:$0xff] }
 0x169   : > { %v3284_v49 = vpop.f32.mrf.mxu0 }
 0x16a   : > { %v1821_v22 = vmax.f32 %v1813_v52, 0.0  ;;  %v1811_v51 = vadd.f32 %v3008_v44, %v1796_v48  ;;  %v1799_v35 = vadd.f32 %v3284_v49, %v1697_v11  ;;  %v3423_v48 = vld [vmem:[%s4213_s3 + $0x48] sm:$0xff]  }
 0x16b   : > { %v1768_v53 = vpop.f32.mrf.mxu0 }
 0x16c   : > { %1852 = vst.msk [vmem:[#allocation3 + $0x31] sm:$0xff] %vm1827_vm10, %v1821_v22  ;;  %v1819_v4 = vmax.f32 %v1811_v51, 0.0  ;;  %v1814_v2 = vadd.f32 %v3008_v44, %v1799_v35  ;;  %v1797_v56 = vadd.f32 %v1768_v53, %v1695_v50 }
 0x16d   : > { %v3287_v58 = vpop.f32.mrf.mxu0 }
 0x16e   : > { %1850 = vst.msk [vmem:[#allocation3 + $0x11] sm:$0xff] %vm1827_vm10, %v1819_v4  ;;  %v1822_v26 = vmax.f32 %v1814_v2, 0.0  ;;  %v1812_v63 = vadd.f32 %v3008_v44, %v1797_v56  ;;  %v1802_v59 = vadd.f32 %v3287_v58, %v1700_v16 }
 0x16f   : > { %v1781_v30 = vpop.f32.mrf.mxu0 }
 0x170   : > { %1853 = vst.msk [vmem:[#allocation3 + $0x41] sm:$0xff] %vm1827_vm10, %v1822_v26  ;;  %v1820_v61 = vmax.f32 %v1812_v63, 0.0  ;;  %v1817_v62 = vadd.f32 %v3008_v44, %v1802_v59  ;;  %v1800_v6 = vadd.f32 %v1781_v30, %v1698_v57  ;;  %v3424_v57 = vld [vmem:[%s4213_s3 + $0x40] sm:$0xff]   ;;  %v3426_v26 = vld [vmem:[%s4213_s3 + $0x50] sm:$0xff]   ;;  %v3427_v63 = vld [vmem:[%s4213_s3 + $0x68] sm:$0xff]  }
 0x171   : > { %v3288_v8 = vpop.f32.mrf.mxu0 }
 0x172   : > { %1851 = vst.msk [vmem:[#allocation3 + $0x21] sm:$0xff] %vm1827_vm10, %v1820_v61  ;;  %v1825_v12 = vmax.f32 %v1817_v62, 0.0  ;;  %v1815_v0 = vadd.f32 %v3008_v44, %v1800_v6  ;;  %v1803_v9 = vadd.f32 %v3288_v8, %v1701_v24  ;;  %v3429_v62 = vld [vmem:[%s4213_s3 + $0x78] sm:$0xff]  }
 0x173   : > { %v1784_v14 = vpop.f32.mrf.mxu0  ;;  %v4029_v23 = vld [vmem:[#allocation3 + $0x31] sm:$0xff] }
 0x174   : > { %1856 = vst.msk [vmem:[#allocation3 + $0x71] sm:$0xff] %vm1827_vm10, %v1825_v12  ;;  %v1823_v3 = vmax.f32 %v1815_v0, 0.0  ;;  %v1818_v55 = vadd.f32 %v3008_v44, %v1803_v9  ;;  %v1801_v15 = vadd.f32 %v1784_v14, %v1699_v29  ;;  %v1861_v5 = vld [vmem:[#allocation3 + $0x30] sm:$0xff]  ;;  %v3428_v0 = vld [vmem:[%s4213_s3 + $0x60] sm:$0xff]  }
 0x175   : > { %v4022_v13 = vld [vmem:[#allocation3 + $0x11] sm:$0xff] }
 0x176   : > { %v1859_v43 = vld [vmem:[#allocation3 + $0x10] sm:$0xff]  ;;  %1854 = vst.msk [vmem:[#allocation3 + $0x51] sm:$0xff] %vm1827_vm10, %v1823_v3  ;;  %v1826_v54 = vmax.f32 %v1818_v55, 0.0  ;;  %v1816_v27 = vadd.f32 %v3008_v44, %v1801_v15  ;;  %v1882_v10 = vpack.c.bf16 %v4022_v13, %v1874_v17 }
 0x177   : > { %v1866_v19 = vpack.c.bf16 %v1859_v43, %v1858_v28  ;;  %v4050_v34 = vld [vmem:[#allocation3 + $0x41] sm:$0xff]  ;;  %v2070_v49 = vld [vmem:[#allocation3 + $0x12] sm:$0xff] }
 0x178   : > { %1857 = vst.msk [vmem:[#allocation3 + $0x81] sm:$0xff] %vm1827_vm10, %v1826_v54  ;;  %v1824_v18 = vmax.f32 %v1816_v27, 0.0  ;;  %3293 = vmatprep.mubr.msk.bf16.mxu1 %vm1827_vm10, %v1882_v10  ;;  %v1862_v41 = vld [vmem:[#allocation3 + $0x40] sm:$0xff]  ;;  %v2077_v38 = vpack.c.bf16 %v2070_v49, %v2069_v46  ;;  %v2072_v1 = vld [vmem:[#allocation3 + $0x32] sm:$0xff]  ;;  %v2306_v29 = vpack.c.bf16 %v4050_v34, %v4029_v23  ;;  %v3431_v28 = vld [vmem:[%s4213_s3 + $0x88] sm:$0xff]  }
 0x179   : > { %3305 = vmatprep.mubr.msk.bf16.mxu0 %vm1827_vm10, %v1866_v19  ;;  %v4031_v39 = vld [vmem:[#allocation3 + $0x21] sm:$0xff]  ;;  %v2192_v2 = vpack.c.bf16 %v1862_v41, %v1861_v5  ;;  %v3430_v17 = vld [vmem:[%s4213_s3 + $0x70] sm:$0xff]  }
 0x17a   : > { %v1860_v45 = vld [vmem:[#allocation3 + $0x20] sm:$0xff]  ;;  %1855 = vst.msk [vmem:[#allocation3 + $0x61] sm:$0xff] %vm1827_vm10, %v1824_v18  ;;  %v4036_v44 = vpack.c.bf16 %v4029_v23, %v4031_v39  ;;  %v2305_v6 = vpack.c.bf16 %v4031_v39, %v4022_v13  ;;  %v2533_v54 = vld [vmem:[#allocation3 + $0x90] sm:$0xff] }
 0x17b   : > { %v4038_v32 = vpack.c.bf16 %v1861_v5, %v1860_v45  ;;  %v4072_v42 = vld [vmem:[#allocation3 + $0x71] sm:$0xff]  ;;  %v2191_v16 = vpack.c.bf16 %v1860_v45, %v1859_v43  ;;  %v2071_v7 = vld [vmem:[#allocation3 + $0x22] sm:$0xff] }
 0x17c   : > { %3294 = vmatmul.mubr.msk.bf16.vlgmr.msra.gmra.mxu1 %vm1827_vm10, %v4036_v44  ;;  %v1865_v51 = vld [vmem:[#allocation3 + $0x70] sm:$0xff]  ;;  %v4085_v4 = vpack.c.bf16 %v2072_v1, %v2071_v7  ;;  %v2073_v56 = vld [vmem:[#allocation3 + $0x42] sm:$0xff]  ;;  %v2419_v8 = vpack.c.bf16 %v2071_v7, %v2070_v49 }
 0x17d   : > { %3306 = vmatmul.mubr.msk.bf16.vlgmr.msra.gmra.mxu0 %vm1827_vm10, %v4038_v32  ;;  %3314 = vmatpush3.bf16.msra.mxu1 %v4227_v31  ;;  %v4053_v36 = vld [vmem:[#allocation3 + $0x51] sm:$0xff]  ;;  %v2420_v12 = vpack.c.bf16 %v2073_v56, %v2072_v1  ;;  %v3432_v43 = vld [vmem:[%s4213_s3 + $0x80] sm:$0xff]  }
 0x17e   : > { %v1863_v37 = vld [vmem:[#allocation3 + $0x50] sm:$0xff]  ;;  %3326 = vmatpush3.bf16.msra.mxu0 %v4228_v40  ;;  %v4058_v11 = vpack.c.bf16 %v4053_v36, %v4050_v34  ;;  %3315 = vmatprep.subr.bf16.mxu1 %v3420_v25 }
 0x17f   : > { %v4060_v52 = vpack.c.bf16 %v1863_v37, %v1862_v41  ;;  %3327 = vmatprep.subr.bf16.mxu0 %v3422_v20  ;;  %v2074_v53 = vld [vmem:[#allocation3 + $0x52] sm:$0xff]  ;;  %v2190_v60 = vld [vmem:[#allocation3 + $0x80] sm:$0xff] }
 0x180   : > { %3297 = vmatprep.mubr.msk.bf16.mxu1 %vm1827_vm10, %v4058_v11  ;;  %v4090_v58 = vpack.c.bf16 %v2074_v53, %v2073_v56  ;;  %v2076_v30 = vld [vmem:[#allocation3 + $0x72] sm:$0xff]  ;;  %v2194_v61 = vpack.c.bf16 %v2190_v60, %v1865_v51  ;;  %v2304_v3 = vld [vmem:[#allocation3 + $0x81] sm:$0xff]  ;;  %v2537_v10 = vpack.c.bf16 %v2533_v54, %v2190_v60 }
 0x181   : > { %3309 = vmatprep.mubr.msk.bf16.mxu0 %vm1827_vm10, %v4060_v52  ;;  %v1880_v50 = vld [vmem:[#allocation3 + $0x61] sm:$0xff]  ;;  %3316 = vmatpush3.bf16.msra.mxu1 %v3420_v25  ;;  %v2308_v15 = vpack.c.bf16 %v2304_v3, %v4072_v42  ;;  %v2647_v27 = vld [vmem:[#allocation3 + $0x91] sm:$0xff] }
 0x182   : > { %v1864_v22 = vld [vmem:[#allocation3 + $0x60] sm:$0xff]  ;;  %3328 = vmatpush3.bf16.msra.mxu0 %v3422_v20  ;;  %v4075_v35 = vpack.c.bf16 %v4072_v42, %v1880_v50  ;;  %3337 = vmatprep.subr.bf16.mxu1 %v3423_v48  ;;  %v2307_v9 = vpack.c.bf16 %v1880_v50, %v4053_v36  ;;  %v2651_v19 = vpack.c.bf16 %v2647_v27, %v2304_v3  ;;  %v2761_v18 = vld [vmem:[#allocation3 + $0x92] sm:$0xff] }
 0x183   : > { %v4077_v21 = vpack.c.bf16 %v1865_v51, %v1864_v22  ;;  %3349 = vmatprep.subr.bf16.mxu0 %v3425_v33  ;;  %v2193_v47 = vpack.c.bf16 %v1864_v22, %v1863_v37  ;;  %v2075_v59 = vld [vmem:[#allocation3 + $0x62] sm:$0xff] }
 0x184   : > { %3298 = vmatmul.mubr.msk.bf16.gmra.mxu1 %vm1827_vm10, %v4075_v35  ;;  %v2080_v24 = vpack.c.bf16 %v2076_v30, %v2075_v59  ;;  %v2421_v14 = vpack.c.bf16 %v2075_v59, %v2074_v53  ;;  %v2418_v55 = vld [vmem:[#allocation3 + $0x82] sm:$0xff] }
 0x185   : > { %3310 = vmatmul.mubr.msk.bf16.gmra.mxu0 %vm1827_vm10, %v4077_v21  ;;  %3317 = vmatprep.mubr.msk.bf16.mxu1 %vm1827_vm10, %v2077_v38  ;;  %v2422_v13 = vpack.c.bf16 %v2418_v55, %v2076_v30  ;;  %v2765_v23 = vpack.c.bf16 %v2761_v18, %v2418_v55 }
 0x186   : > { %3329 = vmatprep.mubr.msk.bf16.mxu0 %vm1827_vm10, %v2191_v16 }
 0x18c   : > { %3318 = vmatmul.mubr.msk.bf16.vlgmr.msra.gmra.mxu1 %vm1827_vm10, %v4085_v4 }
 0x18d   : > { %3330 = vmatmul.mubr.msk.bf16.vlgmr.msra.gmra.mxu0 %vm1827_vm10, %v2192_v2  ;;  %3338 = vmatpush3.bf16.msra.mxu1 %v3423_v48 }
 0x18e   : > { %3321 = vmatprep.mubr.msk.bf16.mxu1 %vm1827_vm10, %v4090_v58  ;;  %3333 = vmatprep.mubr.msk.bf16.mxu0 %vm1827_vm10, %v2193_v47 }
 0x18f   : > { %3339 = vmatprep.subr.bf16.mxu1 %v3424_v57  ;;  %3350 = vmatpush3.bf16.msra.mxu0 %v3425_v33 }
 0x190   : > { %3351 = vmatprep.subr.bf16.mxu0 %v3426_v26 }
 0x191   : > { %3340 = vmatpush3.bf16.msra.mxu1 %v3424_v57 }
 0x192   : > { %3361 = vmatprep.subr.bf16.mxu1 %v3427_v63 }
 0x193   : > { %3352 = vmatpush3.bf16.msra.mxu0 %v3426_v26 }
 0x194   : > { %3322 = vmatmul.mubr.msk.bf16.gmra.mxu1 %vm1827_vm10, %v2080_v24  ;;  %3373 = vmatprep.subr.bf16.mxu0 %v3429_v62 }
 0x195   : > { %3334 = vmatmul.mubr.msk.bf16.gmra.mxu0 %vm1827_vm10, %v2194_v61  ;;  %3341 = vmatprep.mubr.msk.bf16.mxu1 %vm1827_vm10, %v2305_v6 }
 0x196   : > { %3353 = vmatprep.mubr.msk.bf16.mxu0 %vm1827_vm10, %v2419_v8 }
 0x19c   : > { %3342 = vmatmul.mubr.msk.bf16.vlgmr.msra.gmra.mxu1 %vm1827_vm10, %v2306_v29 }
 0x19d   : > { %3354 = vmatmul.mubr.msk.bf16.vlgmr.msra.gmra.mxu0 %vm1827_vm10, %v2420_v12  ;;  %3362 = vmatpush3.bf16.msra.mxu1 %v3427_v63 }
 0x19e   : > { %3345 = vmatprep.mubr.msk.bf16.mxu1 %vm1827_vm10, %v2307_v9  ;;  %3357 = vmatprep.mubr.msk.bf16.mxu0 %vm1827_vm10, %v2421_v14 }
 0x19f   : > { %3363 = vmatprep.subr.bf16.mxu1 %v3428_v0  ;;  %3374 = vmatpush3.bf16.msra.mxu0 %v3429_v62 }
 0x1a0   : > { %3375 = vmatprep.subr.bf16.mxu0 %v3430_v17 }
 0x1a1   : > { %3364 = vmatpush3.bf16.msra.mxu1 %v3428_v0 }
 0x1a2   : > { %3385 = vmatprep.subr.bf16.mxu1 %v3431_v28 }
 0x1a3   : > { %3376 = vmatpush3.bf16.msra.mxu0 %v3430_v17 }
 0x1a4   : > { %3346 = vmatmul.mubr.msk.bf16.gmra.mxu1 %vm1827_vm10, %v2308_v15 }
 0x1a5   : > { %3358 = vmatmul.mubr.msk.bf16.gmra.mxu0 %vm1827_vm10, %v2422_v13  ;;  %3365 = vmatprep.mubr.msk.bf16.mxu1 %vm1827_vm10, %v4038_v32 }
 0x1a6   : > { %3377 = vmatprep.mubr.msk.bf16.mxu0 %vm1827_vm10, %v4036_v44 }
 0x1ac   : > { %3366 = vmatmul.mubr.msk.bf16.vlgmr.msra.gmra.mxu1 %vm1827_vm10, %v4060_v52 }
 0x1ad   : > { %3378 = vmatmul.mubr.msk.bf16.vlgmr.msra.gmra.mxu0 %vm1827_vm10, %v4058_v11  ;;  %3386 = vmatpush3.bf16.msra.mxu1 %v3431_v28 }
 0x1ae   : > { %3369 = vmatprep.mubr.msk.bf16.mxu1 %vm1827_vm10, %v4077_v21  ;;  %3381 = vmatprep.mubr.msk.bf16.mxu0 %vm1827_vm10, %v4075_v35 }
 0x1af   : > { %3387 = vmatprep.subr.bf16.mxu1 %v3432_v43 }
 0x1b1   : > { %3388 = vmatpush3.bf16.msra.mxu1 %v3432_v43 }
 0x1b4   : > { %3370 = vmatmul.mubr.msk.bf16.gmra.mxu1 %vm1827_vm10, %v2537_v10 }
 0x1b5   : > { %3382 = vmatmul.mubr.msk.bf16.gmra.mxu0 %vm1827_vm10, %v2651_v19  ;;  %3389 = vmatprep.mubr.msk.bf16.mxu1 %vm1827_vm10, %v4085_v4 }
 0x1bc   : > { %3390 = vmatmul.mubr.msk.bf16.vlgmr.msra.gmra.mxu1 %vm1827_vm10, %v4090_v58 }
 0x1bd   : > { %3393 = vmatprep.mubr.msk.bf16.mxu1 %vm1827_vm10, %v2080_v24 }
 0x1c4   : > { %3394 = vmatmul.mubr.msk.bf16.gmra.mxu1 %vm1827_vm10, %v2765_v23 }
 0x23c   : > { %v3295_v39 = vpop.f32.mrf.mxu1 }
 0x23d   : > { %v3307_v45 = vpop.f32.mrf.mxu0 }
 0x23e   : > { %v1949_v5 = vpop.f32.mrf.mxu1  ;;  %v2047_v29 = vadd.f32 %v3307_v45, %v3295_v39 }
 0x23f   : > { %v2038_v44 = vpop.f32.mrf.mxu0 }
 0x240   : > { %v3296_v32 = vpop.f32.mrf.mxu1  ;;  %v2039_v9 = vadd.f32 %v2038_v44, %v1949_v5 }
 0x241   : > { %v3308_v25 = vpop.f32.mrf.mxu0 }
 0x242   : > { %v1952_v20 = vpop.f32.mrf.mxu1  ;;  %v2050_v3 = vadd.f32 %v3308_v25, %v3296_v32 }
 0x243   : > { %v2041_v34 = vpop.f32.mrf.mxu0 }
 0x244   : > { %v3299_v31 = vpop.f32.mrf.mxu1  ;;  %v2042_v13 = vadd.f32 %v2041_v34, %v1952_v20 }
 0x245   : > { %v3311_v36 = vpop.f32.mrf.mxu0 }
 0x246   : > { %v1965_v41 = vpop.f32.mrf.mxu1  ;;  %v2063_v27 = vadd.f32 %v3311_v36, %v3299_v31 }
 0x247   : > { %v2054_v37 = vpop.f32.mrf.mxu0 }
 0x248   : > { %v3300_v40 = vpop.f32.mrf.mxu1  ;;  %v2055_v45 = vadd.f32 %v2054_v37, %v1965_v41 }
 0x249   : > { %v3312_v11 = vpop.f32.mrf.mxu0 }
 0x24a   : > { %v4155_v52 = vpop.f32.mrf.mxu1 }
 0x24b   : > { %v4157_v48 = vpop.f32.mrf.mxu0 }
 0x24c   : > { %v3319_v33 = vpop.f32.mrf.mxu1  ;;  %v2058_v31 = vadd.f32 %v4157_v48, %v4155_v52 }
 0x24d   : > { %v3331_v42 = vpop.f32.mrf.mxu0  ;;  %v2177_v14 = vadd.f32 %v3319_v33, %v2047_v29  ;;  %v2066_v33 = vadd.f32 %v3312_v11, %v3300_v40 }
 0x24e   : > { %v2144_v46 = vpop.f32.mrf.mxu1 }
 0x24f   : > { %v2258_v49 = vpop.f32.mrf.mxu0  ;;  %v2175_v55 = vadd.f32 %v2144_v46, %v2039_v9  ;;  %v2291_v43 = vadd.f32 %v3331_v42, %v2177_v14 }
 0x250   : > { %v3320_v50 = vpop.f32.mrf.mxu1 }
 0x251   : > { %v3332_v22 = vpop.f32.mrf.mxu0  ;;  %v2178_v54 = vadd.f32 %v3320_v50, %v2050_v3  ;;  %v2289_v18 = vadd.f32 %v2258_v49, %v2175_v55 }
 0x252   : > { %v2147_v51 = vpop.f32.mrf.mxu1 }
 0x253   : > { %v2261_v35 = vpop.f32.mrf.mxu0  ;;  %v2176_v23 = vadd.f32 %v2147_v51, %v2042_v13  ;;  %v2292_v5 = vadd.f32 %v3332_v22, %v2178_v54 }
 0x254   : > { %v3323_v21 = vpop.f32.mrf.mxu1 }
 0x255   : > { %v3335_v38 = vpop.f32.mrf.mxu0  ;;  %v2290_v46 = vadd.f32 %v2261_v35, %v2176_v23 }
 0x256   : > { %v2160_v16 = vpop.f32.mrf.mxu1 }
 0x257   : > { %v2274_v7 = vpop.f32.mrf.mxu0  ;;  %v2179_v29 = vadd.f32 %v2160_v16, %v2055_v45 }
 0x258   : > { %v3324_v53 = vpop.f32.mrf.mxu1 }
 0x259   : > { %v4159_v1 = vpop.f32.mrf.mxu0  ;;  %v2182_v42 = vadd.f32 %v3324_v53, %v2066_v33  ;;  %v2293_v22 = vadd.f32 %v2274_v7, %v2179_v29 }
 0x25a   : > { %v2163_v4 = vpop.f32.mrf.mxu1 }
 0x25b   : > { %v4161_v2 = vpop.f32.mrf.mxu0  ;;  %v2180_v40 = vadd.f32 %v2163_v4, %v2058_v31 }
 0x25c   : > { %v3343_v56 = vpop.f32.mrf.mxu1 }
 0x25d   : > { %v3355_v57 = vpop.f32.mrf.mxu0  ;;  %v2405_v39 = vadd.f32 %v3343_v56, %v2291_v43  ;;  %v2296_v56 = vadd.f32 %v4159_v1, %v2182_v42  ;;  %v2294_v53 = vadd.f32 %v4161_v2, %v2180_v40 }
 0x25e   : > { %v2372_v58 = vpop.f32.mrf.mxu1 }
 0x25f   : > { %v2486_v47 = vpop.f32.mrf.mxu0  ;;  %v2403_v44 = vadd.f32 %v2372_v58, %v2289_v18  ;;  %v2519_v20 = vadd.f32 %v3355_v57, %v2405_v39 }
 0x260   : > { %v3344_v26 = vpop.f32.mrf.mxu1 }
 0x261   : > { %v3356_v63 = vpop.f32.mrf.mxu0  ;;  %v2406_v34 = vadd.f32 %v3344_v26, %v2292_v5  ;;  %v2517_v37 = vadd.f32 %v2486_v47, %v2403_v44 }
 0x262   : > { %v2375_v59 = vpop.f32.mrf.mxu1 }
 0x263   : > { %v2489_v60 = vpop.f32.mrf.mxu0  ;;  %v2404_v49 = vadd.f32 %v2375_v59, %v2290_v46  ;;  %v2520_v35 = vadd.f32 %v3356_v63, %v2406_v34  ;;  %v3095_v63 = vld [vmem:[%s4214_s4] ss:$0 sm:$0xff] }
 0x264   : > { %v3347_v30 = vpop.f32.mrf.mxu1 }
 0x265   : > { %v3359_v24 = vpop.f32.mrf.mxu0  ;;  %v2518_v52 = vadd.f32 %v2489_v60, %v2404_v49 }
 0x266   : > { %v2388_v61 = vpop.f32.mrf.mxu1 }
 0x267   : > { %v4163_v62 = vpop.f32.mrf.mxu0  ;;  %v2407_v57 = vadd.f32 %v2388_v61, %v2293_v22 }
 0x268   : > { %v3348_v6 = vpop.f32.mrf.mxu1 }
 0x269   : > { %v4165_v8 = vpop.f32.mrf.mxu0  ;;  %v2410_v26 = vadd.f32 %v3348_v6, %v2296_v56  ;;  %v2521_v1 = vadd.f32 %v4163_v62, %v2407_v57 }
 0x26a   : > { %4229 = vst [vmem:[#allocation6_spill] sm:$0xff] %v4165_v8  ;;  %v4167_v12 = vpop.f32.mrf.mxu1  ;;  %v2181_v8 = vadd.f32 %v3323_v21, %v2063_v27 }
 0x26b   : > { %v4169_v0 = vpop.f32.mrf.mxu0  ;;  %v2408_v60 = vadd.f32 %v4167_v12, %v2294_v53 }
 0x26c   : > { %4230 = vst [vmem:[#allocation7_spill] sm:$0xff] %v4169_v0  ;;  %v3367_v17 = vpop.f32.mrf.mxu1  ;;  %v2295_v36 = vadd.f32 %v3335_v38, %v2181_v8 }
 0x26d   : > { %v3379_v28 = vpop.f32.mrf.mxu0  ;;  %v2634_v50 = vadd.f32 %v3367_v17, %v2519_v20 }
 0x26e   : > { %v2601_v15 = vpop.f32.mrf.mxu1  ;;  %v2409_v11 = vadd.f32 %v3347_v30, %v2295_v36 }
 0x26f   : > { %v2715_v10 = vpop.f32.mrf.mxu0  ;;  %v2632_v16 = vadd.f32 %v2601_v15, %v2517_v37  ;;  %v2748_v48 = vadd.f32 %v3379_v28, %v2634_v50 }
 0x270   : > { %v3368_v19 = vpop.f32.mrf.mxu1  ;;  %v2523_v47 = vadd.f32 %v3359_v24, %v2409_v11 }
 0x271   : > { %v3380_v32 = vpop.f32.mrf.mxu0  ;;  %v2635_v38 = vadd.f32 %v3368_v19, %v2520_v35  ;;  %v2746_v59 = vadd.f32 %v2715_v10, %v2632_v16  ;;  %v4231_v6 = vld [vmem:[#allocation6_spill] sm:$0xff] }
 0x272   : > { %v2604_v0 = vpop.f32.mrf.mxu1  ;;  %v2524_v17 = vadd.f32 %v4231_v6, %v2410_v26 }
 0x273   : > { %v2718_v51 = vpop.f32.mrf.mxu0  ;;  %v2633_v30 = vadd.f32 %v2604_v0, %v2518_v52  ;;  %v2749_v14 = vadd.f32 %v3380_v32, %v2635_v38  ;;  %v4232_v13 = vld [vmem:[#allocation7_spill] sm:$0xff] }
 0x274   : > { %v3371_v25 = vpop.f32.mrf.mxu1  ;;  %v2522_v43 = vadd.f32 %v4232_v13, %v2408_v60 }
 0x275   : > { %v3383_v7 = vpop.f32.mrf.mxu0  ;;  %v2638_v61 = vadd.f32 %v3371_v25, %v2523_v47  ;;  %v2747_v55 = vadd.f32 %v2718_v51, %v2633_v30 }
 0x276   : > { %v2617_v41 = vpop.f32.mrf.mxu1 }
 0x277   : > { %v2636_v28 = vadd.f32 %v2617_v41, %v2521_v1  ;;  %v2731_v3 = vpop.f32.mrf.mxu0  ;;  %v2752_v54 = vadd.f32 %v3383_v7, %v2638_v61 }
 0x278   : > { %v3372_v21 = vpop.f32.mrf.mxu1 }
 0x279   : > { %v2639_v10 = vadd.f32 %v3372_v21, %v2524_v17  ;;  %v2750_v39 = vadd.f32 %v2731_v3, %v2636_v28  ;;  %v3384_v45 = vpop.f32.mrf.mxu0 }
 0x27a   : > { %v2620_v58 = vpop.f32.mrf.mxu1 }
 0x27b   : > { %v2637_v44 = vadd.f32 %v2620_v58, %v2522_v43  ;;  %v2753_v46 = vadd.f32 %v3384_v45, %v2639_v10  ;;  %v2734_v36 = vpop.f32.mrf.mxu0 }
 0x27c   : > { %v3391_v4 = vpop.f32.mrf.mxu1 }
 0x27d   : > { %v2862_v8 = vadd.f32 %v3391_v4, %v2748_v48  ;;  %v2751_v41 = vadd.f32 %v2734_v36, %v2637_v44 }
 0x27e   : > { %v2829_v9 = vpop.f32.mrf.mxu1 }
 0x27f   : > { %v2877_v2 = vadd.f32 %v3095_v63, %v2862_v8  ;;  %v2860_v24 = vadd.f32 %v2829_v9, %v2746_v59 }
 0x280   : > { %v3392_v0 = vpop.f32.mrf.mxu1 }
 0x281   : > { %v2885_v62 = vmax.f32 %v2877_v2, 0.0  ;;  %v2875_v12 = vadd.f32 %v3095_v63, %v2860_v24  ;;  %v2863_v15 = vadd.f32 %v3392_v0, %v2749_v14 }
 0x282   : > { %v2832_v27 = vpop.f32.mrf.mxu1 }
 0x283   : > { %2893 = vst.msk [vmem:[%s4188_s16 + $0x10] sm:$0xff] %vm1827_vm10, %v2885_v62  ;;  %v2883_v19 = vmax.f32 %v2875_v12, 0.0  ;;  %v2878_v18 = vadd.f32 %v3095_v63, %v2863_v15  ;;  %v2861_v23 = vadd.f32 %v2832_v27, %v2747_v55 }
 0x284   : > { %v3395_v5 = vpop.f32.mrf.mxu1 }
 0x285   : > { %2891 = vst.msk [vmem:[%s4188_s16] sm:$0xff] %vm1827_vm10, %v2883_v19  ;;  %v2886_v33 = vmax.f32 %v2878_v18, 0.0  ;;  %v2876_v29 = vadd.f32 %v3095_v63, %v2861_v23  ;;  %v2866_v32 = vadd.f32 %v3395_v5, %v2752_v54 }
 0x286   : > { %v2845_v25 = vpop.f32.mrf.mxu1 }
 0x287   : > { %2894 = vst.msk [vmem:[%s4188_s16 + $0x18] sm:$0xff] %vm1827_vm10, %v2886_v33  ;;  %v2884_v20 = vmax.f32 %v2876_v29, 0.0  ;;  %v2881_v34 = vadd.f32 %v3095_v63, %v2866_v32  ;;  %v2864_v31 = vadd.f32 %v2845_v25, %v2750_v39 }
 0x288   : > { %v3396_v42 = vpop.f32.mrf.mxu1 }
 0x289   : > { %2892 = vst.msk [vmem:[%s4188_s16 + $0x8] sm:$0xff] %vm1827_vm10, %v2884_v20  ;;  %v2889_v37 = vmax.f32 %v2881_v34, 0.0  ;;  %v2879_v49 = vadd.f32 %v3095_v63, %v2864_v31  ;;  %v2867_v50 = vadd.f32 %v3396_v42, %v2753_v46 }
 0x28a   : > { %v2848_v22 = vpop.f32.mrf.mxu1 }
 0x28b   : > { %2897 = vst.msk [vmem:[%s4188_s16 + $0x30] sm:$0xff] %vm1827_vm10, %v2889_v37  ;;  %v2887_v40 = vmax.f32 %v2879_v49, 0.0  ;;  %v2882_v11 = vadd.f32 %v3095_v63, %v2867_v50  ;;  %v2865_v51 = vadd.f32 %v2848_v22, %v2751_v41 }
 0x28d   : > { %2895 = vst.msk [vmem:[%s4188_s16 + $0x20] sm:$0xff] %vm1827_vm10, %v2887_v40  ;;  %v2890_v21 = vmax.f32 %v2882_v11, 0.0  ;;  %v2880_v35 = vadd.f32 %v3095_v63, %v2865_v51 }
 0x28f   : > { %2898 = vst.msk [vmem:[%s4188_s16 + $0x38] sm:$0xff] %vm1827_vm10, %v2890_v21  ;;  %v2888_v16 = vmax.f32 %v2880_v35, 0.0 }
 0x291   : > { %2896 = vst.msk [vmem:[%s4188_s16 + $0x28] sm:$0xff] %vm1827_vm10, %v2888_v16 }
 0x292 PF: > { %s15_s18 = sadd.s32 1, %s3439_s18  }
 0x293   : > { %p12_p5 = scmp.ge.s32.totalorder %s15_s18, 4  }
 0x295   :  { %14 = sbr.rel (!%p12_p5) target bundleno = 1 (0x1), region = 90 }

// kernel: down_forward.3
= control target key start
LH: loop header
LB: loop body
LE: loop exit
PB: predicated region body
PF: predicated region fallthrough
CT: control target
= control target key end

     0   :  { %vm62_vm0 = vcmask 261120   ;;  %v7003_v3 = vmov 0.0   ;;  %vm64_vm1 = vcmask 254976   ;;  %s6984_s0 = inlined_call_operand.vmem [shape: f32[2,8,8,32], index: 0, kind: input, shape index: {}]   ;;  %s6985_s1 = inlined_call_operand.vmem [shape: bf16[9,32,32], index: 1, kind: input, shape index: {}]   ;;  %s6986_s2 = inlined_call_operand.vmem [shape: f32[1,32], index: 2, kind: input, shape index: {}]   ;;  %s6987_s3 = inlined_call_operand.vmem [shape: f32[1,32], index: 3, kind: input, shape index: {}]   ;;  %s6988_s4 = inlined_call_operand.vmem [shape: f32[1,32], index: 4, kind: input, shape index: {}]   ;;  %s6989_s5 = inlined_call_operand.vmem [shape: bf16[9,32,32], index: 5, kind: input, shape index: {}]   ;;  %s6990_s6 = inlined_call_operand.vmem [shape: f32[1,32], index: 6, kind: input, shape index: {}]   ;;  %s6991_s7 = inlined_call_operand.vmem [shape: f32[1,32], index: 7, kind: input, shape index: {}]   ;;  %s6992_s8 = inlined_call_operand.vmem [shape: f32[1,32], index: 8, kind: input, shape index: {}]   ;;  %s6993_s9 = inlined_call_operand.vmem [shape: f32[32,2], index: 9, kind: input, shape index: {}]   ;;  %s6994_s10 = inlined_call_operand.vmem [shape: f32[1,2], index: 10, kind: input, shape index: {}]   ;;  %s6995_s11 = inlined_call_operand.vmem [shape: f32[2,32], index: 11, kind: input, shape index: {}]   ;;  %s6996_s12 = inlined_call_operand.vmem [shape: f32[1,32], index: 12, kind: input, shape index: {}]   ;;  %s6997_s13 = inlined_call_operand.hbm [shape: f32[2,8,8,32], index: 13, kind: output, shape index: {}]  }
   0x1   :  { %v4868_v0 = vld [vmem:[%s6985_s1 + $0x18] sm:$0xff]   ;;  %v4869_v1 = vld [vmem:[%s6985_s1 + $0x8] sm:$0xff]   ;;  %v4870_v2 = vld [vmem:[%s6985_s1 + $0x10] sm:$0xff]   ;;  %63 = vst.msk [vmem:[#allocation2] sm:$0xff] %vm62_vm0, %v7003_v3 }
   0x2   :  { %4486 = vmatprep.subr.bf16.mxu0 %v4868_v0  ;;  %66 = vst.msk [vmem:[#allocation2 + $0x10] sm:$0xff] %vm62_vm0, %v7003_v3  ;;  %68 = vst.msk [vmem:[#allocation2 + $0x20] sm:$0xff] %vm62_vm0, %v7003_v3  ;;  %4506 = vmatprep.subr.bf16.mxu1 %v4869_v1  ;;  %v4871_v4 = vld [vmem:[%s6985_s1] sm:$0xff]   ;;  %v4872_v6 = vld [vmem:[%s6985_s1 + $0x28] sm:$0xff]  }
   0x3   :  { %70 = vst.msk [vmem:[#allocation2 + $0x30] sm:$0xff] %vm62_vm0, %v7003_v3  ;;  %72 = vst.msk [vmem:[#allocation2 + $0x40] sm:$0xff] %vm62_vm0, %v7003_v3  ;;  %4487 = vmatpush3.bf16.msra.mxu0 %v4868_v0  ;;  %4507 = vmatpush3.bf16.msra.mxu1 %v4869_v1  ;;  %v5105_v5 = vld [vmem:[%s6984_s0] sm:$0xff]  ;;  %v5115_v7 = vld [vmem:[%s6984_s0 + $0x8] sm:$0xff] }
   0x4   :  { %74 = vst.msk [vmem:[#allocation2 + $0x50] sm:$0xff] %vm62_vm0, %v7003_v3  ;;  %76 = vst.msk [vmem:[#allocation2 + $0x60] sm:$0xff] %vm62_vm0, %v7003_v3  ;;  %4488 = vmatprep.subr.bf16.mxu0 %v4870_v2  ;;  %4508 = vmatprep.subr.bf16.mxu1 %v4871_v4  ;;  %v5120_v8 = vld [vmem:[%s6984_s0 + $0x10] sm:$0xff]  ;;  %v5129_v9 = vld [vmem:[%s6984_s0 + $0x18] sm:$0xff] }
   0x5   :  { %78 = vst.msk [vmem:[#allocation2 + $0x70] sm:$0xff] %vm62_vm0, %v7003_v3  ;;  %80 = vst.msk [vmem:[#allocation2 + $0x80] sm:$0xff] %vm62_vm0, %v7003_v3  ;;  %v5134_v10 = vld [vmem:[%s6984_s0 + $0x20] sm:$0xff]  ;;  %v5139_v11 = vld [vmem:[%s6984_s0 + $0x28] sm:$0xff] }
   0x6   :  { %82 = vst.msk [vmem:[#allocation2 + $0x90] sm:$0xff] %vm62_vm0, %v7003_v3  ;;  %84 = vst.msk [vmem:[#allocation2 + $0xa0] sm:$0xff] %vm62_vm0, %v7003_v3  ;;  %v5148_v12 = vld [vmem:[%s6984_s0 + $0x30] sm:$0xff]  ;;  %v5155_v13 = vld [vmem:[%s6984_s0 + $0x40] sm:$0xff] }
   0x7   :  { %86 = vst.msk [vmem:[#allocation2 + $0xb0] sm:$0xff] %vm62_vm0, %v7003_v3  ;;  %88 = vst.msk [vmem:[#allocation2 + $0xc0] sm:$0xff] %vm62_vm0, %v7003_v3  ;;  %4489 = vmatpush3.bf16.msra.mxu0 %v4870_v2  ;;  %4509 = vmatpush3.bf16.msra.mxu1 %v4871_v4  ;;  %v5164_v14 = vld [vmem:[%s6984_s0 + $0x48] sm:$0xff]  ;;  %v5169_v15 = vld [vmem:[%s6984_s0 + $0x50] sm:$0xff] }
   0x8   :  { %90 = vst.msk [vmem:[#allocation2 + $0xd0] sm:$0xff] %vm62_vm0, %v7003_v3  ;;  %92 = vst.msk [vmem:[#allocation2 + $0xe0] sm:$0xff] %vm62_vm0, %v7003_v3  ;;  %4526 = vmatprep.subr.bf16.mxu0 %v4872_v6  ;;  %v121_v17 = vld [vmem:[#allocation2] sm:$0xff]  ;;  %v5178_v18 = vld [vmem:[%s6984_s0 + $0x58] sm:$0xff] }
   0x9   :  { %94 = vst.msk [vmem:[#allocation2 + $0xf0] sm:$0xff] %vm62_vm0, %v7003_v3  ;;  %96 = vst.msk [vmem:[#allocation2 + $0x100] sm:$0xff] %vm62_vm0, %v7003_v3  ;;  %v5183_v19 = vld [vmem:[%s6984_s0 + $0x60] sm:$0xff]  ;;  %v5190_v20 = vld [vmem:[%s6984_s0 + $0x68] sm:$0xff] }
   0xa   :  { %98 = vst.msk [vmem:[#allocation2 + $0x110] sm:$0xff] %vm62_vm0, %v7003_v3  ;;  %100 = vst.msk [vmem:[#allocation2 + $0x120] sm:$0xff] %vm62_vm0, %v7003_v3  ;;  %v5195_v21 = vld [vmem:[%s6984_s0 + $0x70] sm:$0xff]  ;;  %v4873_v37 = vld [vmem:[%s6985_s1 + $0x20] sm:$0xff]  }
   0xb   :  { %102 = vst.msk [vmem:[#allocation2 + $0x130] sm:$0xff] %vm62_vm0, %v7003_v3  ;;  %7026 = vst [vmem:[#allocation6_spill] sm:$0xff] %v5105_v5  ;;  %v4874_v51 = vld [vmem:[%s6985_s1 + $0x38] sm:$0xff]   ;;  %v4875_v54 = vld [vmem:[%s6985_s1 + $0x30] sm:$0xff]  }
   0xc   :  { %65 = vst.msk [vmem:[#allocation2 + $0x8] sm:$0x3] %vm64_vm1, %v7003_v3  ;;  %67 = vst.msk [vmem:[#allocation2 + $0x18] sm:$0x3] %vm64_vm1, %v7003_v3  ;;  %4546 = vmatprep.subr.bf16.mxu1 %v4874_v51  ;;  %v5307_v61 = vld [vmem:[%s6985_s1 + $0x48] sm:$0xff]  }
   0xd   :  { %69 = vst.msk [vmem:[#allocation2 + $0x28] sm:$0x3] %vm64_vm1, %v7003_v3  ;;  %71 = vst.msk [vmem:[#allocation2 + $0x38] sm:$0x3] %vm64_vm1, %v7003_v3  ;;  %v129_v45 = vld [vmem:[#allocation2 + $0xa0] sm:$0xff] }
   0xe   :  { %73 = vst.msk [vmem:[#allocation2 + $0x48] sm:$0x3] %vm64_vm1, %v7003_v3  ;;  %75 = vst.msk [vmem:[#allocation2 + $0x58] sm:$0x3] %vm64_vm1, %v7003_v3 }
   0xf   :  { %77 = vst.msk [vmem:[#allocation2 + $0x68] sm:$0x3] %vm64_vm1, %v7003_v3  ;;  %79 = vst.msk [vmem:[#allocation2 + $0x78] sm:$0x3] %vm64_vm1, %v7003_v3 }
  0x10   :  { %81 = vst.msk [vmem:[#allocation2 + $0x88] sm:$0x3] %vm64_vm1, %v7003_v3  ;;  %83 = vst.msk [vmem:[#allocation2 + $0x98] sm:$0x3] %vm64_vm1, %v7003_v3 }
  0x11   :  { %85 = vst.msk [vmem:[#allocation2 + $0xa8] sm:$0x3] %vm64_vm1, %v7003_v3  ;;  %87 = vst.msk [vmem:[#allocation2 + $0xb8] sm:$0x3] %vm64_vm1, %v7003_v3 }
  0x12   :  { %89 = vst.msk [vmem:[#allocation2 + $0xc8] sm:$0x3] %vm64_vm1, %v7003_v3  ;;  %91 = vst.msk [vmem:[#allocation2 + $0xd8] sm:$0x3] %vm64_vm1, %v7003_v3 }
  0x13   :  { %93 = vst.msk [vmem:[#allocation2 + $0xe8] sm:$0x3] %vm64_vm1, %v7003_v3  ;;  %95 = vst.msk [vmem:[#allocation2 + $0xf8] sm:$0x3] %vm64_vm1, %v7003_v3  ;;  %v149_v16 = vld [vmem:[#allocation2 + $0x1] sm:$0xff] }
  0x14   :  { %97 = vst.msk [vmem:[#allocation2 + $0x108] sm:$0x3] %vm64_vm1, %v7003_v3  ;;  %99 = vst.msk [vmem:[#allocation2 + $0x118] sm:$0x3] %vm64_vm1, %v7003_v3  ;;  %v5286_v55 = vld [vmem:[#allocation2 + $0x2] sm:$0xff] }
  0x15   :  { %101 = vst.msk [vmem:[#allocation2 + $0x128] sm:$0x3] %vm64_vm1, %v7003_v3  ;;  %103 = vst.msk [vmem:[#allocation2 + $0x138] sm:$0x3] %vm64_vm1, %v7003_v3 }
  0x16   :  { %105 = vst.msk [vmem:[#allocation2 + $0x11] sm:$0xff] %vm62_vm0, %v5105_v5  ;;  %7027 = vst [vmem:[#allocation7_spill] sm:$0xff] %v5115_v7 }
  0x17   :  { %7028 = vst [vmem:[#allocation8_spill] sm:$0xff] %v5120_v8  ;;  %106 = vst.msk [vmem:[#allocation2 + $0x21] sm:$0xff] %vm62_vm0, %v5115_v7 }
  0x18   :  { %107 = vst.msk [vmem:[#allocation2 + $0x31] sm:$0xff] %vm62_vm0, %v5120_v8  ;;  %7029 = vst [vmem:[#allocation9_spill] sm:$0xff] %v5129_v9  ;;  %v157_v41 = vld [vmem:[#allocation2 + $0xa1] sm:$0xff] }
  0x19   :  { %7030 = vst [vmem:[#allocation10_spill] sm:$0xff] %v5134_v10  ;;  %7031 = vst [vmem:[#allocation11_spill] sm:$0xff] %v5139_v11 }
  0x1a   :  { %108 = vst.msk [vmem:[#allocation2 + $0x41] sm:$0xff] %vm62_vm0, %v5129_v9  ;;  %109 = vst.msk [vmem:[#allocation2 + $0x51] sm:$0xff] %vm62_vm0, %v5134_v10 }
  0x1b   :  { %7032 = vst [vmem:[#allocation12_spill] sm:$0xff] %v5148_v12  ;;  %110 = vst.msk [vmem:[#allocation2 + $0x61] sm:$0xff] %vm62_vm0, %v5139_v11 }
  0x1c   :  { %7033 = vst [vmem:[#allocation13_spill] sm:$0xff] %v5155_v13  ;;  %111 = vst.msk [vmem:[#allocation2 + $0x71] sm:$0xff] %vm62_vm0, %v5148_v12  ;;  %v4878_v12 = vld [vmem:[%s6985_s1 + $0x58] sm:$0xff]  }
  0x1d   :  { %113 = vst.msk [vmem:[#allocation2 + $0xb1] sm:$0xff] %vm62_vm0, %v5155_v13  ;;  %7034 = vst [vmem:[#allocation14_spill] sm:$0xff] %v5164_v14  ;;  %v5197_v22 = vld [vmem:[#allocation2 + $0x11] sm:$0xff] }
  0x1e   :  { %7035 = vst [vmem:[#allocation15_spill] sm:$0xff] %v5169_v15  ;;  %114 = vst.msk [vmem:[#allocation2 + $0xc1] sm:$0xff] %vm62_vm0, %v5164_v14  ;;  %v5199_v23 = vld [vmem:[#allocation2 + $0x10] sm:$0xff]  ;;  %v165_v24 = vpack.c.bf16 %v5197_v22, %v149_v16  ;;  %v5209_v26 = vld [vmem:[#allocation2 + $0x21] sm:$0xff] }
  0x1f   :  { %115 = vst.msk [vmem:[#allocation2 + $0xd1] sm:$0xff] %vm62_vm0, %v5169_v15  ;;  %7036 = vst [vmem:[#allocation16_spill] sm:$0xff] %v5178_v18  ;;  %v137_v25 = vpack.c.bf16 %v5199_v23, %v121_v17  ;;  %v5211_v27 = vld [vmem:[#allocation2 + $0x31] sm:$0xff]  ;;  %v5213_v28 = vld [vmem:[#allocation2 + $0x20] sm:$0xff] }
  0x20   :  { %7037 = vst [vmem:[#allocation17_spill] sm:$0xff] %v5183_v19  ;;  %116 = vst.msk [vmem:[#allocation2 + $0xe1] sm:$0xff] %vm62_vm0, %v5178_v18  ;;  %v5217_v29 = vpack.c.bf16 %v5211_v27, %v5209_v26  ;;  %v5219_v30 = vld [vmem:[#allocation2 + $0x30] sm:$0xff]  ;;  %4490 = vmatprep.mubr.msk.bf16.mxu0 %vm62_vm0, %v165_v24  ;;  %v5320_v0 = vld [vmem:[#allocation2 + $0x22] sm:$0xff]  ;;  %v638_v5 = vpack.c.bf16 %v5213_v28, %v5199_v23 }
  0x21   :  { %7038 = vst [vmem:[#allocation18_spill] sm:$0xff] %v5190_v20  ;;  %7039 = vst [vmem:[#allocation19_spill] sm:$0xff] %v5195_v21  ;;  %v5221_v31 = vld [vmem:[#allocation2 + $0x41] sm:$0xff]  ;;  %v5223_v32 = vld [vmem:[#allocation2 + $0x51] sm:$0xff]  ;;  %4510 = vmatprep.mubr.msk.bf16.mxu1 %vm62_vm0, %v137_v25  ;;  %v5229_v33 = vpack.c.bf16 %v5219_v30, %v5213_v28 }
  0x22   :  { %117 = vst.msk [vmem:[#allocation2 + $0xf1] sm:$0xff] %vm62_vm0, %v5183_v19  ;;  %118 = vst.msk [vmem:[#allocation2 + $0x101] sm:$0xff] %vm62_vm0, %v5190_v20  ;;  %v5233_v34 = vpack.c.bf16 %v5223_v32, %v5221_v31  ;;  %v5235_v35 = vld [vmem:[#allocation2 + $0x40] sm:$0xff]  ;;  %v5237_v36 = vld [vmem:[#allocation2 + $0x50] sm:$0xff]  ;;  %4491 = vmatmul.mubr.msk.bf16.vlgmr.msra.gmra.mxu0 %vm62_vm0, %v5217_v29 }
  0x23   :  { %119 = vst.msk [vmem:[#allocation2 + $0x111] sm:$0xff] %vm62_vm0, %v5195_v21  ;;  %v5246_v38 = vpack.c.bf16 %v5237_v36, %v5235_v35  ;;  %4511 = vmatmul.mubr.msk.bf16.vlgmr.msra.gmra.mxu1 %vm62_vm0, %v5229_v33  ;;  %4527 = vmatpush3.bf16.msra.mxu0 %v4872_v6  ;;  %v5250_v39 = vld [vmem:[#allocation2 + $0x61] sm:$0xff]  ;;  %v5252_v40 = vld [vmem:[#allocation2 + $0x71] sm:$0xff]  ;;  %1902 = vst.msk [vmem:[#allocation2] sm:$0xff] %vm62_vm0, %v7003_v3 }
  0x24   :  { %4494 = vmatprep.mubr.msk.bf16.mxu0 %vm62_vm0, %v5233_v34  ;;  %v5258_v42 = vld [vmem:[#allocation2 + $0x60] sm:$0xff]  ;;  %v5260_v43 = vld [vmem:[#allocation2 + $0x70] sm:$0xff]  ;;  %4528 = vmatprep.subr.bf16.mxu0 %v4873_v37  ;;  %v5268_v47 = vpack.c.bf16 %v5252_v40, %v5250_v39  ;;  %1903 = vst.msk [vmem:[#allocation2 + $0x8] sm:$0x3] %vm64_vm1, %v7003_v3  ;;  %1907 = vst.msk [vmem:[#allocation2 + $0x28] sm:$0x3] %vm64_vm1, %v7003_v3 }
  0x25   :  { %4514 = vmatprep.mubr.msk.bf16.mxu1 %vm62_vm0, %v5246_v38  ;;  %v5262_v44 = vld [vmem:[#allocation2 + $0xb1] sm:$0xff]  ;;  %v5272_v48 = vpack.c.bf16 %v5260_v43, %v5258_v42  ;;  %v5279_v52 = vld [vmem:[#allocation2 + $0xc1] sm:$0xff]  ;;  %4547 = vmatpush3.bf16.msra.mxu1 %v4874_v51  ;;  %1906 = vst.msk [vmem:[#allocation2 + $0x20] sm:$0xff] %vm62_vm0, %v7003_v3 }
  0x26   :  { %v5264_v46 = vld [vmem:[#allocation2 + $0xb0] sm:$0xff]  ;;  %7040 = vst [vmem:[#allocation20_spill] sm:$0xff] %v5268_v47  ;;  %v169_v49 = vpack.c.bf16 %v5262_v44, %v157_v41  ;;  %v5292_v57 = vld [vmem:[#allocation2 + $0xc0] sm:$0xff]  ;;  %4548 = vmatprep.subr.bf16.mxu1 %v4875_v54  ;;  %v5349_v17 = vld [vmem:[%s6984_s0 + $0x38] sm:$0xff] }
  0x27   :  { %7041 = vst [vmem:[#allocation21_spill] sm:$0xff] %v5272_v48  ;;  %4529 = vmatpush3.bf16.msra.mxu0 %v4873_v37  ;;  %v141_v50 = vpack.c.bf16 %v5264_v46, %v129_v45  ;;  %v5281_v53 = vld [vmem:[#allocation2 + $0xd1] sm:$0xff]  ;;  %v5296_v59 = vld [vmem:[#allocation2 + $0xe1] sm:$0xff]  ;;  %7042 = vst [vmem:[#allocation22_spill] sm:$0xff] %v5349_v17 }
  0x28   :  { %v5288_v56 = vld [vmem:[#allocation2 + $0x12] sm:$0xff]  ;;  %v5316_v62 = vld [vmem:[#allocation2 + $0xe0] sm:$0xff]  ;;  %4566 = vmatprep.subr.bf16.mxu0 %v5307_v61  ;;  %v5369_v37 = vpack.c.bf16 %v5281_v53, %v5279_v52  ;;  %112 = vst.msk [vmem:[#allocation2 + $0x81] sm:$0xff] %vm62_vm0, %v5349_v17  ;;  %v7047_v17 = vmov 0.0  }
  0x29   :  { %v5294_v58 = vld [vmem:[#allocation2 + $0xd0] sm:$0xff]  ;;  %1904 = vst.msk [vmem:[#allocation2 + $0x10] sm:$0xff] %vm62_vm0, %v7003_v3  ;;  %v5324_v2 = vld [vmem:[#allocation2 + $0x42] sm:$0xff]  ;;  %4549 = vmatpush3.bf16.msra.mxu1 %v4875_v54  ;;  %v5428_v54 = vld [vmem:[%s6984_s0 + $0x78] sm:$0xff]  ;;  %v460_v7 = vpack.c.bf16 %v5288_v56, %v5286_v55 }
  0x2a   :  { %4495 = vmatmul.mubr.msk.bf16.gmra.mxu0 %vm62_vm0, %v5268_v47  ;;  %v5298_v60 = vld [vmem:[#allocation2 + $0xf1] sm:$0xff]  ;;  %1905 = vst.msk [vmem:[#allocation2 + $0x18] sm:$0x3] %vm64_vm1, %v7003_v3  ;;  %v5329_v6 = vld [vmem:[#allocation2 + $0x62] sm:$0xff]  ;;  %1911 = vst.msk [vmem:[#allocation2 + $0x48] sm:$0x3] %vm64_vm1, %v7003_v3  ;;  %v5391_v51 = vpack.c.bf16 %v5294_v58, %v5292_v57  ;;  %4586 = vmatprep.subr.bf16.mxu1 %v4878_v12 }
  0x2b   :  { %4515 = vmatmul.mubr.msk.bf16.gmra.mxu1 %vm62_vm0, %v5272_v48  ;;  %4498 = vmatprep.mubr.msk.bf16.mxu0 %vm62_vm0, %v169_v49  ;;  %v5318_v63 = vld [vmem:[#allocation2 + $0xf0] sm:$0xff]  ;;  %1910 = vst.msk [vmem:[#allocation2 + $0x40] sm:$0xff] %vm62_vm0, %v7003_v3  ;;  %v5351_v24 = vld [vmem:[#allocation2 + $0xa2] sm:$0xff]  ;;  %1914 = vst.msk [vmem:[#allocation2 + $0x60] sm:$0xff] %vm62_vm0, %v7003_v3  ;;  %v5395_v21 = vpack.c.bf16 %v5298_v60, %v5296_v59  ;;  %v639_v48 = vpack.c.bf16 %v5235_v35, %v5219_v30 }
  0x2c   :  { %v5322_v1 = vld [vmem:[#allocation2 + $0x32] sm:$0xff]  ;;  %4518 = vmatprep.mubr.msk.bf16.mxu1 %vm62_vm0, %v141_v50  ;;  %1915 = vst.msk [vmem:[#allocation2 + $0x68] sm:$0x3] %vm64_vm1, %v7003_v3  ;;  %7043 = vst [vmem:[#allocation23_spill] sm:$0xff] %v5369_v37  ;;  %v5371_v41 = vld [vmem:[#allocation2 + $0x101] sm:$0xff]  ;;  %v5405_v15 = vpack.c.bf16 %v5318_v63, %v5316_v62 }
  0x2d   :  { %v5327_v4 = vld [vmem:[#allocation2 + $0x52] sm:$0xff]  ;;  %1908 = vst.msk [vmem:[#allocation2 + $0x30] sm:$0xff] %vm62_vm0, %v7003_v3  ;;  %v5375_v49 = vld [vmem:[#allocation2 + $0x100] sm:$0xff]  ;;  %1922 = vst.msk [vmem:[#allocation2 + $0xa0] sm:$0xff] %vm62_vm0, %v7003_v3 }
  0x2e   :  { %v5331_v16 = vld [vmem:[#allocation2 + $0x72] sm:$0xff]  ;;  %1909 = vst.msk [vmem:[#allocation2 + $0x38] sm:$0x3] %vm64_vm1, %v7003_v3  ;;  %1913 = vst.msk [vmem:[#allocation2 + $0x58] sm:$0x3] %vm64_vm1, %v7003_v3  ;;  %v5397_v20 = vld [vmem:[#allocation2 + $0xc2] sm:$0xff] }
  0x2f   :  { %v5353_v25 = vld [vmem:[#allocation2 + $0xb2] sm:$0xff]  ;;  %1912 = vst.msk [vmem:[#allocation2 + $0x50] sm:$0xff] %vm62_vm0, %v7003_v3  ;;  %1916 = vst.msk [vmem:[#allocation2 + $0x70] sm:$0xff] %vm62_vm0, %v7003_v3  ;;  %v5401_v18 = vld [vmem:[#allocation2 + $0xe2] sm:$0xff] }
  0x30   :  { %1917 = vst.msk [vmem:[#allocation2 + $0x78] sm:$0x3] %vm64_vm1, %v7003_v3  ;;  %v5373_v45 = vld [vmem:[#allocation2 + $0x111] sm:$0xff]  ;;  %1923 = vst.msk [vmem:[#allocation2 + $0xa8] sm:$0x3] %vm64_vm1, %v7003_v3  ;;  %v5409_v14 = vld [vmem:[#allocation2 + $0x102] sm:$0xff] }
  0x31   :  { %v5377_v50 = vld [vmem:[#allocation2 + $0x110] sm:$0xff]  ;;  %1924 = vst.msk [vmem:[#allocation2 + $0xb0] sm:$0xff] %vm62_vm0, %v7003_v3  ;;  %7044 = vst [vmem:[#allocation24_spill] sm:$0xff] %v5391_v51  ;;  %v5455_v11 = vld [vmem:[#allocation2 + $0x80] sm:$0xff] }
  0x32   :  { %1925 = vst.msk [vmem:[#allocation2 + $0xb8] sm:$0x3] %vm64_vm1, %v7003_v3  ;;  %7045 = vst [vmem:[#allocation25_spill] sm:$0xff] %v5395_v21  ;;  %v5399_v19 = vld [vmem:[#allocation2 + $0xd2] sm:$0xff]  ;;  %4499 = vmatmul.mubr.msk.bf16.gmra.mxu0 %vm62_vm0, %v5369_v37  ;;  %v5457_v10 = vld [vmem:[#allocation2 + $0x81] sm:$0xff]  ;;  %v5471_v8 = vpack.c.bf16 %v5377_v50, %v5375_v49 }
  0x33   :  { %7046 = vst [vmem:[#allocation26_spill] sm:$0xff] %v5405_v15  ;;  %v5407_v3 = vld [vmem:[#allocation2 + $0xf2] sm:$0xff]  ;;  %1926 = vst.msk [vmem:[#allocation2 + $0xc0] sm:$0xff] %vm62_vm0, %v7047_v17  ;;  %4519 = vmatmul.mubr.msk.bf16.gmra.mxu1 %vm62_vm0, %v5391_v51  ;;  %4502 = vmatprep.mubr.msk.bf16.mxu0 %vm62_vm0, %v5395_v21  ;;  %v5459_v9 = vld [vmem:[#allocation2 + $0x82] sm:$0xff] }
  0x34   :  { %v5411_v13 = vld [vmem:[#allocation2 + $0x112] sm:$0xff]  ;;  %1927 = vst.msk [vmem:[#allocation2 + $0xc8] sm:$0x3] %vm64_vm1, %v7047_v17  ;;  %1929 = vst.msk [vmem:[#allocation2 + $0xd8] sm:$0x3] %vm64_vm1, %v7047_v17  ;;  %4522 = vmatprep.mubr.msk.bf16.mxu1 %vm62_vm0, %v5405_v15  ;;  %v4877_v23 = vld [vmem:[%s6985_s1 + $0x40] sm:$0xff]  }
  0x35   :  { %1928 = vst.msk [vmem:[#allocation2 + $0xd0] sm:$0xff] %vm62_vm0, %v7047_v17  ;;  %1930 = vst.msk [vmem:[#allocation2 + $0xe0] sm:$0xff] %vm62_vm0, %v7047_v17  ;;  %v5485_v51 = vld [vmem:[#allocation2 + $0x90] sm:$0xff]  ;;  %v4880_v30 = vld [vmem:[%s6985_s1 + $0x68] sm:$0xff]  }
  0x36   :  { %1931 = vst.msk [vmem:[#allocation2 + $0xe8] sm:$0x3] %vm64_vm1, %v7047_v17  ;;  %7048 = vst [vmem:[#allocation27_spill] sm:$0xff] %v5428_v54  ;;  %v5496_v28 = vld [vmem:[#allocation2 + $0x91] sm:$0xff] }
  0x37   :  { %1932 = vst.msk [vmem:[#allocation2 + $0xf0] sm:$0xff] %vm62_vm0, %v7047_v17  ;;  %1934 = vst.msk [vmem:[#allocation2 + $0x100] sm:$0xff] %vm62_vm0, %v7047_v17  ;;  %v5499_v55 = vld [vmem:[#allocation2 + $0x130] sm:$0xff]  ;;  %v4882_v35 = vld [vmem:[%s6985_s1 + $0x78] sm:$0xff]  }
  0x38   :  { %1933 = vst.msk [vmem:[#allocation2 + $0xf8] sm:$0x3] %vm64_vm1, %v7047_v17  ;;  %1935 = vst.msk [vmem:[#allocation2 + $0x108] sm:$0x3] %vm64_vm1, %v7047_v17  ;;  %v5503_v47 = vld [vmem:[#allocation2 + $0x92] sm:$0xff] }
  0x39   :  { %1936 = vst.msk [vmem:[#allocation2 + $0x110] sm:$0xff] %vm62_vm0, %v7047_v17  ;;  %120 = vst.msk [vmem:[#allocation2 + $0x121] sm:$0xff] %vm62_vm0, %v5428_v54  ;;  %v5463_v54 = vpack.c.bf16 %v5373_v45, %v5371_v41 }
  0x3a   :  { %1937 = vst.msk [vmem:[#allocation2 + $0x118] sm:$0x3] %vm64_vm1, %v7047_v17  ;;  %1919 = vst.msk [vmem:[#allocation2 + $0x88] sm:$0x3] %vm64_vm1, %v7047_v17 }
  0x3b   :  { %7049 = vst [vmem:[#allocation28_spill] sm:$0xff] %v5463_v54  ;;  %1918 = vst.msk [vmem:[#allocation2 + $0x80] sm:$0xff] %vm62_vm0, %v7047_v17  ;;  %4503 = vmatmul.mubr.msk.bf16.gmra.mxu0 %vm62_vm0, %v5463_v54  ;;  %4523 = vmatmul.mubr.msk.bf16.gmra.mxu1 %vm62_vm0, %v5471_v8  ;;  %v5501_v54 = vld [vmem:[#allocation2 + $0x131] sm:$0xff] }
  0x3c   :  { %4530 = vmatprep.mubr.msk.bf16.mxu0 %vm62_vm0, %v460_v7  ;;  %4550 = vmatprep.mubr.msk.bf16.mxu1 %vm62_vm0, %v638_v5  ;;  %7050 = vst [vmem:[#allocation29_spill] sm:$0xff] %v5499_v55  ;;  %7051 = vst [vmem:[#allocation30_spill] sm:$0xff] %v5503_v47  ;;  %v5511_v7 = vld [vmem:[#allocation2 + $0x132] sm:$0xff]  ;;  %v5515_v5 = vpack.c.bf16 %v5322_v1, %v5320_v0  ;;  %v640_v47 = vpack.c.bf16 %v5258_v42, %v5237_v36 }
  0x3d   :  { %1920 = vst.msk [vmem:[#allocation2 + $0x90] sm:$0xff] %vm62_vm0, %v7047_v17  ;;  %7052 = vst [vmem:[#allocation31_spill] sm:$0xff] %v5511_v7  ;;  %v5528_v7 = vpack.c.bf16 %v5327_v4, %v5324_v2  ;;  %v4879_v55 = vld [vmem:[%s6985_s1 + $0x50] sm:$0xff]   ;;  %v5550_v36 = vpack.c.bf16 %v5331_v16, %v5329_v6  ;;  %v641_v42 = vpack.c.bf16 %v5455_v11, %v5260_v43 }
  0x3e   :  { %1921 = vst.msk [vmem:[#allocation2 + $0x98] sm:$0x3] %vm64_vm1, %v7047_v17  ;;  %1941 = vst.msk [vmem:[#allocation2 + $0x138] sm:$0x3] %vm64_vm1, %v7047_v17 }
  0x3f   :  { %1940 = vst.msk [vmem:[#allocation2 + $0x130] sm:$0xff] %vm62_vm0, %v7047_v17 }
  0x40   :  { %v5477_v21 = vld [vmem:[#allocation2 + $0x120] sm:$0xff] }
  0x41   :  { %v5479_v15 = vld [vmem:[#allocation2 + $0x121] sm:$0xff] }
  0x42   :  { %v5481_v37 = vld [vmem:[#allocation2 + $0x122] sm:$0xff] }
  0x43   :  { %1938 = vst.msk [vmem:[#allocation2 + $0x120] sm:$0xff] %vm62_vm0, %v7047_v17  ;;  %4531 = vmatmul.mubr.msk.bf16.vlgmr.msra.gmra.mxu0 %vm62_vm0, %v5515_v5  ;;  %4551 = vmatmul.mubr.msk.bf16.vlgmr.msra.gmra.mxu1 %vm62_vm0, %v639_v48  ;;  %v464_v48 = vpack.c.bf16 %v5353_v25, %v5351_v24 }
  0x44   :  { %1939 = vst.msk [vmem:[#allocation2 + $0x128] sm:$0x3] %vm64_vm1, %v7047_v17  ;;  %4567 = vmatpush3.bf16.msra.mxu0 %v5307_v61  ;;  %4534 = vmatprep.mubr.msk.bf16.mxu0 %vm62_vm0, %v5528_v7 }
  0x45   :  { %4554 = vmatprep.mubr.msk.bf16.mxu1 %vm62_vm0, %v640_v47  ;;  %4568 = vmatprep.subr.bf16.mxu0 %v4877_v23  ;;  %v642_v47 = vpack.c.bf16 %v5292_v57, %v5264_v46 }
  0x46   :  { %4587 = vmatpush3.bf16.msra.mxu1 %v4878_v12 }
  0x47   :  { %4588 = vmatprep.subr.bf16.mxu1 %v4879_v55 }
  0x48   :  { %4569 = vmatpush3.bf16.msra.mxu0 %v4877_v23 }
  0x49   :  { %4606 = vmatprep.subr.bf16.mxu0 %v4880_v30 }
  0x4a   :  { %4589 = vmatpush3.bf16.msra.mxu1 %v4879_v55 }
  0x4b   :  { %18 = vsyncpa [#allocation4], 0  ;;  %4535 = vmatmul.mubr.msk.bf16.gmra.mxu0 %vm62_vm0, %v5550_v36  ;;  %4626 = vmatprep.subr.bf16.mxu1 %v4882_v35  ;;  %v5565_v12 = vpack.c.bf16 %v5399_v19, %v5397_v20  ;;  %v643_v43 = vpack.c.bf16 %v5316_v62, %v5294_v58  ;;  %v5571_v46 = vpack.c.bf16 %v5407_v3, %v5401_v18  ;;  %vm4935_vm2 = vmmov 0  }
  0x4c   :  { %4555 = vmatmul.mubr.msk.bf16.gmra.mxu1 %vm62_vm0, %v641_v42  ;;  %4538 = vmatprep.mubr.msk.bf16.mxu0 %vm62_vm0, %v464_v48  ;;  %v644_v57 = vpack.c.bf16 %v5375_v49, %v5318_v63  ;;  %v5583_v58 = vpack.c.bf16 %v5411_v13, %v5409_v14  ;;  %v645_v61 = vpack.c.bf16 %v5477_v21, %v5377_v50  ;;  %vm3866_vm3 = vcmask 1041408  }
  0x4d   :  { %4558 = vmatprep.mubr.msk.bf16.mxu1 %vm62_vm0, %v642_v47  ;;  %v816_v62 = vpack.c.bf16 %v5209_v26, %v5197_v22  ;;  %v994_v63 = vpack.c.bf16 %v5320_v0, %v5288_v56  ;;  %v817_v24 = vpack.c.bf16 %v5221_v31, %v5211_v27  ;;  %v995_v49 = vpack.c.bf16 %v5324_v2, %v5322_v1  ;;  %v4881_v56 = vld [vmem:[%s6985_s1 + $0x60] sm:$0xff]   ;;  %v4883_v0 = vld [vmem:[%s6985_s1 + $0x70] sm:$0xff]   ;;  %v4884_v27 = vld [vmem:[%s6985_s1 + $0x88] sm:$0xff]  }
  0x4e   :  { %v818_v22 = vpack.c.bf16 %v5250_v39, %v5223_v32  ;;  %v996_v26 = vpack.c.bf16 %v5329_v6, %v5327_v4  ;;  %v819_v31 = vpack.c.bf16 %v5457_v10, %v5252_v40  ;;  %v997_v32 = vpack.c.bf16 %v5459_v9, %v5331_v16 }
  0x4f   :  { %v820_v39 = vpack.c.bf16 %v5279_v52, %v5262_v44  ;;  %v998_v1 = vpack.c.bf16 %v5397_v20, %v5353_v25  ;;  %v821_v40 = vpack.c.bf16 %v5296_v59, %v5281_v53  ;;  %v999_v44 = vpack.c.bf16 %v5401_v18, %v5399_v19  ;;  %v7059_v59 = vld [vmem:[#allocation25_spill] sm:$0xff] }
  0x50   :  { %v822_v52 = vpack.c.bf16 %v5371_v41, %v5298_v60  ;;  %v1000_v20 = vpack.c.bf16 %v5409_v14, %v5407_v3  ;;  %v823_v53 = vpack.c.bf16 %v5479_v15, %v5373_v45  ;;  %v1001_v18 = vpack.c.bf16 %v5481_v37, %v5411_v13  ;;  %v4885_v3 = vld [vmem:[%s6985_s1 + $0x80] sm:$0xff]   ;;  %v7053_v13 = vld [vmem:[#allocation21_spill] sm:$0xff]  ;;  %v7054_v14 = vld [vmem:[#allocation20_spill] sm:$0xff] }
  0x51   :  { %v1354_v19 = vpack.c.bf16 %v5496_v28, %v5457_v10  ;;  %v7060_v10 = vld [vmem:[#allocation28_spill] sm:$0xff]  ;;  %v7061_v60 = vld [vmem:[#allocation29_spill] sm:$0xff]  ;;  %vm3779_vm4 = vcmask 1041409   ;;  %vm3862_vm5 = vcmask 15360  }
  0x52   :  { %v7062_v2 = vpack.c.bf16 %v7061_v60, %v5477_v21 }
  0x53   :  { %4539 = vmatmul.mubr.msk.bf16.gmra.mxu0 %vm62_vm0, %v5565_v12 }
  0x54   :  { %4559 = vmatmul.mubr.msk.bf16.gmra.mxu1 %vm62_vm0, %v643_v43  ;;  %4542 = vmatprep.mubr.msk.bf16.mxu0 %vm62_vm0, %v5571_v46 }
  0x55   :  { %4562 = vmatprep.mubr.msk.bf16.mxu1 %vm62_vm0, %v644_v57 }
  0x5b   :  { %4543 = vmatmul.mubr.msk.bf16.gmra.mxu0 %vm62_vm0, %v5583_v58 }
  0x5c   :  { %4563 = vmatmul.mubr.msk.bf16.gmra.mxu1 %vm62_vm0, %v645_v61  ;;  %4570 = vmatprep.mubr.msk.bf16.mxu0 %vm62_vm0, %v816_v62 }
  0x5d   :  { %4590 = vmatprep.mubr.msk.bf16.mxu1 %vm62_vm0, %v994_v63 }
  0x63   :  { %4571 = vmatmul.mubr.msk.bf16.vlgmr.msra.gmra.mxu0 %vm62_vm0, %v817_v24 }
  0x64   :  { %4607 = vmatpush3.bf16.msra.mxu0 %v4880_v30  ;;  %4591 = vmatmul.mubr.msk.bf16.vlgmr.msra.gmra.mxu1 %vm62_vm0, %v995_v49 }
  0x65   :  { %4574 = vmatprep.mubr.msk.bf16.mxu0 %vm62_vm0, %v818_v22  ;;  %4594 = vmatprep.mubr.msk.bf16.mxu1 %vm62_vm0, %v996_v26 }
  0x66   :  { %4608 = vmatprep.subr.bf16.mxu0 %v4881_v56  ;;  %4627 = vmatpush3.bf16.msra.mxu1 %v4882_v35 }
  0x67   :  { %4628 = vmatprep.subr.bf16.mxu1 %v4883_v0 }
  0x68   :  { %4609 = vmatpush3.bf16.msra.mxu0 %v4881_v56 }
  0x69   :  { %4646 = vmatprep.subr.bf16.mxu0 %v4884_v27 }
  0x6a   :  { %4629 = vmatpush3.bf16.msra.mxu1 %v4883_v0 }
  0x6b   :  { %4575 = vmatmul.mubr.msk.bf16.gmra.mxu0 %vm62_vm0, %v819_v31 }
  0x6c   :  { %4595 = vmatmul.mubr.msk.bf16.gmra.mxu1 %vm62_vm0, %v997_v32  ;;  %4578 = vmatprep.mubr.msk.bf16.mxu0 %vm62_vm0, %v820_v39 }
  0x6d   :  { %4598 = vmatprep.mubr.msk.bf16.mxu1 %vm62_vm0, %v998_v1 }
  0x73   :  { %4579 = vmatmul.mubr.msk.bf16.gmra.mxu0 %vm62_vm0, %v821_v40 }
  0x74   :  { %4599 = vmatmul.mubr.msk.bf16.gmra.mxu1 %vm62_vm0, %v999_v44  ;;  %4582 = vmatprep.mubr.msk.bf16.mxu0 %vm62_vm0, %v822_v52 }
  0x75   :  { %4602 = vmatprep.mubr.msk.bf16.mxu1 %vm62_vm0, %v1000_v20 }
  0x7b   :  { %4583 = vmatmul.mubr.msk.bf16.gmra.mxu0 %vm62_vm0, %v823_v53 }
  0x7c   :  { %4603 = vmatmul.mubr.msk.bf16.gmra.mxu1 %vm62_vm0, %v1001_v18  ;;  %4610 = vmatprep.mubr.msk.bf16.mxu0 %vm62_vm0, %v5229_v33  ;;  %v7056_v33 = vld [vmem:[#allocation24_spill] sm:$0xff] }
  0x7d   :  { %4630 = vmatprep.mubr.msk.bf16.mxu1 %vm62_vm0, %v5217_v29  ;;  %v7055_v29 = vpack.c.bf16 %v5485_v51, %v5455_v11  ;;  %v1358_v11 = vpack.c.bf16 %v5501_v54, %v5479_v15  ;;  %v7064_v15 = vld [vmem:[#allocation31_spill] sm:$0xff] }
  0x7e   :  { %v1536_v21 = vpack.c.bf16 %v7064_v15, %v5481_v37 }
  0x83   :  { %4611 = vmatmul.mubr.msk.bf16.vlgmr.msra.gmra.mxu0 %vm62_vm0, %v5246_v38  ;;  %v7058_v38 = vld [vmem:[#allocation26_spill] sm:$0xff] }
  0x84   :  { %4647 = vmatpush3.bf16.msra.mxu0 %v4884_v27  ;;  %4631 = vmatmul.mubr.msk.bf16.vlgmr.msra.gmra.mxu1 %vm62_vm0, %v5233_v34  ;;  %v7057_v34 = vld [vmem:[#allocation23_spill] sm:$0xff] }
  0x85   :  { %4614 = vmatprep.mubr.msk.bf16.mxu0 %vm62_vm0, %v7053_v13  ;;  %4634 = vmatprep.mubr.msk.bf16.mxu1 %vm62_vm0, %v7054_v14 }
  0x86   :  { %4648 = vmatprep.subr.bf16.mxu0 %v4885_v3 }
  0x88   :  { %4649 = vmatpush3.bf16.msra.mxu0 %v4885_v3 }
  0x8b   :  { %4615 = vmatmul.mubr.msk.bf16.gmra.mxu0 %vm62_vm0, %v7055_v29 }
  0x8c   :  { %4635 = vmatmul.mubr.msk.bf16.gmra.mxu1 %vm62_vm0, %v1354_v19  ;;  %4618 = vmatprep.mubr.msk.bf16.mxu0 %vm62_vm0, %v7056_v33 }
  0x8d   :  { %4638 = vmatprep.mubr.msk.bf16.mxu1 %vm62_vm0, %v7057_v34 }
  0x93   :  { %4619 = vmatmul.mubr.msk.bf16.gmra.mxu0 %vm62_vm0, %v7058_v38 }
  0x94   :  { %4639 = vmatmul.mubr.msk.bf16.gmra.mxu1 %vm62_vm0, %v7059_v59  ;;  %4622 = vmatprep.mubr.msk.bf16.mxu0 %vm62_vm0, %v5471_v8  ;;  %v7063_v8 = vld [vmem:[#allocation30_spill] sm:$0xff] }
  0x95   :  { %4642 = vmatprep.mubr.msk.bf16.mxu1 %vm62_vm0, %v7060_v10  ;;  %v1532_v4 = vpack.c.bf16 %v7063_v8, %v5459_v9 }
  0x9b   :  { %4623 = vmatmul.mubr.msk.bf16.gmra.mxu0 %vm62_vm0, %v7062_v2 }
  0x9c   :  { %4643 = vmatmul.mubr.msk.bf16.gmra.mxu1 %vm62_vm0, %v1358_v11  ;;  %4650 = vmatprep.mubr.msk.bf16.mxu0 %vm62_vm0, %v5515_v5 }
  0xa3   :  { %4651 = vmatmul.mubr.msk.bf16.vlgmr.msra.gmra.mxu0 %vm62_vm0, %v5528_v7 }
  0xa4   :  { %4654 = vmatprep.mubr.msk.bf16.mxu0 %vm62_vm0, %v5550_v36 }
  0xab   :  { %4655 = vmatmul.mubr.msk.bf16.gmra.mxu0 %vm62_vm0, %v1532_v4 }
  0xac   :  { %4658 = vmatprep.mubr.msk.bf16.mxu0 %vm62_vm0, %v5565_v12 }
  0xb3   :  { %4659 = vmatmul.mubr.msk.bf16.gmra.mxu0 %vm62_vm0, %v5571_v46 }
  0xb4   :  { %4662 = vmatprep.mubr.msk.bf16.mxu0 %vm62_vm0, %v5583_v58 }
  0xbb   :  { %4663 = vmatmul.mubr.msk.bf16.gmra.mxu0 %vm62_vm0, %v1536_v21 }
  0xe2   :  { %v4492_v6 = vpop.f32.mrf.mxu0 }
  0xe3   :  { %v4512_v16 = vpop.f32.mrf.mxu1 }
  0xe4   :  { %v390_v25 = vadd.f32 %v4512_v16, %v4492_v6  ;;  %v248_v9 = vpop.f32.mrf.mxu0 }
  0xe5   :  { %v381_v41 = vpop.f32.mrf.mxu1 }
  0xe6   :  { %v382_v45 = vadd.f32 %v381_v41, %v248_v9  ;;  %v4493_v50 = vpop.f32.mrf.mxu0 }
  0xe7   :  { %v4513_v51 = vpop.f32.mrf.mxu1 }
  0xe8   :  { %v393_v54 = vadd.f32 %v4513_v51, %v4493_v50  ;;  %v5706_v23 = vpop.f32.mrf.mxu0 }
  0xe9   :  { %v5708_v28 = vpop.f32.mrf.mxu1 }
  0xea   :  { %v4496_v55 = vpop.f32.mrf.mxu0 }
  0xeb   :  { %v4516_v7 = vpop.f32.mrf.mxu1 }
  0xec   :  { %v406_v5 = vadd.f32 %v4516_v7, %v4496_v55  ;;  %v264_v30 = vpop.f32.mrf.mxu0 }
  0xed   :  { %v397_v37 = vpop.f32.mrf.mxu1 }
  0xee   :  { %v398_v35 = vadd.f32 %v397_v37, %v264_v30  ;;  %v4497_v36 = vpop.f32.mrf.mxu0 }
  0xef   :  { %v4517_v42 = vpop.f32.mrf.mxu1 }
  0xf0   :  { %v409_v48 = vadd.f32 %v4517_v42, %v4497_v36  ;;  %v5710_v47 = vpop.f32.mrf.mxu0 }
  0xf1   :  { %v5712_v12 = vpop.f32.mrf.mxu1 }
  0xf2   :  { %v4500_v43 = vpop.f32.mrf.mxu0 }
  0xf3   :  { %v4520_v46 = vpop.f32.mrf.mxu1 }
  0xf4   :  { %v422_v57 = vadd.f32 %v4520_v46, %v4500_v43  ;;  %v280_v58 = vpop.f32.mrf.mxu0 }
  0xf5   :  { %v413_v61 = vpop.f32.mrf.mxu1 }
  0xf6   :  { %v414_v62 = vadd.f32 %v413_v61, %v280_v58  ;;  %v4501_v63 = vpop.f32.mrf.mxu0 }
  0xf7   :  { %v4521_v24 = vpop.f32.mrf.mxu1 }
  0xf8   :  { %v425_v49 = vadd.f32 %v4521_v24, %v4501_v63  ;;  %v5714_v22 = vpop.f32.mrf.mxu0 }
  0xf9   :  { %v5716_v26 = vpop.f32.mrf.mxu1 }
  0xfb   :  { %v4504_v56 = vpop.f32.mrf.mxu0  ;;  %v4524_v0 = vpop.f32.mrf.mxu1 }
  0xfc   :  { %v438_v27 = vadd.f32 %v4524_v0, %v4504_v56 }
  0xfd   :  { %v296_v31 = vpop.f32.mrf.mxu0  ;;  %v429_v32 = vpop.f32.mrf.mxu1 }
  0xfe   :  { %v430_v39 = vadd.f32 %v429_v32, %v296_v31 }
  0xff   :  { %v4505_v1 = vpop.f32.mrf.mxu0  ;;  %v4525_v40 = vpop.f32.mrf.mxu1 }
 0x100   :  { %v441_v44 = vadd.f32 %v4525_v40, %v4505_v1 }
 0x101   :  { %v5718_v52 = vpop.f32.mrf.mxu0  ;;  %v5720_v20 = vpop.f32.mrf.mxu1 }
 0x103   :  { %v4532_v53 = vpop.f32.mrf.mxu0  ;;  %v4552_v3 = vpop.f32.mrf.mxu1 }
 0x104   :  { %v608_v18 = vadd.f32 %v4532_v53, %v390_v25 }
 0x105   :  { %v543_v13 = vpop.f32.mrf.mxu0  ;;  %v5724_v29 = vpop.f32.mrf.mxu1 }
 0x106   :  { %v5722_v14 = vadd.f32 %v543_v13, %v382_v45  ;;  %v786_v19 = vadd.f32 %v4552_v3, %v608_v18 }
 0x107   :  { %v4533_v33 = vpop.f32.mrf.mxu0  ;;  %v5728_v38 = vpop.f32.mrf.mxu1 }
 0x108   :  { %v5726_v34 = vadd.f32 %v4533_v33, %v393_v54 }
 0x109   :  { %v5730_v59 = vpop.f32.mrf.mxu0  ;;  %v5732_v10 = vpop.f32.mrf.mxu1 }
 0x10b   :  { %v4536_v11 = vpop.f32.mrf.mxu0 }
 0x10c   :  { %v612_v60 = vadd.f32 %v4536_v11, %v406_v5  ;;  %v4556_v2 = vpop.f32.mrf.mxu1 }
 0x10d   :  { %v559_v8 = vpop.f32.mrf.mxu0 }
 0x10e   :  { %v5734_v4 = vadd.f32 %v559_v8, %v398_v35  ;;  %v790_v15 = vadd.f32 %v4556_v2, %v612_v60  ;;  %v5736_v21 = vpop.f32.mrf.mxu1 }
 0x10f   :  { %v4537_v6 = vpop.f32.mrf.mxu0 }
 0x110   :  { %v5738_v16 = vadd.f32 %v4537_v6, %v409_v48  ;;  %v5740_v25 = vpop.f32.mrf.mxu1 }
 0x111   :  { %v5742_v9 = vpop.f32.mrf.mxu0 }
 0x112   :  { %v5744_v41 = vpop.f32.mrf.mxu1 }
 0x113   :  { %v4540_v45 = vpop.f32.mrf.mxu0 }
 0x114   :  { %v616_v50 = vadd.f32 %v4540_v45, %v422_v57  ;;  %v4560_v51 = vpop.f32.mrf.mxu1 }
 0x115   :  { %v575_v54 = vpop.f32.mrf.mxu0 }
 0x116   :  { %v5746_v55 = vadd.f32 %v575_v54, %v414_v62  ;;  %v794_v7 = vadd.f32 %v4560_v51, %v616_v50  ;;  %v5748_v5 = vpop.f32.mrf.mxu1 }
 0x117   :  { %v4541_v30 = vpop.f32.mrf.mxu0 }
 0x118   :  { %v5750_v37 = vadd.f32 %v4541_v30, %v425_v49  ;;  %v5752_v35 = vpop.f32.mrf.mxu1 }
 0x119   :  { %v5754_v36 = vpop.f32.mrf.mxu0 }
 0x11a   :  { %v5756_v42 = vpop.f32.mrf.mxu1 }
 0x11b   :  { %v4544_v48 = vpop.f32.mrf.mxu0 }
 0x11c   :  { %v620_v43 = vadd.f32 %v4544_v48, %v438_v27  ;;  %v4564_v46 = vpop.f32.mrf.mxu1 }
 0x11d   :  { %v591_v57 = vpop.f32.mrf.mxu0 }
 0x11e   :  { %v5758_v58 = vadd.f32 %v591_v57, %v430_v39  ;;  %v798_v61 = vadd.f32 %v4564_v46, %v620_v43  ;;  %v5760_v62 = vpop.f32.mrf.mxu1 }
 0x11f   :  { %v4545_v63 = vpop.f32.mrf.mxu0 }
 0x120   :  { %v5762_v24 = vadd.f32 %v4545_v63, %v441_v44  ;;  %v5764_v49 = vpop.f32.mrf.mxu1 }
 0x121   :  { %7066 = vst [vmem:[#allocation20_spill] sm:$0xff] %v5764_v49  ;;  %v5766_v56 = vpop.f32.mrf.mxu0  ;;  %v385_v49 = vadd.f32 %v5708_v28, %v5706_v23 }
 0x122   :  { %7065 = vst [vmem:[#allocation21_spill] sm:$0xff] %v5762_v24  ;;  %v5768_v0 = vpop.f32.mrf.mxu1 }
 0x123   :  { %7067 = vst [vmem:[#allocation24_spill] sm:$0xff] %v5768_v0  ;;  %v4572_v31 = vpop.f32.mrf.mxu0 }
 0x124   :  { %v5770_v32 = vadd.f32 %v4572_v31, %v786_v19  ;;  %v5772_v27 = vpop.f32.mrf.mxu1 }
 0x125   :  { %v899_v1 = vpop.f32.mrf.mxu0 }
 0x126   :  { %v1077_v39 = vpop.f32.mrf.mxu1 }
 0x127   :  { %v4573_v40 = vpop.f32.mrf.mxu0 }
 0x128   :  { %v5774_v53 = vpop.f32.mrf.mxu1 }
 0x129   :  { %v902_v18 = vpop.f32.mrf.mxu0 }
 0x12a   :  { %v5776_v3 = vpop.f32.mrf.mxu1 }
 0x12b   :  { %v4576_v44 = vpop.f32.mrf.mxu0 }
 0x12c   :  { %v5778_v13 = vadd.f32 %v4576_v44, %v790_v15  ;;  %v5780_v33 = vpop.f32.mrf.mxu1 }
 0x12d   :  { %v5782_v11 = vpop.f32.mrf.mxu0 }
 0x12e   :  { %v5784_v60 = vpop.f32.mrf.mxu1 }
 0x12f   :  { %v5786_v19 = vpop.f32.mrf.mxu0 }
 0x130   :  { %v5788_v2 = vpop.f32.mrf.mxu1 }
 0x131   :  { %v5790_v8 = vpop.f32.mrf.mxu0 }
 0x132   :  { %v5792_v6 = vpop.f32.mrf.mxu1 }
 0x133   :  { %7068 = vst [vmem:[#allocation23_spill] sm:$0xff] %v5792_v6  ;;  %v4580_v45 = vpop.f32.mrf.mxu0  ;;  %v784_v6 = vadd.f32 %v5724_v29, %v5722_v14  ;;  %v401_v14 = vadd.f32 %v5712_v12, %v5710_v47 }
 0x134   :  { %v5794_v50 = vadd.f32 %v4580_v45, %v794_v7  ;;  %v5796_v51 = vpop.f32.mrf.mxu1 }
 0x135   :  { %7070 = vst [vmem:[#allocation25_spill] sm:$0xff] %v5796_v51  ;;  %v5798_v15 = vpop.f32.mrf.mxu0 }
 0x136   :  { %7069 = vst [vmem:[#allocation26_spill] sm:$0xff] %v5794_v50  ;;  %v5800_v54 = vpop.f32.mrf.mxu1 }
 0x137   :  { %7071 = vst [vmem:[#allocation28_spill] sm:$0xff] %v5800_v54  ;;  %v5802_v30 = vpop.f32.mrf.mxu0 }
 0x138   :  { %7072 = vst [vmem:[#allocation29_spill] sm:$0xff] %v5802_v30  ;;  %v5804_v48 = vpop.f32.mrf.mxu1 }
 0x139   :  { %7073 = vst [vmem:[#allocation30_spill] sm:$0xff] %v5804_v48  ;;  %v5806_v43 = vpop.f32.mrf.mxu0 }
 0x13a   :  { %7074 = vst [vmem:[#allocation31_spill] sm:$0xff] %v5806_v43  ;;  %v5808_v46 = vpop.f32.mrf.mxu1 }
 0x13b   :  { %7075 = vst [vmem:[#allocation32_spill] sm:$0xff] %v5808_v46  ;;  %v4584_v57 = vpop.f32.mrf.mxu0 }
 0x13c   :  { %v5810_v63 = vadd.f32 %v4584_v57, %v798_v61  ;;  %v5812_v31 = vpop.f32.mrf.mxu1 }
 0x13d   :  { %7077 = vst [vmem:[#allocation34_spill] sm:$0xff] %v5812_v31  ;;  %v5814_v7 = vpop.f32.mrf.mxu0 }
 0x13e   :  { %7076 = vst [vmem:[#allocation33_spill] sm:$0xff] %v5810_v63  ;;  %7078 = vst [vmem:[#allocation35_spill] sm:$0xff] %v5814_v7  ;;  %v5816_v44 = vpop.f32.mrf.mxu1 }
 0x13f   :  { %7079 = vst [vmem:[#allocation36_spill] sm:$0xff] %v5816_v44  ;;  %v5818_v45 = vpop.f32.mrf.mxu0 }
 0x140   :  { %7080 = vst [vmem:[#allocation37_spill] sm:$0xff] %v5818_v45  ;;  %v5820_v17 = vpop.f32.mrf.mxu1 }
 0x141   :  { %7081 = vst [vmem:[#allocation38_spill] sm:$0xff] %v5820_v17  ;;  %v5822_v54 = vpop.f32.mrf.mxu0 }
 0x142   :  { %7082 = vst [vmem:[#allocation39_spill] sm:$0xff] %v5822_v54  ;;  %v5824_v48 = vpop.f32.mrf.mxu1 }
 0x143   :  { %7083 = vst [vmem:[#allocation40_spill] sm:$0xff] %v5824_v48  ;;  %v4612_v43 = vpop.f32.mrf.mxu0 }
 0x144   :  { %v4632_v51 = vpop.f32.mrf.mxu1 }
 0x145   :  { %v1256_v46 = vpop.f32.mrf.mxu0 }
 0x146   :  { %v1434_v50 = vpop.f32.mrf.mxu1 }
 0x147   :  { %v4613_v61 = vpop.f32.mrf.mxu0 }
 0x148   :  { %v4633_v63 = vpop.f32.mrf.mxu1 }
 0x149   :  { %v1259_v57 = vpop.f32.mrf.mxu0 }
 0x14a   :  { %v1437_v7 = vpop.f32.mrf.mxu1 }
 0x14b   :  { %v5826_v31 = vpop.f32.mrf.mxu0 }
 0x14c   :  { %7084 = vst [vmem:[#allocation41_spill] sm:$0xff] %v5826_v31  ;;  %v5830_v45 = vpop.f32.mrf.mxu1 }
 0x14d   :  { %v1272_v30 = vpop.f32.mrf.mxu0  ;;  %7086 = vst [vmem:[#allocation43_spill] sm:$0xff] %v5830_v45 }
 0x14e   :  { %v5836_v48 = vpop.f32.mrf.mxu1 }
 0x14f   :  { %v5828_v44 = vpop.f32.mrf.mxu0  ;;  %7089 = vst [vmem:[#allocation46_spill] sm:$0xff] %v5836_v48 }
 0x150   :  { %7085 = vst [vmem:[#allocation42_spill] sm:$0xff] %v5828_v44  ;;  %v607_v44 = vadd.f32 %v5730_v59, %v385_v49  ;;  %v5847_v31 = vpop.f32.mrf.mxu1 }
 0x151   :  { %v5832_v17 = vpop.f32.mrf.mxu0 }
 0x152   :  { %7087 = vst [vmem:[#allocation44_spill] sm:$0xff] %v5832_v17  ;;  %v962_v17 = vadd.f32 %v899_v1, %v784_v6  ;;  %v785_v48 = vadd.f32 %v5732_v10, %v607_v44  ;;  %v5856_v23 = vpop.f32.mrf.mxu1  ;;  %v788_v1 = vadd.f32 %v5736_v21, %v5734_v4  ;;  %v611_v6 = vadd.f32 %v5742_v9, %v401_v14  ;;  %v7097_v14 = vld [vmem:[#allocation29_spill] sm:$0xff] }
 0x153   :  { %v5834_v54 = vpop.f32.mrf.mxu0  ;;  %v417_v10 = vadd.f32 %v5716_v26, %v5714_v22  ;;  %v791_v21 = vadd.f32 %v5740_v25, %v5738_v16 }
 0x154   :  { %7088 = vst [vmem:[#allocation45_spill] sm:$0xff] %v5834_v54  ;;  %v1140_v59 = vadd.f32 %v1077_v39, %v962_v17  ;;  %v963_v49 = vadd.f32 %v902_v18, %v785_v48  ;;  %v5871_v44 = vpop.f32.mrf.mxu1 }
 0x155   :  { %v5838_v0 = vpop.f32.mrf.mxu0  ;;  %v615_v9 = vadd.f32 %v5754_v36, %v417_v10  ;;  %v969_v18 = vadd.f32 %v5786_v19, %v791_v21 }
 0x156   :  { %7090 = vst [vmem:[#allocation47_spill] sm:$0xff] %v5838_v0  ;;  %v787_v0 = vadd.f32 %v5728_v38, %v5726_v34  ;;  %v1142_v34 = vadd.f32 %v5772_v27, %v5770_v32  ;;  %v1319_v38 = vadd.f32 %v1256_v46, %v1140_v59  ;;  %v1141_v12 = vadd.f32 %v5776_v3, %v963_v49  ;;  %v5887_v3 = vpop.f32.mrf.mxu1 }
 0x157   :  { %v5842_v24 = vpop.f32.mrf.mxu0  ;;  %v789_v27 = vadd.f32 %v5744_v41, %v611_v6  ;;  %v793_v48 = vadd.f32 %v5756_v42, %v615_v9  ;;  %v7098_v59 = vld [vmem:[#allocation42_spill] sm:$0xff]  ;;  %v7103_v9 = vld [vmem:[#allocation28_spill] sm:$0xff] }
 0x158   :  { %7091 = vst [vmem:[#allocation48_spill] sm:$0xff] %v5842_v24  ;;  %v965_v29 = vadd.f32 %v4573_v40, %v787_v0  ;;  %v966_v0 = vadd.f32 %v5782_v11, %v788_v1  ;;  %v1321_v4 = vadd.f32 %v4612_v43, %v1142_v34  ;;  %v1497_v26 = vadd.f32 %v1434_v50, %v1319_v38  ;;  %v5902_v42 = vpop.f32.mrf.mxu1  ;;  %v7099_v6 = vld [vmem:[#allocation46_spill] sm:$0xff] }
 0x159   :  { %v5849_v45 = vpop.f32.mrf.mxu0  ;;  %v1320_v39 = vadd.f32 %v1259_v57, %v1141_v12  ;;  %v433_v40 = vadd.f32 %v5720_v20, %v5718_v52  ;;  %v967_v25 = vadd.f32 %v5790_v8, %v789_v27  ;;  %v795_v50 = vadd.f32 %v5752_v35, %v5750_v37  ;;  %v7092_v37 = vld [vmem:[#allocation41_spill] sm:$0xff]  ;;  %v7100_v38 = vld [vmem:[#allocation44_spill] sm:$0xff]  ;;  %v7104_v27 = vld [vmem:[#allocation31_spill] sm:$0xff] }
 0x15a   :  { %v1143_v17 = vadd.f32 %v5774_v53, %v965_v29  ;;  %v792_v53 = vadd.f32 %v5748_v5, %v5746_v55  ;;  %v1144_v16 = vadd.f32 %v5784_v60, %v966_v0  ;;  %v1499_v36 = vadd.f32 %v4632_v51, %v1321_v4  ;;  %v7101_v0 = vld [vmem:[#allocation26_spill] sm:$0xff]  ;;  %v7102_v4 = vld [vmem:[#allocation25_spill] sm:$0xff] }
 0x15b   :  { %v5851_v54 = vpop.f32.mrf.mxu0  ;;  %v619_v52 = vadd.f32 %v5766_v56, %v433_v40  ;;  %v1146_v20 = vadd.f32 %v5780_v33, %v5778_v13  ;;  %v1498_v19 = vadd.f32 %v1437_v7, %v1320_v39  ;;  %v796_v60 = vadd.f32 %v5760_v62, %v5758_v58  ;;  %v5907_v56 = vld [vmem:[%s6986_s2] ss:$0 sm:$0xff]  ;;  %v7093_v33 = vld [vmem:[#allocation23_spill] sm:$0xff]  ;;  %v7095_v7 = vld [vmem:[#allocation20_spill] sm:$0xff]  ;;  %v1469_v40 = vpop.f32.mrf.mxu1 }
 0x15c   :  { %v1322_v22 = vadd.f32 %v4613_v61, %v1143_v17  ;;  %v1323_v43 = vadd.f32 %v1272_v30, %v1144_v16  ;;  %v1147_v8 = vadd.f32 %v5788_v2, %v969_v18  ;;  %v970_v51 = vadd.f32 %v5798_v15, %v792_v53  ;;  %v7094_v2 = vld [vmem:[#allocation21_spill] sm:$0xff]  ;;  %v7096_v61 = vld [vmem:[#allocation24_spill] sm:$0xff] }
 0x15d   :  { %v5858_v28 = vpop.f32.mrf.mxu0  ;;  %v1325_v35 = vadd.f32 %v7092_v37, %v1146_v20  ;;  %v1145_v30 = vadd.f32 %v7093_v33, %v967_v25  ;;  %v799_v15 = vadd.f32 %v7095_v7, %v7094_v2  ;;  %v797_v57 = vadd.f32 %v7096_v61, %v619_v52  ;;  %v7107_v52 = vld [vmem:[#allocation47_spill] sm:$0xff]  ;;  %v7111_v7 = vld [vmem:[#allocation45_spill] sm:$0xff] }
 0x15e   :  { %v1500_v5 = vadd.f32 %v4633_v63, %v1322_v22  ;;  %v973_v29 = vadd.f32 %v7097_v14, %v795_v50  ;;  %v1326_v49 = vadd.f32 %v7098_v59, %v1147_v8  ;;  %v1501_v34 = vadd.f32 %v7099_v6, %v1323_v43  ;;  %v7108_v8 = vld [vmem:[#allocation32_spill] sm:$0xff]  ;;  %v7109_v37 = vld [vmem:[#allocation35_spill] sm:$0xff] }
 0x15f   :  { %v5862_v24 = vpop.f32.mrf.mxu0  ;;  %v1324_v10 = vadd.f32 %v7100_v38, %v1145_v30  ;;  %v1150_v21 = vadd.f32 %v7102_v4, %v7101_v0  ;;  %v971_v22 = vadd.f32 %v7104_v27, %v793_v48  ;;  %v4888_v2 = vld [vmem:[%s6989_s5 + $0x8] sm:$0xff]   ;;  %v7112_v59 = vld [vmem:[#allocation48_spill] sm:$0xff] }
 0x160   :  { %v1504_v50 = vadd.f32 %v5847_v31, %v1326_v49  ;;  %v5950_v31 = vpop.f32.mrf.mxu1  ;;  %4686 = vmatprep.subr.bf16.mxu0 %v4888_v2 }
 0x161   :  { %v5873_v47 = vpop.f32.mrf.mxu0  ;;  %4687 = vmatpush3.bf16.msra.mxu0 %v4888_v2 }
 0x162   :  { %v1482_v27 = vpop.f32.mrf.mxu1 }
 0x163   :  { %v4652_v32 = vpop.f32.mrf.mxu0 }
 0x164   :  { %v1677_v46 = vadd.f32 %v4652_v32, %v1499_v36  ;;  %v1148_v32 = vadd.f32 %v7103_v9, %v970_v51  ;;  %v7106_v36 = vld [vmem:[#allocation30_spill] sm:$0xff]  ;;  %v1149_v51 = vadd.f32 %v7108_v8, %v971_v22  ;;  %v4645_v8 = vpop.f32.mrf.mxu1 }
 0x165   :  { %v1612_v11 = vpop.f32.mrf.mxu0 }
 0x166   :  { %v1675_v41 = vadd.f32 %v1612_v11, %v1497_v26  ;;  %v5921_v17 = vadd.f32 %v5907_v56, %v1677_v46  ;;  %v7105_v26 = vld [vmem:[#allocation43_spill] sm:$0xff]  ;;  %v1327_v48 = vadd.f32 %v7107_v52, %v1148_v32  ;;  %v1328_v38 = vadd.f32 %v5849_v45, %v1149_v51 }
 0x167   :  { %v4653_v55 = vpop.f32.mrf.mxu0  ;;  %v1503_v39 = vadd.f32 %v7105_v26, %v1325_v35  ;;  %v974_v35 = vadd.f32 %v7109_v37, %v796_v60  ;;  %v1329_v60 = vadd.f32 %v7111_v7, %v1150_v21  ;;  %v7113_v21 = vld [vmem:[#allocation36_spill] sm:$0xff] }
 0x168   :  { %v5911_v63 = vadd.f32 %v5907_v56, %v1675_v41  ;;  %v1678_v58 = vadd.f32 %v4653_v55, %v1500_v5  ;;  %v1151_v41 = vadd.f32 %v7106_v36, %v973_v29  ;;  %v1502_v5 = vadd.f32 %v5856_v23, %v1324_v10  ;;  %v4886_v23 = vld [vmem:[%s6989_s5 + $0x18] sm:$0xff]   ;;  %v4889_v29 = vld [vmem:[%s6989_s5] sm:$0xff]  }
 0x169   :  { %v1615_v13 = vpop.f32.mrf.mxu0  ;;  %4666 = vmatprep.subr.bf16.mxu1 %v4886_v23  ;;  %v1152_v9 = vadd.f32 %v7113_v21, %v974_v35  ;;  %4688 = vmatprep.subr.bf16.mxu0 %v4889_v29  ;;  %v1507_v45 = vadd.f32 %v5871_v44, %v1329_v60 }
 0x16a   :  { %v1676_v62 = vadd.f32 %v1615_v13, %v1498_v19  ;;  %v1714_v18 = vsel %vm62_vm0, %v5911_v63, 0.0  ;;  %v5934_v11 = vadd.f32 %v5907_v56, %v1678_v58  ;;  %v1717_v19 = vsel %vm62_vm0, %v5921_v17, 0.0  ;;  %v7110_v13 = vld [vmem:[#allocation37_spill] sm:$0xff]  ;;  %4667 = vmatpush3.bf16.msra.mxu1 %v4886_v23  ;;  %4689 = vmatpush3.bf16.msra.mxu0 %v4889_v29 }
 0x16b   :  { %v4656_v1 = vpop.f32.mrf.mxu0  ;;  %v977_v33 = vadd.f32 %v7110_v13, %v799_v15  ;;  %v1330_v49 = vadd.f32 %v7112_v59, %v1151_v41 }
 0x16c   :  { %v5924_v12 = vadd.f32 %v5907_v56, %v1676_v62  ;;  %v1681_v43 = vadd.f32 %v4656_v1, %v1503_v39  ;;  %v4887_v62 = vld [vmem:[%s6989_s5 + $0x10] sm:$0xff]   ;;  %v1719_v15 = vsel %vm62_vm0, %v5934_v11, 0.0  ;;  %v1505_v1 = vadd.f32 %v5887_v3, %v1327_v48  ;;  %v7114_v3 = vld [vmem:[#allocation39_spill] sm:$0xff] }
 0x16d   :  { %v1628_v53 = vpop.f32.mrf.mxu0  ;;  %v975_v32 = vadd.f32 %v7114_v3, %v797_v57  ;;  %4668 = vmatprep.subr.bf16.mxu1 %v4887_v62  ;;  %v1508_v41 = vadd.f32 %v5902_v42, %v1330_v49  ;;  %v1331_v57 = vadd.f32 %v5858_v28, %v1152_v9  ;;  %v1506_v48 = vadd.f32 %v1469_v40, %v1328_v38  ;;  %v7117_v42 = vld [vmem:[#allocation38_spill] sm:$0xff]  ;;  %v7118_v28 = vld [vmem:[#allocation40_spill] sm:$0xff] }
 0x16e   :  { %v1715_v16 = vsel %vm62_vm0, %v5924_v12, 0.0  ;;  %v1679_v25 = vadd.f32 %v1628_v53, %v1501_v34  ;;  %v5971_v10 = vadd.f32 %v5907_v56, %v1681_v43  ;;  %4669 = vmatpush3.bf16.msra.mxu1 %v4887_v62 }
 0x16f   :  { %v1716_v20 = vadd.f32 %v1715_v16, %v1714_v18  ;;  %v4657_v55 = vpop.f32.mrf.mxu0  ;;  %v7115_v16 = vld [vmem:[#allocation33_spill] sm:$0xff]  ;;  %v1153_v43 = vadd.f32 %v7118_v28, %v975_v32  ;;  %v1509_v23 = vadd.f32 %v1482_v27, %v1331_v57 }
 0x170   :  { %v5945_v46 = vadd.f32 %v5907_v56, %v1679_v25  ;;  %v1682_v61 = vadd.f32 %v4657_v55, %v1504_v50  ;;  %v7116_v25 = vld [vmem:[#allocation34_spill] sm:$0xff]  ;;  %v1725_v44 = vsel %vm62_vm0, %v5971_v10, 0.0 }
 0x171   :  { %v1718_v30 = vadd.f32 %v1717_v19, %v1716_v20  ;;  %v1631_v58 = vpop.f32.mrf.mxu0  ;;  %v1154_v36 = vadd.f32 %v7116_v25, %v7115_v16  ;;  %v1155_v19 = vadd.f32 %v7117_v42, %v977_v33  ;;  %v1332_v33 = vadd.f32 %v5873_v47, %v1153_v43  ;;  %v6031_v42 = vld [vmem:[%s6989_s5 + $0x38] sm:$0xff]  }
 0x172   :  { %v1680_v14 = vadd.f32 %v1631_v58, %v1502_v5  ;;  %v1721_v0 = vsel %vm62_vm0, %v5945_v46, 0.0  ;;  %v5982_v39 = vadd.f32 %v5907_v56, %v1682_v61  ;;  %v5998_v5 = vld [vmem:[%s6989_s5 + $0x28] sm:$0xff]   ;;  %4726 = vmatprep.subr.bf16.mxu0 %v6031_v42 }
 0x173   :  { %v1720_v6 = vadd.f32 %v1719_v15, %v1718_v30  ;;  %v4660_v34 = vpop.f32.mrf.mxu0  ;;  %v1333_v37 = vadd.f32 %v5851_v54, %v1154_v36  ;;  %4706 = vmatprep.subr.bf16.mxu1 %v5998_v5  ;;  %v1334_v58 = vadd.f32 %v5862_v24, %v1155_v19  ;;  %v1485_v15 = vpop.f32.mrf.mxu1 }
 0x174   :  { %v5976_v4 = vadd.f32 %v5907_v56, %v1680_v14  ;;  %v1685_v20 = vadd.f32 %v4660_v34, %v1507_v45  ;;  %v1727_v35 = vsel %vm62_vm0, %v5982_v39, 0.0  ;;  %v1510_v34 = vadd.f32 %v1485_v15, %v1332_v33 }
 0x175   :  { %v1722_v22 = vadd.f32 %v1721_v0, %v1720_v6  ;;  %v1644_v26 = vpop.f32.mrf.mxu0  ;;  %v1511_v29 = vadd.f32 %v5950_v31, %v1333_v37  ;;  %v1512_v47 = vadd.f32 %v4645_v8, %v1334_v58 }
 0x176   :  { %v1723_v53 = vsel %vm62_vm0, %v5976_v4, 0.0  ;;  %v1683_v18 = vadd.f32 %v1644_v26, %v1505_v1  ;;  %v1708_v7 = vadd.f32 %v5907_v56, %v1685_v20 }
 0x177   :  { %v1724_v50 = vadd.f32 %v1723_v53, %v1722_v22  ;;  %v4661_v52 = vpop.f32.mrf.mxu0 }
 0x178   :  { %v5993_v55 = vadd.f32 %v5907_v56, %v1683_v18  ;;  %v1686_v13 = vadd.f32 %v4661_v52, %v1508_v41  ;;  %v1733_v38 = vsel %vm62_vm0, %v1708_v7, 0.0 }
 0x179   :  { %v1726_v40 = vadd.f32 %v1725_v44, %v1724_v50  ;;  %v1647_v51 = vpop.f32.mrf.mxu0 }
 0x17a   :  { %v1684_v30 = vadd.f32 %v1647_v51, %v1506_v48  ;;  %v1729_v60 = vsel %vm62_vm0, %v5993_v55, 0.0  ;;  %v1709_v24 = vadd.f32 %v5907_v56, %v1686_v13 }
 0x17b   :  { %v1728_v62 = vadd.f32 %v1727_v35, %v1726_v40  ;;  %v4664_v2 = vpop.f32.mrf.mxu0 }
 0x17c   :  { %v6012_v54 = vadd.f32 %v5907_v56, %v1684_v30  ;;  %v1689_v0 = vadd.f32 %v4664_v2, %v1511_v29  ;;  %v1735_v32 = vsel %vm62_vm0, %v1709_v24, 0.0 }
 0x17d   :  { %v1730_v61 = vadd.f32 %v1729_v60, %v1728_v62  ;;  %v1660_v14 = vpop.f32.mrf.mxu0 }
 0x17e   :  { %v1731_v59 = vsel %vm62_vm0, %v6012_v54, 0.0  ;;  %v1687_v49 = vadd.f32 %v1660_v14, %v1509_v23  ;;  %v1712_v26 = vadd.f32 %v5907_v56, %v1689_v0 }
 0x17f   :  { %v1732_v1 = vadd.f32 %v1731_v59, %v1730_v61  ;;  %v4665_v6 = vpop.f32.mrf.mxu0 }
 0x180   :  { %v1710_v21 = vadd.f32 %v5907_v56, %v1687_v49  ;;  %v1690_v31 = vadd.f32 %v4665_v6, %v1512_v47  ;;  %v1741_v41 = vsel %vm62_vm0, %v1712_v26, 0.0 }
 0x181   :  { %v1734_v9 = vadd.f32 %v1733_v38, %v1732_v1  ;;  %v1663_v3 = vpop.f32.mrf.mxu0 }
 0x182   :  { %v1688_v27 = vadd.f32 %v1663_v3, %v1510_v34  ;;  %v1737_v45 = vsel %vm62_vm0, %v1710_v21, 0.0  ;;  %v1713_v16 = vadd.f32 %v5907_v56, %v1690_v31 }
 0x183   :  { %v1736_v22 = vadd.f32 %v1735_v32, %v1734_v9 }
 0x184   :  { %v1711_v53 = vadd.f32 %v5907_v56, %v1688_v27  ;;  %v1743_v50 = vsel %vm62_vm0, %v1713_v16, 0.0 }
 0x185   :  { %v1738_v18 = vadd.f32 %v1737_v45, %v1736_v22 }
 0x186   :  { %v1739_v25 = vsel %vm62_vm0, %v1711_v53, 0.0 }
 0x187   :  { %v1740_v36 = vadd.f32 %v1739_v25, %v1738_v18 }
 0x189   :  { %v1742_v57 = vadd.f32 %v1741_v41, %v1740_v36 }
 0x18b   :  { %v1744_v52 = vadd.f32 %v1743_v50, %v1742_v57 }
 0x18d   :  { %v1745_v48 = vrot.slane %v1744_v52, 4 }
 0x18f   :  { %v1746_v44 = vadd.f32 %v1745_v48, %v1744_v52 }
 0x191   :  { %v1747_v20 = vrot.slane %v1746_v44, 2 }
 0x193   :  { %v1748_v19 = vadd.f32 %v1747_v20, %v1746_v44 }
 0x195   :  { %v1749_v56 = vrot.slane %v1748_v19, 1 }
 0x197   :  { %v1750_v28 = vadd.f32 %v1749_v56, %v1748_v19 }
 0x199   :  { %v1751_v43 = vmul.f32 0.0078125, %v1750_v28 }
 0x19b   :  { %v6035_v8 = vsub.f32 %v5911_v63, %v1751_v43  ;;  %v6038_v40 = vsub.f32 %v5924_v12, %v1751_v43  ;;  %v6041_v51 = vsub.f32 %v5921_v17, %v1751_v43  ;;  %v6044_v37 = vsub.f32 %v5934_v11, %v1751_v43 }
 0x19c   :  { %v6047_v35 = vsub.f32 %v5945_v46, %v1751_v43  ;;  %v6050_v13 = vsub.f32 %v5971_v10, %v1751_v43  ;;  %v6053_v30 = vsub.f32 %v5982_v39, %v1751_v43  ;;  %v6056_v63 = vsub.f32 %v5993_v55, %v1751_v43 }
 0x19d   :  { %v6058_v12 = vsub.f32 %v1708_v7, %v1751_v43  ;;  %v6060_v58 = vsub.f32 %v1709_v24, %v1751_v43  ;;  %v6062_v17 = vsub.f32 %v1710_v21, %v1751_v43  ;;  %v6064_v11 = vsub.f32 %v1712_v26, %v1751_v43 }
 0x19e   :  { %v6066_v23 = vsub.f32 %v1713_v16, %v1751_v43  ;;  %v1768_v46 = vmul.f32 %v6035_v8, %v6035_v8  ;;  %v1769_v10 = vmul.f32 %v6038_v40, %v6038_v40  ;;  %v1770_v39 = vmul.f32 %v6041_v51, %v6041_v51 }
 0x19f   :  { %v1757_v55 = vsub.f32 %v5976_v4, %v1751_v43  ;;  %v1771_v62 = vmul.f32 %v6044_v37, %v6044_v37  ;;  %v1772_v60 = vmul.f32 %v6047_v35, %v6047_v35  ;;  %v1774_v4 = vmul.f32 %v6050_v13, %v6050_v13 }
 0x1a0   :  { %v1784_v2 = vsel %vm62_vm0, %v1768_v46, 0.0  ;;  %v1785_v33 = vsel %vm62_vm0, %v1769_v10, 0.0  ;;  %v1787_v15 = vsel %vm62_vm0, %v1770_v39, 0.0  ;;  %v1761_v47 = vsub.f32 %v6012_v54, %v1751_v43 }
 0x1a1   :  { %v1786_v7 = vadd.f32 %v1785_v33, %v1784_v2  ;;  %v1773_v14 = vmul.f32 %v1757_v55, %v1757_v55  ;;  %v1789_v29 = vsel %vm62_vm0, %v1771_v62, 0.0  ;;  %v1791_v59 = vsel %vm62_vm0, %v1772_v60, 0.0 }
 0x1a2   :  { %v1775_v1 = vmul.f32 %v6053_v30, %v6053_v30  ;;  %v1776_v38 = vmul.f32 %v6056_v63, %v6056_v63  ;;  %v1795_v0 = vsel %vm62_vm0, %v1774_v4, 0.0  ;;  %v1777_v9 = vmul.f32 %v1761_v47, %v1761_v47 }
 0x1a3   :  { %v1788_v61 = vadd.f32 %v1787_v15, %v1786_v7  ;;  %v1793_v6 = vsel %vm62_vm0, %v1773_v14, 0.0  ;;  %v1778_v31 = vmul.f32 %v6058_v12, %v6058_v12  ;;  %v1765_v22 = vsub.f32 %v1711_v53, %v1751_v43 }
 0x1a4   :  { %v1797_v3 = vsel %vm62_vm0, %v1775_v1, 0.0  ;;  %v1799_v54 = vsel %vm62_vm0, %v1776_v38, 0.0  ;;  %v1779_v26 = vmul.f32 %v6060_v58, %v6060_v58  ;;  %v1801_v45 = vsel %vm62_vm0, %v1777_v9, 0.0 }
 0x1a5   :  { %v1790_v24 = vadd.f32 %v1789_v29, %v1788_v61  ;;  %v1780_v16 = vmul.f32 %v6062_v17, %v6062_v17  ;;  %v1803_v25 = vsel %vm62_vm0, %v1778_v31, 0.0  ;;  %v1781_v41 = vmul.f32 %v1765_v22, %v1765_v22 }
 0x1a6   :  { %v1805_v57 = vsel %vm62_vm0, %v1779_v26, 0.0  ;;  %v1782_v52 = vmul.f32 %v6064_v11, %v6064_v11  ;;  %v1783_v44 = vmul.f32 %v6066_v23, %v6066_v23 }
 0x1a7   :  { %v1792_v49 = vadd.f32 %v1791_v59, %v1790_v24  ;;  %v1807_v53 = vsel %vm62_vm0, %v1780_v16, 0.0  ;;  %v1809_v20 = vsel %vm62_vm0, %v1781_v41, 0.0 }
 0x1a8   :  { %v1811_v56 = vsel %vm62_vm0, %v1782_v52, 0.0  ;;  %v1813_v43 = vsel %vm62_vm0, %v1783_v44, 0.0 }
 0x1a9   :  { %v1794_v34 = vadd.f32 %v1793_v6, %v1792_v49 }
 0x1ab   :  { %v1796_v21 = vadd.f32 %v1795_v0, %v1794_v34  ;;  %v4166_v34 = vld [vmem:[%s6987_s3] ss:$0 sm:$0xff] }
 0x1ad   :  { %v1798_v32 = vadd.f32 %v1797_v3, %v1796_v21 }
 0x1af   :  { %v1800_v27 = vadd.f32 %v1799_v54, %v1798_v32 }
 0x1b1   :  { %v1802_v18 = vadd.f32 %v1801_v45, %v1800_v27 }
 0x1b3   :  { %v1804_v36 = vadd.f32 %v1803_v25, %v1802_v18 }
 0x1b5   :  { %v1806_v50 = vadd.f32 %v1805_v57, %v1804_v36 }
 0x1b7   :  { %v1808_v48 = vadd.f32 %v1807_v53, %v1806_v50 }
 0x1b9   :  { %v1810_v19 = vadd.f32 %v1809_v20, %v1808_v48 }
 0x1bb   :  { %v1812_v28 = vadd.f32 %v1811_v56, %v1810_v19 }
 0x1bd   :  { %v1814_v46 = vadd.f32 %v1813_v43, %v1812_v28 }
 0x1bf   :  { %v1815_v10 = vrot.slane %v1814_v46, 4 }
 0x1c1   :  { %v1816_v39 = vadd.f32 %v1815_v10, %v1814_v46 }
 0x1c3   :  { %v1817_v62 = vrot.slane %v1816_v39, 2 }
 0x1c5   :  { %v1818_v2 = vadd.f32 %v1817_v62, %v1816_v39 }
 0x1c7   :  { %v1819_v33 = vrot.slane %v1818_v2, 1 }
 0x1c9   :  { %v1820_v7 = vadd.f32 %v1819_v33, %v1818_v2 }
 0x1cb   :  { %v1821_v60 = vmul.f32 0.0078125, %v1820_v7 }
 0x1cd   :  { %v1822_v15 = vadd.f32 1e-05, %v1821_v60 }
 0x1cf   :  { %4904 = vrsqrt.f32 %v1822_v15 }
 0x1dc   :  { %v4905_v61 = vpop.eup %4904 }
 0x1dd   :  { %v1824_v14 = vmul.f32 %v4905_v61, %v6035_v8  ;;  %v1825_v29 = vmul.f32 %v4905_v61, %v6038_v40  ;;  %v1826_v24 = vmul.f32 %v4905_v61, %v6041_v51  ;;  %v1827_v4 = vmul.f32 %v4905_v61, %v6044_v37 }
 0x1de   :  { %v1828_v59 = vmul.f32 %v4905_v61, %v6047_v35  ;;  %v1829_v49 = vmul.f32 %v4905_v61, %v1757_v55  ;;  %v1830_v1 = vmul.f32 %v4905_v61, %v6050_v13  ;;  %v1831_v6 = vmul.f32 %v4905_v61, %v6053_v30 }
 0x1df   :  { %v1832_v38 = vmul.f32 %v4905_v61, %v6056_v63  ;;  %v1833_v8 = vmul.f32 %v4905_v61, %v1761_v47  ;;  %v1834_v40 = vmul.f32 %v4905_v61, %v6058_v12  ;;  %v1835_v51 = vmul.f32 %v4905_v61, %v6060_v58  ;;  %v4167_v12 = vld [vmem:[%s6988_s4] ss:$0 sm:$0xff] }
 0x1e0   :  { %v1836_v37 = vmul.f32 %v4905_v61, %v6062_v17  ;;  %v1837_v0 = vmul.f32 %v4905_v61, %v1765_v22  ;;  %v1838_v35 = vmul.f32 %v4905_v61, %v6064_v11  ;;  %v1839_v13 = vmul.f32 %v4905_v61, %v6066_v23 }
 0x1e1   :  { %v1847_v55 = vmul.f32 %v4166_v34, %v1824_v14  ;;  %v1848_v30 = vmul.f32 %v4166_v34, %v1825_v29  ;;  %v1849_v21 = vmul.f32 %v4166_v34, %v1826_v24  ;;  %v1850_v9 = vmul.f32 %v4166_v34, %v1827_v4 }
 0x1e2   :  { %v1851_v3 = vmul.f32 %v4166_v34, %v1828_v59  ;;  %v1852_v32 = vmul.f32 %v4166_v34, %v1829_v49  ;;  %v1853_v31 = vmul.f32 %v4166_v34, %v1830_v1  ;;  %v1854_v63 = vmul.f32 %v4166_v34, %v1831_v6  ;;  %v1986_v59 = vld [vmem:[#allocation2 + $0x1] sm:$0xff] }
 0x1e3   :  { %v1855_v58 = vmul.f32 %v4166_v34, %v1832_v38  ;;  %v1856_v47 = vmul.f32 %v4166_v34, %v1833_v8  ;;  %v1857_v17 = vmul.f32 %v4166_v34, %v1834_v40  ;;  %v1858_v54 = vmul.f32 %v4166_v34, %v1835_v51  ;;  %v1958_v49 = vld [vmem:[#allocation2] sm:$0xff] }
 0x1e4   :  { %v1859_v27 = vmul.f32 %v4166_v34, %v1836_v37  ;;  %v1860_v11 = vmul.f32 %v4166_v34, %v1837_v0  ;;  %v1861_v22 = vmul.f32 %v4166_v34, %v1838_v35  ;;  %v1862_v23 = vmul.f32 %v4166_v34, %v1839_v13  ;;  %v4891_v38 = vld [vmem:[%s6989_s5 + $0x20] sm:$0xff]  }
 0x1e5   :  { %v1870_v26 = vadd.f32 %v4167_v12, %v1847_v55  ;;  %v1871_v45 = vadd.f32 %v4167_v12, %v1848_v30  ;;  %v1872_v18 = vadd.f32 %v4167_v12, %v1849_v21  ;;  %v1873_v16 = vadd.f32 %v4167_v12, %v1850_v9 }
 0x1e6   :  { %v1874_v25 = vadd.f32 %v4167_v12, %v1851_v3  ;;  %v1875_v36 = vadd.f32 %v4167_v12, %v1852_v32  ;;  %v1876_v41 = vadd.f32 %v4167_v12, %v1853_v31  ;;  %v1877_v57 = vadd.f32 %v4167_v12, %v1854_v63  ;;  %v4893_v31 = vld [vmem:[%s6989_s5 + $0x30] sm:$0xff]  }
 0x1e7   :  { %v1878_v50 = vadd.f32 %v4167_v12, %v1855_v58  ;;  %v1879_v52 = vadd.f32 %v4167_v12, %v1856_v47  ;;  %v1880_v53 = vadd.f32 %v4167_v12, %v1857_v17  ;;  %v1881_v48 = vadd.f32 %v4167_v12, %v1858_v54  ;;  %v6207_v58 = vld [vmem:[%s6989_s5 + $0x48] sm:$0xff]  }
 0x1e8   :  { %v1882_v44 = vadd.f32 %v4167_v12, %v1859_v27  ;;  %v1883_v20 = vadd.f32 %v4167_v12, %v1860_v11  ;;  %v1884_v19 = vadd.f32 %v4167_v12, %v1861_v22  ;;  %v1885_v56 = vadd.f32 %v4167_v12, %v1862_v23  ;;  %v1994_v12 = vld [vmem:[#allocation2 + $0xa1] sm:$0xff] }
 0x1e9   :  { %v1886_v28 = vmax.f32 %v1870_v26, 0.0  ;;  %v1887_v43 = vmax.f32 %v1871_v45, 0.0  ;;  %v1888_v46 = vmax.f32 %v1872_v18, 0.0  ;;  %v1889_v10 = vmax.f32 %v1873_v16, 0.0  ;;  %v1966_v27 = vld [vmem:[#allocation2 + $0xa0] sm:$0xff] }
 0x1ea   :  { %v1890_v39 = vmax.f32 %v1874_v25, 0.0  ;;  %v1891_v62 = vmax.f32 %v1875_v36, 0.0  ;;  %v1892_v2 = vmax.f32 %v1876_v41, 0.0  ;;  %v1893_v33 = vmax.f32 %v1877_v57, 0.0 }
 0x1eb   :  { %v1894_v7 = vmax.f32 %v1878_v50, 0.0  ;;  %v1895_v60 = vmax.f32 %v1879_v52, 0.0  ;;  %v1896_v15 = vmax.f32 %v1880_v53, 0.0  ;;  %v1897_v61 = vmax.f32 %v1881_v48, 0.0  ;;  %1942 = vst.msk [vmem:[#allocation2 + $0x11] sm:$0xff] %vm62_vm0, %v1886_v28  ;;  %1943 = vst.msk [vmem:[#allocation2 + $0x21] sm:$0xff] %vm62_vm0, %v1887_v43 }
 0x1ec   :  { %1944 = vst.msk [vmem:[#allocation2 + $0x31] sm:$0xff] %vm62_vm0, %v1888_v46  ;;  %1945 = vst.msk [vmem:[#allocation2 + $0x41] sm:$0xff] %vm62_vm0, %v1889_v10  ;;  %v1898_v14 = vmax.f32 %v1882_v44, 0.0  ;;  %v1899_v29 = vmax.f32 %v1883_v20, 0.0  ;;  %v1900_v24 = vmax.f32 %v1884_v19, 0.0  ;;  %v1901_v4 = vmax.f32 %v1885_v56, 0.0 }
 0x1ed   :  { %1946 = vst.msk [vmem:[#allocation2 + $0x51] sm:$0xff] %vm62_vm0, %v1890_v39  ;;  %1947 = vst.msk [vmem:[#allocation2 + $0x61] sm:$0xff] %vm62_vm0, %v1891_v62  ;;  %v2281_v46 = vld [vmem:[#allocation2 + $0x2] sm:$0xff] }
 0x1ee   :  { %1948 = vst.msk [vmem:[#allocation2 + $0x71] sm:$0xff] %vm62_vm0, %v1892_v2  ;;  %1949 = vst.msk [vmem:[#allocation2 + $0x81] sm:$0xff] %vm62_vm0, %v1893_v33 }
 0x1ef   :  { %1950 = vst.msk [vmem:[#allocation2 + $0xb1] sm:$0xff] %vm62_vm0, %v1894_v7  ;;  %1951 = vst.msk [vmem:[#allocation2 + $0xc1] sm:$0xff] %vm62_vm0, %v1895_v60 }
 0x1f0   :  { %1952 = vst.msk [vmem:[#allocation2 + $0xd1] sm:$0xff] %vm62_vm0, %v1896_v15  ;;  %1953 = vst.msk [vmem:[#allocation2 + $0xe1] sm:$0xff] %vm62_vm0, %v1897_v61 }
 0x1f1   :  { %1954 = vst.msk [vmem:[#allocation2 + $0xf1] sm:$0xff] %vm62_vm0, %v1898_v14  ;;  %1955 = vst.msk [vmem:[#allocation2 + $0x101] sm:$0xff] %vm62_vm0, %v1899_v29 }
 0x1f2   :  { %1956 = vst.msk [vmem:[#allocation2 + $0x111] sm:$0xff] %vm62_vm0, %v1900_v24  ;;  %1957 = vst.msk [vmem:[#allocation2 + $0x121] sm:$0xff] %vm62_vm0, %v1901_v4  ;;  %v6147_v1 = vld [vmem:[#allocation2 + $0x11] sm:$0xff]  ;;  %v6151_v34 = vld [vmem:[#allocation2 + $0x21] sm:$0xff] }
 0x1f3   :  { %v6149_v6 = vld [vmem:[#allocation2 + $0x10] sm:$0xff]  ;;  %v2002_v8 = vpack.c.bf16 %v6147_v1, %v1986_v59  ;;  %v6160_v37 = vld [vmem:[#allocation2 + $0x20] sm:$0xff] }
 0x1f4   :  { %v1974_v40 = vpack.c.bf16 %v6149_v6, %v1958_v49  ;;  %v6158_v51 = vld [vmem:[#allocation2 + $0x31] sm:$0xff]  ;;  %v6172_v55 = vld [vmem:[#allocation2 + $0x41] sm:$0xff]  ;;  %v2475_v33 = vpack.c.bf16 %v6160_v37, %v6149_v6 }
 0x1f5   :  { %v6162_v0 = vld [vmem:[#allocation2 + $0x30] sm:$0xff]  ;;  %v6166_v35 = vpack.c.bf16 %v6158_v51, %v6151_v34  ;;  %v6176_v21 = vld [vmem:[#allocation2 + $0x40] sm:$0xff]  ;;  %4670 = vmatprep.mubr.msk.bf16.mxu1 %vm62_vm0, %v2002_v8  ;;  %v4898_v6 = vld [vmem:[%s6989_s5 + $0x68] sm:$0xff]  }
 0x1f6   :  { %v6170_v13 = vpack.c.bf16 %v6162_v0, %v6160_v37  ;;  %v6174_v30 = vld [vmem:[#allocation2 + $0x51] sm:$0xff]  ;;  %4690 = vmatprep.mubr.msk.bf16.mxu0 %vm62_vm0, %v1974_v40  ;;  %v6202_v63 = vld [vmem:[#allocation2 + $0x61] sm:$0xff]  ;;  %v2476_v29 = vpack.c.bf16 %v6176_v21, %v6162_v0 }
 0x1f7   :  { %v6182_v9 = vpack.c.bf16 %v6174_v30, %v6172_v55  ;;  %v6184_v3 = vld [vmem:[#allocation2 + $0x50] sm:$0xff]  ;;  %4671 = vmatmul.mubr.msk.bf16.vlgmr.msra.gmra.mxu1 %vm62_vm0, %v6166_v35  ;;  %v6211_v17 = vld [vmem:[#allocation2 + $0x60] sm:$0xff] }
 0x1f8   :  { %4691 = vmatmul.mubr.msk.bf16.vlgmr.msra.gmra.mxu0 %vm62_vm0, %v6170_v13  ;;  %v6192_v32 = vpack.c.bf16 %v6184_v3, %v6176_v21  ;;  %4707 = vmatpush3.bf16.msra.mxu1 %v5998_v5  ;;  %v6209_v47 = vld [vmem:[#allocation2 + $0x71] sm:$0xff]  ;;  %v6240_v18 = vld [vmem:[#allocation2 + $0xc1] sm:$0xff]  ;;  %v2477_v59 = vpack.c.bf16 %v6211_v17, %v6184_v3 }
 0x1f9   :  { %4674 = vmatprep.mubr.msk.bf16.mxu1 %vm62_vm0, %v6182_v9  ;;  %4708 = vmatprep.subr.bf16.mxu1 %v4891_v38  ;;  %v6213_v5 = vld [vmem:[#allocation2 + $0x70] sm:$0xff]  ;;  %v6222_v22 = vpack.c.bf16 %v6209_v47, %v6202_v63  ;;  %v6244_v25 = vld [vmem:[#allocation2 + $0xc0] sm:$0xff] }
 0x1fa   :  { %4694 = vmatprep.mubr.msk.bf16.mxu0 %vm62_vm0, %v6192_v32  ;;  %4727 = vmatpush3.bf16.msra.mxu0 %v6031_v42  ;;  %v6216_v54 = vld [vmem:[#allocation2 + $0xb1] sm:$0xff]  ;;  %v6226_v23 = vpack.c.bf16 %v6213_v5, %v6211_v17  ;;  %v6248_v41 = vld [vmem:[#allocation2 + $0xe1] sm:$0xff] }
 0x1fb   :  { %v6218_v11 = vld [vmem:[#allocation2 + $0xb0] sm:$0xff]  ;;  %4728 = vmatprep.subr.bf16.mxu0 %v4893_v31  ;;  %v4896_v42 = vld [vmem:[%s6989_s5 + $0x58] sm:$0xff]   ;;  %v2006_v26 = vpack.c.bf16 %v6216_v54, %v1994_v12  ;;  %v6252_v50 = vld [vmem:[#allocation2 + $0xe0] sm:$0xff] }
 0x1fc   :  { %4709 = vmatpush3.bf16.msra.mxu1 %v4891_v38  ;;  %v1978_v45 = vpack.c.bf16 %v6218_v11, %v1966_v27  ;;  %v6242_v16 = vld [vmem:[#allocation2 + $0xd1] sm:$0xff]  ;;  %v6280_v19 = vld [vmem:[#allocation2 + $0x101] sm:$0xff] }
 0x1fd   :  { %4746 = vmatprep.subr.bf16.mxu1 %v6207_v58  ;;  %v6246_v36 = vld [vmem:[#allocation2 + $0xd0] sm:$0xff]  ;;  %v6258_v53 = vpack.c.bf16 %v6242_v16, %v6240_v18  ;;  %v1972_v28 = vld [vmem:[#allocation2 + $0x100] sm:$0xff] }
 0x1fe   :  { %4729 = vmatpush3.bf16.msra.mxu0 %v4893_v31  ;;  %v6250_v57 = vld [vmem:[#allocation2 + $0xf1] sm:$0xff]  ;;  %v6262_v48 = vpack.c.bf16 %v6246_v36, %v6244_v25  ;;  %v2283_v7 = vld [vmem:[#allocation2 + $0x22] sm:$0xff] }
 0x1ff   :  { %4675 = vmatmul.mubr.msk.bf16.gmra.mxu1 %vm62_vm0, %v6222_v22  ;;  %4766 = vmatprep.subr.bf16.mxu0 %v4896_v42  ;;  %v6254_v52 = vld [vmem:[#allocation2 + $0xf0] sm:$0xff]  ;;  %v6266_v44 = vpack.c.bf16 %v6250_v57, %v6248_v41  ;;  %v6306_v15 = vld [vmem:[#allocation2 + $0x42] sm:$0xff]  ;;  %v4900_v31 = vld [vmem:[%s6989_s5 + $0x78] sm:$0xff]  }
 0x200   :  { %4695 = vmatmul.mubr.msk.bf16.gmra.mxu0 %vm62_vm0, %v6226_v23  ;;  %4678 = vmatprep.mubr.msk.bf16.mxu1 %vm62_vm0, %v2006_v26  ;;  %v6270_v20 = vpack.c.bf16 %v6254_v52, %v6252_v50  ;;  %v6282_v56 = vld [vmem:[#allocation2 + $0x111] sm:$0xff]  ;;  %v4895_v24 = vld [vmem:[%s6989_s5 + $0x40] sm:$0xff]  }
 0x201   :  { %4698 = vmatprep.mubr.msk.bf16.mxu0 %vm62_vm0, %v1978_v45  ;;  %v6284_v43 = vld [vmem:[#allocation2 + $0x110] sm:$0xff]  ;;  %v6290_v39 = vpack.c.bf16 %v6282_v56, %v6280_v19  ;;  %v2287_v38 = vld [vmem:[#allocation2 + $0x62] sm:$0xff] }
 0x202   :  { %v6286_v10 = vld [vmem:[#allocation2 + $0x12] sm:$0xff]  ;;  %v6293_v62 = vpack.c.bf16 %v6284_v43, %v1972_v28  ;;  %v6339_v40 = vld [vmem:[#allocation2 + $0x80] sm:$0xff] }
 0x203   :  { %v2297_v2 = vpack.c.bf16 %v6286_v10, %v2281_v46  ;;  %v6304_v60 = vld [vmem:[#allocation2 + $0x32] sm:$0xff]  ;;  %v2289_v37 = vld [vmem:[#allocation2 + $0xa2] sm:$0xff]  ;;  %v2478_v3 = vpack.c.bf16 %v6339_v40, %v6213_v5 }
 0x204   :  { %v6308_v61 = vld [vmem:[#allocation2 + $0x52] sm:$0xff]  ;;  %v6311_v14 = vpack.c.bf16 %v6304_v60, %v2283_v7  ;;  %v2291_v17 = vld [vmem:[#allocation2 + $0xc2] sm:$0xff] }
 0x205   :  { %v6320_v4 = vpack.c.bf16 %v6308_v61, %v6306_v15  ;;  %v4897_v49 = vld [vmem:[%s6989_s5 + $0x50] sm:$0xff]   ;;  %v2293_v27 = vld [vmem:[#allocation2 + $0xe2] sm:$0xff] }
 0x206   :  { %v6337_v8 = vld [vmem:[#allocation2 + $0x72] sm:$0xff]  ;;  %v2295_v46 = vld [vmem:[#allocation2 + $0x102] sm:$0xff] }
 0x207   :  { %4679 = vmatmul.mubr.msk.bf16.gmra.mxu1 %vm62_vm0, %v6258_v53  ;;  %v6341_v0 = vld [vmem:[#allocation2 + $0xb2] sm:$0xff]  ;;  %v6344_v21 = vpack.c.bf16 %v6337_v8, %v2287_v38 }
 0x208   :  { %4699 = vmatmul.mubr.msk.bf16.gmra.mxu0 %vm62_vm0, %v6262_v48  ;;  %4682 = vmatprep.mubr.msk.bf16.mxu1 %vm62_vm0, %v6266_v44  ;;  %v2301_v12 = vpack.c.bf16 %v6341_v0, %v2289_v37  ;;  %v2292_v5 = vld [vmem:[#allocation2 + $0xd2] sm:$0xff] }
 0x209   :  { %4702 = vmatprep.mubr.msk.bf16.mxu0 %vm62_vm0, %v6270_v20  ;;  %v6359_v26 = vpack.c.bf16 %v2292_v5, %v2291_v17 }
 0x20f   :  { %4683 = vmatmul.mubr.msk.bf16.gmra.mxu1 %vm62_vm0, %v6290_v39 }
 0x210   :  { %4703 = vmatmul.mubr.msk.bf16.gmra.mxu0 %vm62_vm0, %v6293_v62  ;;  %4710 = vmatprep.mubr.msk.bf16.mxu1 %vm62_vm0, %v2297_v2  ;;  %v2296_v2 = vld [vmem:[#allocation2 + $0x112] sm:$0xff] }
 0x211   :  { %4730 = vmatprep.mubr.msk.bf16.mxu0 %vm62_vm0, %v2475_v33  ;;  %v6372_v33 = vld [vmem:[#allocation2 + $0x120] sm:$0xff] }
 0x217   :  { %4711 = vmatmul.mubr.msk.bf16.vlgmr.msra.gmra.mxu1 %vm62_vm0, %v6311_v14 }
 0x218   :  { %4731 = vmatmul.mubr.msk.bf16.vlgmr.msra.gmra.mxu0 %vm62_vm0, %v2476_v29  ;;  %4747 = vmatpush3.bf16.msra.mxu1 %v6207_v58  ;;  %v2479_v58 = vpack.c.bf16 %v6244_v25, %v6218_v11  ;;  %v2480_v11 = vpack.c.bf16 %v6252_v50, %v6246_v36  ;;  %v2481_v25 = vpack.c.bf16 %v1972_v28, %v6254_v52 }
 0x219   :  { %4714 = vmatprep.mubr.msk.bf16.mxu1 %vm62_vm0, %v6320_v4  ;;  %4734 = vmatprep.mubr.msk.bf16.mxu0 %vm62_vm0, %v2477_v59  ;;  %v6374_v29 = vpack.c.bf16 %v2296_v2, %v2295_v46  ;;  %v2482_v36 = vpack.c.bf16 %v6372_v33, %v6284_v43  ;;  %v2653_v50 = vpack.c.bf16 %v6151_v34, %v6147_v1  ;;  %v4899_v1 = vld [vmem:[%s6989_s5 + $0x60] sm:$0xff]  }
 0x21a   :  { %4748 = vmatprep.subr.bf16.mxu1 %v4895_v24  ;;  %4767 = vmatpush3.bf16.msra.mxu0 %v4896_v42  ;;  %v2294_v42 = vld [vmem:[#allocation2 + $0xf2] sm:$0xff]  ;;  %v2831_v52 = vpack.c.bf16 %v2283_v7, %v6286_v10  ;;  %v2654_v28 = vpack.c.bf16 %v6172_v55, %v6158_v51  ;;  %v2832_v43 = vpack.c.bf16 %v6306_v15, %v6304_v60  ;;  %v4902_v55 = vld [vmem:[%s6989_s5 + $0x88] sm:$0xff]  }
 0x21b   :  { %4768 = vmatprep.subr.bf16.mxu0 %v4897_v49  ;;  %v6363_v45 = vpack.c.bf16 %v2294_v42, %v2293_v27  ;;  %v2655_v34 = vpack.c.bf16 %v6202_v63, %v6174_v30  ;;  %v2833_v10 = vpack.c.bf16 %v2287_v38, %v6308_v61  ;;  %v4901_v51 = vld [vmem:[%s6989_s5 + $0x70] sm:$0xff]   ;;  %v2644_v30 = vld [vmem:[#allocation2 + $0x81] sm:$0xff]  ;;  %v2657_v15 = vpack.c.bf16 %v6240_v18, %v6216_v54 }
 0x21c   :  { %4749 = vmatpush3.bf16.msra.mxu1 %v4895_v24  ;;  %v6406_v63 = vld [vmem:[#allocation2 + $0x82] sm:$0xff]  ;;  %v2656_v7 = vpack.c.bf16 %v2644_v30, %v6209_v47  ;;  %v2835_v61 = vpack.c.bf16 %v2291_v17, %v6341_v0  ;;  %v7119_v24 = vmov 0.0   ;;  %v2658_v47 = vpack.c.bf16 %v6248_v41, %v6242_v16 }
 0x21d   :  { %4786 = vmatprep.subr.bf16.mxu1 %v4898_v6  ;;  %v2834_v60 = vpack.c.bf16 %v6406_v63, %v6337_v8  ;;  %v2836_v59 = vpack.c.bf16 %v2293_v27, %v2292_v5  ;;  %v2659_v54 = vpack.c.bf16 %v6280_v19, %v6250_v57  ;;  %v2837_v18 = vpack.c.bf16 %v2295_v46, %v2294_v42  ;;  %v4903_v16 = vld [vmem:[%s6989_s5 + $0x80] sm:$0xff]  }
 0x21e   :  { %4769 = vmatpush3.bf16.msra.mxu0 %v4897_v49  ;;  %v2652_v49 = vld [vmem:[#allocation2 + $0x121] sm:$0xff] }
 0x21f   :  { %4715 = vmatmul.mubr.msk.bf16.gmra.mxu1 %vm62_vm0, %v6344_v21  ;;  %4806 = vmatprep.subr.bf16.mxu0 %v4900_v31  ;;  %v2660_v38 = vpack.c.bf16 %v2652_v49, %v6282_v56 }
 0x220   :  { %4735 = vmatmul.mubr.msk.bf16.gmra.mxu0 %vm62_vm0, %v2478_v3  ;;  %4718 = vmatprep.mubr.msk.bf16.mxu1 %vm62_vm0, %v2301_v12 }
 0x221   :  { %4738 = vmatprep.mubr.msk.bf16.mxu0 %vm62_vm0, %v2479_v58 }
 0x227   :  { %4719 = vmatmul.mubr.msk.bf16.gmra.mxu1 %vm62_vm0, %v6359_v26 }
 0x228   :  { %4739 = vmatmul.mubr.msk.bf16.gmra.mxu0 %vm62_vm0, %v2480_v11  ;;  %4722 = vmatprep.mubr.msk.bf16.mxu1 %vm62_vm0, %v6363_v45 }
 0x229   :  { %4742 = vmatprep.mubr.msk.bf16.mxu0 %vm62_vm0, %v2481_v25 }
 0x22f   :  { %4723 = vmatmul.mubr.msk.bf16.gmra.mxu1 %vm62_vm0, %v6374_v29 }
 0x230   :  { %4743 = vmatmul.mubr.msk.bf16.gmra.mxu0 %vm62_vm0, %v2482_v36  ;;  %4750 = vmatprep.mubr.msk.bf16.mxu1 %vm62_vm0, %v2653_v50 }
 0x231   :  { %4770 = vmatprep.mubr.msk.bf16.mxu0 %vm62_vm0, %v2831_v52 }
 0x237   :  { %4751 = vmatmul.mubr.msk.bf16.vlgmr.msra.gmra.mxu1 %vm62_vm0, %v2654_v28 }
 0x238   :  { %4771 = vmatmul.mubr.msk.bf16.vlgmr.msra.gmra.mxu0 %vm62_vm0, %v2832_v43  ;;  %4787 = vmatpush3.bf16.msra.mxu1 %v4898_v6  ;;  %v2830_v6 = vld [vmem:[#allocation2 + $0x122] sm:$0xff] }
 0x239   :  { %4754 = vmatprep.mubr.msk.bf16.mxu1 %vm62_vm0, %v2655_v34  ;;  %4774 = vmatprep.mubr.msk.bf16.mxu0 %vm62_vm0, %v2833_v10  ;;  %v2838_v8 = vpack.c.bf16 %v2830_v6, %v2296_v2 }
 0x23a   :  { %4788 = vmatprep.subr.bf16.mxu1 %v4899_v1  ;;  %4807 = vmatpush3.bf16.msra.mxu0 %v4900_v31 }
 0x23b   :  { %4808 = vmatprep.subr.bf16.mxu0 %v4901_v51 }
 0x23c   :  { %4789 = vmatpush3.bf16.msra.mxu1 %v4899_v1 }
 0x23d   :  { %4826 = vmatprep.subr.bf16.mxu1 %v4902_v55 }
 0x23e   :  { %4809 = vmatpush3.bf16.msra.mxu0 %v4901_v51 }
 0x23f   :  { %4755 = vmatmul.mubr.msk.bf16.gmra.mxu1 %vm62_vm0, %v2656_v7  ;;  %4846 = vmatprep.subr.mxu0 %v7119_v24 }
 0x240   :  { %4775 = vmatmul.mubr.msk.bf16.gmra.mxu0 %vm62_vm0, %v2834_v60  ;;  %4758 = vmatprep.mubr.msk.bf16.mxu1 %vm62_vm0, %v2657_v15 }
 0x241   :  { %4778 = vmatprep.mubr.msk.bf16.mxu0 %vm62_vm0, %v2835_v61 }
 0x247   :  { %4759 = vmatmul.mubr.msk.bf16.gmra.mxu1 %vm62_vm0, %v2658_v47 }
 0x248   :  { %4779 = vmatmul.mubr.msk.bf16.gmra.mxu0 %vm62_vm0, %v2836_v59  ;;  %4762 = vmatprep.mubr.msk.bf16.mxu1 %vm62_vm0, %v2659_v54 }
 0x249   :  { %4782 = vmatprep.mubr.msk.bf16.mxu0 %vm62_vm0, %v2837_v18 }
 0x24f   :  { %4763 = vmatmul.mubr.msk.bf16.gmra.mxu1 %vm62_vm0, %v2660_v38 }
 0x250   :  { %4783 = vmatmul.mubr.msk.bf16.gmra.mxu0 %vm62_vm0, %v2838_v8  ;;  %4790 = vmatprep.mubr.msk.bf16.mxu1 %vm62_vm0, %v6170_v13  ;;  %v3000_v13 = vld [vmem:[#allocation2 + $0x90] sm:$0xff] }
 0x251   :  { %4810 = vmatprep.mubr.msk.bf16.mxu0 %vm62_vm0, %v6166_v35  ;;  %v3178_v35 = vld [vmem:[#allocation2 + $0x91] sm:$0xff]  ;;  %v3012_v41 = vpack.c.bf16 %v3000_v13, %v6339_v40 }
 0x252   :  { %v3190_v57 = vpack.c.bf16 %v3178_v35, %v2644_v30 }
 0x257   :  { %4791 = vmatmul.mubr.msk.bf16.vlgmr.msra.gmra.mxu1 %vm62_vm0, %v6192_v32  ;;  %v3186_v32 = vld [vmem:[#allocation2 + $0x131] sm:$0xff] }
 0x258   :  { %4811 = vmatmul.mubr.msk.bf16.vlgmr.msra.gmra.mxu0 %vm62_vm0, %v6182_v9  ;;  %4827 = vmatpush3.bf16.msra.mxu1 %v4902_v55  ;;  %v3008_v9 = vld [vmem:[#allocation2 + $0x130] sm:$0xff] }
 0x259   :  { %4794 = vmatprep.mubr.msk.bf16.mxu1 %vm62_vm0, %v6226_v23  ;;  %4814 = vmatprep.mubr.msk.bf16.mxu0 %vm62_vm0, %v6222_v22  ;;  %v3016_v22 = vpack.c.bf16 %v3008_v9, %v6372_v33  ;;  %v3194_v23 = vpack.c.bf16 %v3186_v32, %v2652_v49 }
 0x25a   :  { %4828 = vmatprep.subr.bf16.mxu1 %v4903_v16 }
 0x25c   :  { %4829 = vmatpush3.bf16.msra.mxu1 %v4903_v16 }
 0x25d   :  { %4857 = vmatprep.subr.mxu1 %v7119_v24 }
 0x25f   :  { %4795 = vmatmul.mubr.msk.bf16.gmra.mxu1 %vm62_vm0, %v3012_v41 }
 0x260   :  { %4815 = vmatmul.mubr.msk.bf16.gmra.mxu0 %vm62_vm0, %v3190_v57  ;;  %4798 = vmatprep.mubr.msk.bf16.mxu1 %vm62_vm0, %v6262_v48 }
 0x261   :  { %4818 = vmatprep.mubr.msk.bf16.mxu0 %vm62_vm0, %v6258_v53  ;;  %v3356_v53 = vld [vmem:[#allocation2 + $0x92] sm:$0xff] }
 0x262   :  { %v3368_v48 = vpack.c.bf16 %v3356_v53, %v6406_v63 }
 0x267   :  { %4799 = vmatmul.mubr.msk.bf16.gmra.mxu1 %vm62_vm0, %v6270_v20 }
 0x268   :  { %4819 = vmatmul.mubr.msk.bf16.gmra.mxu0 %vm62_vm0, %v6266_v44  ;;  %4802 = vmatprep.mubr.msk.bf16.mxu1 %vm62_vm0, %v6293_v62  ;;  %v3364_v44 = vld [vmem:[#allocation2 + $0x132] sm:$0xff] }
 0x269   :  { %4822 = vmatprep.mubr.msk.bf16.mxu0 %vm62_vm0, %v6290_v39  ;;  %v3372_v20 = vpack.c.bf16 %v3364_v44, %v2830_v6 }
 0x26f   :  { %4803 = vmatmul.mubr.msk.bf16.gmra.mxu1 %vm62_vm0, %v3016_v22 }
 0x270   :  { %4823 = vmatmul.mubr.msk.bf16.gmra.mxu0 %vm62_vm0, %v3194_v23  ;;  %4830 = vmatprep.mubr.msk.bf16.mxu1 %vm62_vm0, %v6311_v14 }
 0x277   :  { %4831 = vmatmul.mubr.msk.bf16.vlgmr.msra.gmra.mxu1 %vm62_vm0, %v6320_v4 }
 0x278   :  { %4834 = vmatprep.mubr.msk.bf16.mxu1 %vm62_vm0, %v6344_v21 }
 0x27f   :  { %4835 = vmatmul.mubr.msk.bf16.gmra.mxu1 %vm62_vm0, %v3368_v48 }
 0x280   :  { %4838 = vmatprep.mubr.msk.bf16.mxu1 %vm62_vm0, %v6359_v26 }
 0x287   :  { %4839 = vmatmul.mubr.msk.bf16.gmra.mxu1 %vm62_vm0, %v6363_v45 }
 0x288   :  { %4842 = vmatprep.mubr.msk.bf16.mxu1 %vm62_vm0, %v6374_v29 }
 0x28f   :  { %4843 = vmatmul.mubr.msk.bf16.gmra.mxu1 %vm62_vm0, %v3372_v20 }
 0x2b7   :  { %v4672_v19 = vpop.f32.mrf.mxu1 }
 0x2b8   :  { %v4692_v56 = vpop.f32.mrf.mxu0 }
 0x2b9   :  { %v2227_v39 = vadd.f32 %v4692_v56, %v4672_v19  ;;  %v2085_v62 = vpop.f32.mrf.mxu1 }
 0x2ba   :  { %v2218_v14 = vpop.f32.mrf.mxu0 }
 0x2bb   :  { %v2219_v4 = vadd.f32 %v2218_v14, %v2085_v62  ;;  %v4673_v40 = vpop.f32.mrf.mxu1 }
 0x2bc   :  { %v4693_v37 = vpop.f32.mrf.mxu0 }
 0x2bd   :  { %v2230_v0 = vadd.f32 %v4693_v37, %v4673_v40  ;;  %v2088_v21 = vpop.f32.mrf.mxu1 }
 0x2be   :  { %v2221_v3 = vpop.f32.mrf.mxu0 }
 0x2bf   :  { %v2222_v31 = vadd.f32 %v2221_v3, %v2088_v21  ;;  %v4676_v12 = vpop.f32.mrf.mxu1 }
 0x2c0   :  { %v4696_v58 = vpop.f32.mrf.mxu0 }
 0x2c1   :  { %v2243_v17 = vadd.f32 %v4696_v58, %v4676_v12  ;;  %v2101_v5 = vpop.f32.mrf.mxu1 }
 0x2c2   :  { %v2234_v27 = vpop.f32.mrf.mxu0 }
 0x2c3   :  { %v2235_v42 = vadd.f32 %v2234_v27, %v2101_v5  ;;  %v4677_v26 = vpop.f32.mrf.mxu1 }
 0x2c4   :  { %v4697_v11 = vpop.f32.mrf.mxu0 }
 0x2c5   :  { %v2246_v45 = vadd.f32 %v4697_v11, %v4677_v26  ;;  %v2104_v25 = vpop.f32.mrf.mxu1 }
 0x2c6   :  { %v2237_v46 = vpop.f32.mrf.mxu0 }
 0x2c7   :  { %v2238_v2 = vadd.f32 %v2237_v46, %v2104_v25  ;;  %v4680_v33 = vpop.f32.mrf.mxu1 }
 0x2c8   :  { %v4700_v29 = vpop.f32.mrf.mxu0 }
 0x2c9   :  { %v2259_v36 = vadd.f32 %v4700_v29, %v4680_v33  ;;  %v2117_v50 = vpop.f32.mrf.mxu1 }
 0x2ca   :  { %v2250_v52 = vpop.f32.mrf.mxu0 }
 0x2cb   :  { %v2251_v28 = vadd.f32 %v2250_v52, %v2117_v50  ;;  %v4681_v43 = vpop.f32.mrf.mxu1 }
 0x2cc   :  { %v4701_v1 = vpop.f32.mrf.mxu0 }
 0x2cd   :  { %v2262_v34 = vadd.f32 %v4701_v1, %v4681_v43  ;;  %v2120_v10 = vpop.f32.mrf.mxu1 }
 0x2ce   :  { %v2253_v51 = vpop.f32.mrf.mxu0 }
 0x2cf   :  { %v2254_v55 = vadd.f32 %v2253_v51, %v2120_v10  ;;  %v4684_v30 = vpop.f32.mrf.mxu1 }
 0x2d0   :  { %v4704_v63 = vpop.f32.mrf.mxu0 }
 0x2d1   :  { %v2275_v7 = vadd.f32 %v4704_v63, %v4684_v30  ;;  %v2133_v60 = vpop.f32.mrf.mxu1 }
 0x2d2   :  { %v2266_v15 = vpop.f32.mrf.mxu0 }
 0x2d3   :  { %v2267_v61 = vadd.f32 %v2266_v15, %v2133_v60  ;;  %v4685_v47 = vpop.f32.mrf.mxu1 }
 0x2d4   :  { %v4705_v59 = vpop.f32.mrf.mxu0 }
 0x2d5   :  { %v2278_v54 = vadd.f32 %v4705_v59, %v4685_v47  ;;  %v2136_v18 = vpop.f32.mrf.mxu1 }
 0x2d6   :  { %v2269_v49 = vpop.f32.mrf.mxu0 }
 0x2d7   :  { %v2270_v6 = vadd.f32 %v2269_v49, %v2136_v18  ;;  %v4712_v38 = vpop.f32.mrf.mxu1 }
 0x2d8   :  { %v4732_v8 = vpop.f32.mrf.mxu0  ;;  %v2445_v16 = vadd.f32 %v4712_v38, %v2227_v39 }
 0x2d9   :  { %v2380_v13 = vpop.f32.mrf.mxu1 }
 0x2da   :  { %v6479_v35 = vpop.f32.mrf.mxu0  ;;  %v2623_v41 = vadd.f32 %v4732_v8, %v2445_v16  ;;  %v6481_v57 = vadd.f32 %v2380_v13, %v2219_v4 }
 0x2db   :  { %v4713_v9 = vpop.f32.mrf.mxu1 }
 0x2dc   :  { %v6483_v32 = vpop.f32.mrf.mxu0  ;;  %v6485_v22 = vadd.f32 %v4713_v9, %v2230_v0 }
 0x2dd   :  { %v2383_v23 = vpop.f32.mrf.mxu1 }
 0x2de   :  { %v6487_v53 = vpop.f32.mrf.mxu0  ;;  %v6489_v48 = vadd.f32 %v2383_v23, %v2222_v31 }
 0x2df   :  { %v4716_v44 = vpop.f32.mrf.mxu1 }
 0x2e0   :  { %v4736_v20 = vpop.f32.mrf.mxu0  ;;  %v2449_v19 = vadd.f32 %v4716_v44, %v2243_v17 }
 0x2e1   :  { %v2396_v56 = vpop.f32.mrf.mxu1 }
 0x2e2   :  { %v6491_v39 = vpop.f32.mrf.mxu0  ;;  %v2627_v62 = vadd.f32 %v4736_v20, %v2449_v19  ;;  %v6493_v14 = vadd.f32 %v2396_v56, %v2235_v42 }
 0x2e3   :  { %v4717_v4 = vpop.f32.mrf.mxu1 }
 0x2e4   :  { %v6495_v40 = vpop.f32.mrf.mxu0  ;;  %v6497_v37 = vadd.f32 %v4717_v4, %v2246_v45 }
 0x2e5   :  { %v2399_v0 = vpop.f32.mrf.mxu1 }
 0x2e6   :  { %v6499_v21 = vpop.f32.mrf.mxu0  ;;  %v6501_v3 = vadd.f32 %v2399_v0, %v2238_v2 }
 0x2e7   :  { %v4720_v31 = vpop.f32.mrf.mxu1 }
 0x2e8   :  { %v4740_v12 = vpop.f32.mrf.mxu0  ;;  %v2453_v58 = vadd.f32 %v4720_v31, %v2259_v36 }
 0x2e9   :  { %v2412_v17 = vpop.f32.mrf.mxu1 }
 0x2ea   :  { %v6503_v5 = vpop.f32.mrf.mxu0  ;;  %v2631_v27 = vadd.f32 %v4740_v12, %v2453_v58  ;;  %v6505_v26 = vadd.f32 %v2412_v17, %v2251_v28 }
 0x2eb   :  { %v4721_v42 = vpop.f32.mrf.mxu1 }
 0x2ec   :  { %v6507_v11 = vpop.f32.mrf.mxu0  ;;  %v6509_v25 = vadd.f32 %v4721_v42, %v2262_v34 }
 0x2ed   :  { %v2415_v45 = vpop.f32.mrf.mxu1 }
 0x2ee   :  { %v6511_v46 = vpop.f32.mrf.mxu0  ;;  %v6513_v33 = vadd.f32 %v2415_v45, %v2254_v55 }
 0x2ef   :  { %v4724_v2 = vpop.f32.mrf.mxu1 }
 0x2f0   :  { %v4744_v29 = vpop.f32.mrf.mxu0  ;;  %v2457_v50 = vadd.f32 %v4724_v2, %v2275_v7 }
 0x2f1   :  { %v2428_v36 = vpop.f32.mrf.mxu1 }
 0x2f2   :  { %v6515_v52 = vpop.f32.mrf.mxu0  ;;  %v2635_v43 = vadd.f32 %v4744_v29, %v2457_v50  ;;  %v6517_v1 = vadd.f32 %v2428_v36, %v2267_v61 }
 0x2f3   :  { %v4725_v28 = vpop.f32.mrf.mxu1 }
 0x2f4   :  { %v6519_v10 = vpop.f32.mrf.mxu0  ;;  %v6521_v51 = vadd.f32 %v4725_v28, %v2278_v54 }
 0x2f5   :  { %v2431_v34 = vpop.f32.mrf.mxu1 }
 0x2f6   :  { %v6523_v30 = vpop.f32.mrf.mxu0  ;;  %v6525_v63 = vadd.f32 %v2431_v34, %v2270_v6 }
 0x2f7   :  { %7120 = vst [vmem:[#allocation41_spill] sm:$0xff] %v6523_v30  ;;  %v4752_v55 = vpop.f32.mrf.mxu1 }
 0x2f8   :  { %7121 = vst [vmem:[#allocation23_spill] sm:$0xff] %v6525_v63  ;;  %v6527_v60 = vpop.f32.mrf.mxu0  ;;  %v6529_v7 = vadd.f32 %v4752_v55, %v2623_v41 }
 0x2f9   :  { %v2736_v15 = vpop.f32.mrf.mxu1 }
 0x2fa   :  { %v2914_v47 = vpop.f32.mrf.mxu0 }
 0x2fb   :  { %v4753_v59 = vpop.f32.mrf.mxu1 }
 0x2fc   :  { %v6531_v61 = vpop.f32.mrf.mxu0 }
 0x2fd   :  { %v2739_v18 = vpop.f32.mrf.mxu1 }
 0x2fe   :  { %v6533_v49 = vpop.f32.mrf.mxu0 }
 0x2ff   :  { %v4756_v54 = vpop.f32.mrf.mxu1 }
 0x300   :  { %v6535_v38 = vpop.f32.mrf.mxu0  ;;  %v6537_v8 = vadd.f32 %v4756_v54, %v2627_v62 }
 0x301   :  { %v2752_v6 = vpop.f32.mrf.mxu1 }
 0x302   :  { %v6539_v16 = vpop.f32.mrf.mxu0 }
 0x303   :  { %v6541_v13 = vpop.f32.mrf.mxu1 }
 0x304   :  { %v6543_v41 = vpop.f32.mrf.mxu0 }
 0x305   :  { %v6545_v9 = vpop.f32.mrf.mxu1 }
 0x306   :  { %v6547_v23 = vpop.f32.mrf.mxu0 }
 0x307   :  { %v4760_v44 = vpop.f32.mrf.mxu1 }
 0x308   :  { %v6549_v20 = vpop.f32.mrf.mxu0  ;;  %v6551_v19 = vadd.f32 %v4760_v44, %v2631_v27 }
 0x309   :  { %7122 = vst [vmem:[#allocation21_spill] sm:$0xff] %v6549_v20  ;;  %v6553_v56 = vpop.f32.mrf.mxu1 }
 0x30a   :  { %7123 = vst [vmem:[#allocation20_spill] sm:$0xff] %v6551_v19  ;;  %v6555_v62 = vpop.f32.mrf.mxu0 }
 0x30b   :  { %7124 = vst [vmem:[#allocation24_spill] sm:$0xff] %v6555_v62  ;;  %v6557_v4 = vpop.f32.mrf.mxu1 }
 0x30c   :  { %7125 = vst [vmem:[#allocation29_spill] sm:$0xff] %v6557_v4  ;;  %v6559_v0 = vpop.f32.mrf.mxu0 }
 0x30d   :  { %7126 = vst [vmem:[#allocation42_spill] sm:$0xff] %v6559_v0  ;;  %v6561_v31 = vpop.f32.mrf.mxu1 }
 0x30e   :  { %7127 = vst [vmem:[#allocation46_spill] sm:$0xff] %v6561_v31  ;;  %v6563_v12 = vpop.f32.mrf.mxu0 }
 0x30f   :  { %7128 = vst [vmem:[#allocation44_spill] sm:$0xff] %v6563_v12  ;;  %v4764_v58 = vpop.f32.mrf.mxu1 }
 0x310   :  { %v6565_v17 = vpop.f32.mrf.mxu0  ;;  %v6567_v42 = vadd.f32 %v4764_v58, %v2635_v43 }
 0x311   :  { %7129 = vst [vmem:[#allocation26_spill] sm:$0xff] %v6565_v17  ;;  %v6569_v45 = vpop.f32.mrf.mxu1 }
 0x312   :  { %7130 = vst [vmem:[#allocation25_spill] sm:$0xff] %v6567_v42  ;;  %7131 = vst [vmem:[#allocation28_spill] sm:$0xff] %v6569_v45  ;;  %v6571_v27 = vpop.f32.mrf.mxu0  ;;  %v2621_v45 = vadd.f32 %v6479_v35, %v6481_v57  ;;  %v2625_v57 = vadd.f32 %v6491_v39, %v6493_v14  ;;  %v2626_v39 = vadd.f32 %v6499_v21, %v6501_v3 }
 0x313   :  { %7132 = vst [vmem:[#allocation31_spill] sm:$0xff] %v6571_v27  ;;  %v6573_v2 = vpop.f32.mrf.mxu1 }
 0x314   :  { %7133 = vst [vmem:[#allocation43_spill] sm:$0xff] %v6573_v2  ;;  %v6575_v29 = vpop.f32.mrf.mxu0  ;;  %v2799_v0 = vadd.f32 %v2736_v15, %v2621_v45  ;;  %v2979_v15 = vadd.f32 %v6527_v60, %v6529_v7 }
 0x315   :  { %7134 = vst [vmem:[#allocation30_spill] sm:$0xff] %v6575_v29  ;;  %v6577_v50 = vpop.f32.mrf.mxu1 }
 0x316   :  { %7135 = vst [vmem:[#allocation47_spill] sm:$0xff] %v6577_v50  ;;  %v6579_v36 = vpop.f32.mrf.mxu0  ;;  %v2977_v31 = vadd.f32 %v2914_v47, %v2799_v0 }
 0x317   :  { %7136 = vst [vmem:[#allocation32_spill] sm:$0xff] %v6579_v36  ;;  %v4792_v28 = vpop.f32.mrf.mxu1 }
 0x318   :  { %v4812_v34 = vpop.f32.mrf.mxu0  ;;  %v3157_v47 = vadd.f32 %v4792_v28, %v2979_v15 }
 0x319   :  { %v3092_v55 = vpop.f32.mrf.mxu1 }
 0x31a   :  { %v3270_v54 = vpop.f32.mrf.mxu0  ;;  %v3155_v45 = vadd.f32 %v3092_v55, %v2977_v31 }
 0x31b   :  { %v4793_v44 = vpop.f32.mrf.mxu1 }
 0x31c   :  { %v4813_v43 = vpop.f32.mrf.mxu0  ;;  %v3333_v14 = vadd.f32 %v3270_v54, %v3155_v45 }
 0x31d   :  { %v3095_v24 = vpop.f32.mrf.mxu1 }
 0x31e   :  { %v3273_v42 = vpop.f32.mrf.mxu0 }
 0x31f   :  { %v4796_v58 = vpop.f32.mrf.mxu1 }
 0x320   :  { %v6583_v2 = vpop.f32.mrf.mxu0 }
 0x321   :  { %v3108_v17 = vpop.f32.mrf.mxu1  ;;  %7137 = vst [vmem:[#allocation35_spill] sm:$0xff] %v6583_v2  ;;  %v2624_v2 = vadd.f32 %v6483_v32, %v6485_v22 }
 0x322   :  { %v3286_v36 = vpop.f32.mrf.mxu0 }
 0x323   :  { %v4797_v30 = vpop.f32.mrf.mxu1 }
 0x324   :  { %v6595_v20 = vpop.f32.mrf.mxu0 }
 0x325   :  { %v6581_v27 = vpop.f32.mrf.mxu1 }
 0x326   :  { %v6605_v62 = vpop.f32.mrf.mxu0 }
 0x327   :  { %v6585_v29 = vpop.f32.mrf.mxu1 }
 0x328   :  { %7138 = vst [vmem:[#allocation37_spill] sm:$0xff] %v6585_v29  ;;  %v2622_v29 = vadd.f32 %v6487_v53, %v6489_v48  ;;  %v2803_v48 = vadd.f32 %v2752_v6, %v2625_v57  ;;  %v7141_v57 = vld [vmem:[#allocation24_spill] sm:$0xff]  ;;  %v7144_v45 = vld [vmem:[#allocation35_spill] sm:$0xff] }
 0x329   :  { %v6587_v50 = vpop.f32.mrf.mxu1 }
 0x32a   :  { %7139 = vst [vmem:[#allocation45_spill] sm:$0xff] %v6587_v50  ;;  %v2800_v4 = vadd.f32 %v2739_v18, %v2622_v29  ;;  %v6619_v18 = vpop.f32.mrf.mxu0 }
 0x32b   :  { %v6589_v63 = vpop.f32.mrf.mxu1 }
 0x32c   :  { %7140 = vst [vmem:[#allocation48_spill] sm:$0xff] %v6589_v63  ;;  %v2802_v63 = vadd.f32 %v4753_v59, %v2624_v2  ;;  %v2978_v53 = vadd.f32 %v6533_v49, %v2800_v4  ;;  %v2628_v59 = vadd.f32 %v6495_v40, %v6497_v37  ;;  %v3335_v49 = vadd.f32 %v4812_v34, %v3157_v47  ;;  %v3302_v4 = vpop.f32.mrf.mxu0 }
 0x32d   :  { %v6593_v12 = vpop.f32.mrf.mxu1  ;;  %v2629_v40 = vadd.f32 %v6503_v5, %v6505_v26  ;;  %v2983_v37 = vadd.f32 %v6535_v38, %v6537_v8  ;;  %v6637_v5 = vld [vmem:[%s6990_s6] ss:$0 sm:$0xff] }
 0x32e   :  { %v2980_v22 = vadd.f32 %v6531_v61, %v2802_v63  ;;  %v3156_v7 = vadd.f32 %v3095_v24, %v2978_v53  ;;  %v2806_v31 = vadd.f32 %v6541_v13, %v2628_v59  ;;  %v2981_v63 = vadd.f32 %v6539_v16, %v2803_v48  ;;  %v4821_v55 = vpop.f32.mrf.mxu0  ;;  %v7145_v53 = vld [vmem:[#allocation20_spill] sm:$0xff]  ;;  %v7146_v48 = vld [vmem:[#allocation21_spill] sm:$0xff] }
 0x32f   :  { %v6597_v19 = vpop.f32.mrf.mxu1  ;;  %v2804_v61 = vadd.f32 %v6545_v9, %v2626_v39  ;;  %v2632_v13 = vadd.f32 %v6507_v11, %v6509_v25  ;;  %v2807_v9 = vadd.f32 %v6553_v56, %v2629_v40  ;;  %v3161_v34 = vadd.f32 %v4796_v58, %v2983_v37  ;;  %v7149_v40 = vld [vmem:[#allocation44_spill] sm:$0xff] }
 0x330   :  { %v3158_v60 = vadd.f32 %v4793_v44, %v2980_v22  ;;  %v3334_v29 = vadd.f32 %v3273_v42, %v3156_v7  ;;  %v3159_v24 = vadd.f32 %v3108_v17, %v2981_v63  ;;  %v2984_v16 = vadd.f32 %v6543_v41, %v2806_v31 }
 0x331   :  { %v6603_v50 = vpop.f32.mrf.mxu1  ;;  %v2982_v38 = vadd.f32 %v6547_v23, %v2804_v61  ;;  %v2630_v11 = vadd.f32 %v6511_v46, %v6513_v33  ;;  %v2633_v25 = vadd.f32 %v6515_v52, %v6517_v1  ;;  %v2636_v41 = vadd.f32 %v6519_v10, %v6521_v51  ;;  %v7142_v33 = vld [vmem:[#allocation29_spill] sm:$0xff]  ;;  %v7143_v52 = vld [vmem:[#allocation46_spill] sm:$0xff] }
 0x332   :  { %v3336_v3 = vadd.f32 %v4813_v43, %v3158_v60  ;;  %v3162_v56 = vadd.f32 %v4797_v30, %v2984_v16  ;;  %v3337_v44 = vadd.f32 %v3286_v36, %v3159_v24  ;;  %v2985_v46 = vadd.f32 %v7141_v57, %v2807_v9  ;;  %v7151_v24 = vld [vmem:[#allocation37_spill] sm:$0xff]  ;;  %v7152_v9 = vld [vmem:[#allocation23_spill] sm:$0xff] }
 0x333   :  { %v6607_v35 = vpop.f32.mrf.mxu1  ;;  %v3160_v23 = vadd.f32 %v6581_v27, %v2982_v38  ;;  %v2810_v15 = vadd.f32 %v7142_v33, %v2632_v13  ;;  %v2808_v1 = vadd.f32 %v7143_v52, %v2630_v11  ;;  %v3339_v10 = vadd.f32 %v7144_v45, %v3161_v34  ;;  %v7153_v34 = vld [vmem:[#allocation41_spill] sm:$0xff]  ;;  %v7157_v52 = vld [vmem:[#allocation47_spill] sm:$0xff] }
 0x334   :  { %v2987_v47 = vadd.f32 %v7146_v48, %v7145_v53  ;;  %v3340_v59 = vadd.f32 %v6595_v20, %v3162_v56  ;;  %v7159_v53 = vld [vmem:[#allocation26_spill] sm:$0xff] }
 0x335   :  { %v6613_v32 = vpop.f32.mrf.mxu1  ;;  %v3338_v31 = vadd.f32 %v6605_v62, %v3160_v23  ;;  %v2986_v37 = vadd.f32 %v7149_v40, %v2808_v1 }
 0x337   :  { %v4832_v0 = vpop.f32.mrf.mxu1 }
 0x338   :  { %v3513_v28 = vadd.f32 %v4832_v0, %v3335_v49  ;;  %v7147_v0 = vld [vmem:[#allocation45_spill] sm:$0xff]  ;;  %v7148_v49 = vld [vmem:[#allocation42_spill] sm:$0xff] }
 0x339   :  { %v3448_v2 = vpop.f32.mrf.mxu1  ;;  %v3163_v39 = vadd.f32 %v7147_v0, %v2985_v46  ;;  %v7155_v46 = vld [vmem:[#allocation31_spill] sm:$0xff] }
 0x33a   :  { %v3511_v6 = vadd.f32 %v3448_v2, %v3333_v14  ;;  %v6651_v43 = vadd.f32 %v6637_v5, %v3513_v28  ;;  %v3305_v14 = vpop.f32.mrf.mxu0  ;;  %v3165_v28 = vadd.f32 %v7151_v24, %v2987_v47 }
 0x33b   :  { %v4833_v21 = vpop.f32.mrf.mxu1  ;;  %v3341_v38 = vadd.f32 %v3302_v4, %v3163_v39 }
 0x33c   :  { %v6641_v8 = vadd.f32 %v6637_v5, %v3511_v6  ;;  %v3514_v17 = vadd.f32 %v4833_v21, %v3336_v3  ;;  %v3553_v2 = vsel %vm62_vm0, %v6651_v43, 0.0  ;;  %v2988_v6 = vadd.f32 %v7148_v49, %v2810_v15  ;;  %v7150_v21 = vld [vmem:[#allocation28_spill] sm:$0xff]  ;;  %v4824_v11 = vpop.f32.mrf.mxu0  ;;  %v7156_v15 = vld [vmem:[#allocation43_spill] sm:$0xff] }
 0x33d   :  { %v3451_v26 = vpop.f32.mrf.mxu1  ;;  %v2811_v20 = vadd.f32 %v7150_v21, %v2633_v25  ;;  %v3164_v25 = vadd.f32 %v6593_v12, %v2986_v37  ;;  %v2814_v4 = vadd.f32 %v7156_v15, %v2636_v41  ;;  %v7161_v49 = vld [vmem:[#allocation32_spill] sm:$0xff] }
 0x33e   :  { %v3512_v42 = vadd.f32 %v3451_v26, %v3334_v29  ;;  %v3550_v30 = vsel %vm62_vm0, %v6641_v8, 0.0  ;;  %v6663_v27 = vadd.f32 %v6637_v5, %v3514_v17  ;;  %v2634_v26 = vadd.f32 %v7153_v34, %v7152_v9  ;;  %v7154_v17 = vld [vmem:[#allocation48_spill] sm:$0xff]  ;;  %v3318_v41 = vpop.f32.mrf.mxu0 }
 0x33f   :  { %v4836_v54 = vpop.f32.mrf.mxu1  ;;  %v2989_v33 = vadd.f32 %v7155_v46, %v2811_v20 }
 0x340   :  { %v6654_v58 = vadd.f32 %v6637_v5, %v3512_v42  ;;  %v3517_v63 = vadd.f32 %v4836_v54, %v3339_v10  ;;  %v3555_v62 = vsel %vm62_vm0, %v6663_v27, 0.0  ;;  %v3166_v42 = vadd.f32 %v7154_v17, %v2988_v6 }
 0x341   :  { %v3464_v51 = vpop.f32.mrf.mxu1  ;;  %v2812_v1 = vadd.f32 %v7157_v52, %v2634_v26 }
 0x342   :  { %v3551_v36 = vsel %vm62_vm0, %v6654_v58, 0.0  ;;  %v3515_v22 = vadd.f32 %v3464_v51, %v3337_v44  ;;  %v6688_v44 = vadd.f32 %v6637_v5, %v3517_v63  ;;  %v3343_v51 = vadd.f32 %v6619_v18, %v3165_v28 }
 0x343   :  { %v3552_v60 = vadd.f32 %v3551_v36, %v3550_v30  ;;  %v4837_v7 = vpop.f32.mrf.mxu1  ;;  %v3344_v47 = vadd.f32 %v4821_v55, %v3166_v42  ;;  %v2990_v6 = vadd.f32 %v7161_v49, %v2812_v1  ;;  %v3768_v55 = vld [vmem:[%s6993_s9 + $0x10] sm:$0xff]  ;;  %v3766_v42 = vld [vmem:[%s6993_s9] sm:$0xff] }
 0x344   :  { %v6675_v61 = vadd.f32 %v6637_v5, %v3515_v22  ;;  %v3518_v13 = vadd.f32 %v4837_v7, %v3340_v59  ;;  %v7158_v22 = vld [vmem:[#allocation25_spill] sm:$0xff]  ;;  %v3167_v59 = vadd.f32 %v6603_v50, %v2989_v33  ;;  %v3561_v18 = vsel %vm62_vm0, %v6688_v44, 0.0  ;;  %v3854_v49 = vld [vmem:[%s6995_s11] sm:$0x3] }
 0x345   :  { %v3554_v3 = vadd.f32 %v3553_v2, %v3552_v60  ;;  %v3467_v29 = vpop.f32.mrf.mxu1  ;;  %v2991_v48 = vadd.f32 %v7159_v53, %v7158_v22  ;;  %v3342_v60 = vadd.f32 %v3305_v14, %v3164_v25  ;;  %v7160_v2 = vld [vmem:[#allocation30_spill] sm:$0xff]  ;;  %v3769_v50 = vld [vmem:[%s6993_s9 + $0x18] sm:$0xff]  ;;  %v3168_v9 = vadd.f32 %v6613_v32, %v2990_v6  ;;  %4858 = vmatpush3.msk.msra.mxu1 %vm3866_vm3, %v3854_v49 }
 0x346   :  { %v3516_v16 = vadd.f32 %v3467_v29, %v3338_v31  ;;  %v3557_v23 = vsel %vm62_vm0, %v6675_v61, 0.0  ;;  %v6700_v12 = vadd.f32 %v6637_v5, %v3518_v13  ;;  %v2992_v63 = vadd.f32 %v7160_v2, %v2814_v4  ;;  %4847 = vmatpush3.msra.mxu0 %v3769_v50 }
 0x347   :  { %v3556_v56 = vadd.f32 %v3555_v62, %v3554_v3  ;;  %v4840_v54 = vpop.f32.mrf.mxu1  ;;  %v3169_v14 = vadd.f32 %v6597_v19, %v2991_v48  ;;  %v7162_v29 = vmov 0.0   ;;  %v3345_v24 = vadd.f32 %v3318_v41, %v3167_v59  ;;  %v4825_v62 = vpop.f32.mrf.mxu0  ;;  %v3767_v19 = vld [vmem:[%s6993_s9 + $0x8] sm:$0xff] }
 0x348   :  { %v6693_v57 = vadd.f32 %v6637_v5, %v3516_v16  ;;  %v3521_v7 = vadd.f32 %v4840_v54, %v3343_v51  ;;  %v3563_v21 = vsel %vm62_vm0, %v6700_v12, 0.0  ;;  %4854 = vmatprep.mubr.msk.f32.mxu0 %vm4935_vm2, %v7162_v29  ;;  %v3170_v28 = vadd.f32 %v6607_v35, %v2992_v63  ;;  %4848 = vmatprep.subr.mxu0 %v7162_v29 }
 0x349   :  { %v3558_v45 = vadd.f32 %v3557_v23, %v3556_v56  ;;  %v3480_v10 = vpop.f32.mrf.mxu1  ;;  %4859 = vmatprep.mubr.msk.f32.mxu1 %vm4935_vm2, %v7162_v29  ;;  %4849 = vmatpush3.msra.mxu0 %v3768_v55  ;;  %v3347_v56 = vadd.f32 %v4824_v11, %v3169_v14  ;;  %v3321_v46 = vpop.f32.mrf.mxu0 }
 0x34a   :  { %v3559_v30 = vsel %vm62_vm0, %v6693_v57, 0.0  ;;  %v3519_v36 = vadd.f32 %v3480_v10, %v3341_v38  ;;  %v3544_v34 = vadd.f32 %v6637_v5, %v3521_v7  ;;  %4850 = vmatprep.subr.mxu0 %v7162_v29  ;;  %v3348_v23 = vadd.f32 %v4825_v62, %v3170_v28 }
 0x34b   :  { %v3560_v0 = vadd.f32 %v3559_v30, %v3558_v45  ;;  %v4841_v39 = vpop.f32.mrf.mxu1  ;;  %4851 = vmatpush3.msra.mxu0 %v3767_v19  ;;  %v3346_v4 = vadd.f32 %v3321_v46, %v3168_v9 }
 0x34c   :  { %v6710_v31 = vadd.f32 %v6637_v5, %v3519_v36  ;;  %v3522_v20 = vadd.f32 %v4841_v39, %v3344_v47  ;;  %4852 = vmatprep.subr.mxu0 %v7162_v29  ;;  %v3569_v52 = vsel %vm62_vm0, %v3544_v34, 0.0 }
 0x34d   :  { %v3562_v40 = vadd.f32 %v3561_v18, %v3560_v0  ;;  %v3483_v37 = vpop.f32.mrf.mxu1  ;;  %4853 = vmatpush3.msra.mxu0 %v3766_v42 }
 0x34e   :  { %v3520_v3 = vadd.f32 %v3483_v37, %v3342_v60  ;;  %v3565_v26 = vsel %vm62_vm0, %v6710_v31, 0.0  ;;  %v3545_v54 = vadd.f32 %v6637_v5, %v3522_v20 }
 0x34f   :  { %v3564_v13 = vadd.f32 %v3563_v21, %v3562_v40  ;;  %v4844_v16 = vpop.f32.mrf.mxu1 }
 0x350   :  { %v3543_v35 = vadd.f32 %v6637_v5, %v3520_v3  ;;  %v3525_v1 = vadd.f32 %v4844_v16, %v3347_v56  ;;  %v3571_v51 = vsel %vm62_vm0, %v3545_v54, 0.0 }
 0x351   :  { %v3566_v38 = vadd.f32 %v3565_v26, %v3564_v13  ;;  %v3496_v17 = vpop.f32.mrf.mxu1 }
 0x352   :  { %v3567_v32 = vsel %vm62_vm0, %v3543_v35, 0.0  ;;  %v3523_v25 = vadd.f32 %v3496_v17, %v3345_v24  ;;  %v3548_v53 = vadd.f32 %v6637_v5, %v3525_v1 }
 0x353   :  { %v3568_v33 = vadd.f32 %v3567_v32, %v3566_v38  ;;  %v4845_v15 = vpop.f32.mrf.mxu1 }
 0x354   :  { %v3546_v45 = vadd.f32 %v6637_v5, %v3523_v25  ;;  %v3526_v30 = vadd.f32 %v4845_v15, %v3348_v23  ;;  %v3577_v60 = vsel %vm62_vm0, %v3548_v53, 0.0 }
 0x355   :  { %v3570_v11 = vadd.f32 %v3569_v52, %v3568_v33  ;;  %v3499_v10 = vpop.f32.mrf.mxu1 }
 0x356   :  { %v3524_v36 = vadd.f32 %v3499_v10, %v3346_v4  ;;  %v3573_v48 = vsel %vm62_vm0, %v3546_v45, 0.0  ;;  %v3549_v41 = vadd.f32 %v6637_v5, %v3526_v30 }
 0x357   :  { %v3572_v22 = vadd.f32 %v3571_v51, %v3570_v11 }
 0x358   :  { %v3547_v47 = vadd.f32 %v6637_v5, %v3524_v36  ;;  %v3579_v7 = vsel %vm62_vm0, %v3549_v41, 0.0 }
 0x359   :  { %v3574_v59 = vadd.f32 %v3573_v48, %v3572_v22 }
 0x35a   :  { %v3575_v0 = vsel %vm62_vm0, %v3547_v47, 0.0 }
 0x35b   :  { %v3576_v39 = vadd.f32 %v3575_v0, %v3574_v59 }
 0x35d   :  { %v3578_v18 = vadd.f32 %v3577_v60, %v3576_v39 }
 0x35f   :  { %v3580_v2 = vadd.f32 %v3579_v7, %v3578_v18 }
 0x361   :  { %v3581_v63 = vrot.slane %v3580_v2, 4 }
 0x363   :  { %v3582_v6 = vadd.f32 %v3581_v63, %v3580_v2 }
 0x365   :  { %v3583_v40 = vrot.slane %v3582_v6, 2 }
 0x367   :  { %v3584_v37 = vadd.f32 %v3583_v40, %v3582_v6 }
 0x369   :  { %v3585_v5 = vrot.slane %v3584_v37, 1 }
 0x36b   :  { %v3586_v50 = vadd.f32 %v3585_v5, %v3584_v37 }
 0x36d   :  { %v3587_v55 = vmul.f32 0.0078125, %v3586_v50 }
 0x36f   :  { %v6756_v14 = vsub.f32 %v6641_v8, %v3587_v55  ;;  %v6759_v21 = vsub.f32 %v6654_v58, %v3587_v55  ;;  %v6762_v20 = vsub.f32 %v6651_v43, %v3587_v55  ;;  %v6765_v3 = vsub.f32 %v6663_v27, %v3587_v55 }
 0x370   :  { %v6768_v29 = vsub.f32 %v6675_v61, %v3587_v55  ;;  %v6771_v24 = vsub.f32 %v6693_v57, %v3587_v55  ;;  %v6774_v28 = vsub.f32 %v6688_v44, %v3587_v55  ;;  %v6777_v8 = vsub.f32 %v6700_v12, %v3587_v55 }
 0x371   :  { %v6780_v58 = vsub.f32 %v6710_v31, %v3587_v55  ;;  %v6782_v43 = vsub.f32 %v3543_v35, %v3587_v55  ;;  %v6784_v62 = vsub.f32 %v3544_v34, %v3587_v55  ;;  %v6786_v27 = vsub.f32 %v3545_v54, %v3587_v55 }
 0x372   :  { %v6788_v61 = vsub.f32 %v3546_v45, %v3587_v55  ;;  %v6790_v13 = vsub.f32 %v3547_v47, %v3587_v55  ;;  %v6792_v57 = vsub.f32 %v3548_v53, %v3587_v55  ;;  %v6794_v44 = vsub.f32 %v3549_v41, %v3587_v55 }
 0x373   :  { %v3604_v12 = vmul.f32 %v6756_v14, %v6756_v14  ;;  %v3605_v31 = vmul.f32 %v6759_v21, %v6759_v21  ;;  %v3606_v16 = vmul.f32 %v6762_v20, %v6762_v20  ;;  %v3607_v19 = vmul.f32 %v6765_v3, %v6765_v3 }
 0x374   :  { %v3608_v35 = vmul.f32 %v6768_v29, %v6768_v29  ;;  %v3609_v42 = vmul.f32 %v6771_v24, %v6771_v24  ;;  %v3610_v32 = vmul.f32 %v6774_v28, %v6774_v28  ;;  %v3611_v46 = vmul.f32 %v6777_v8, %v6777_v8 }
 0x375   :  { %v3620_v9 = vsel %vm62_vm0, %v3604_v12, 0.0  ;;  %v3621_v34 = vsel %vm62_vm0, %v3605_v31, 0.0  ;;  %v3623_v38 = vsel %vm62_vm0, %v3606_v16, 0.0  ;;  %v3625_v56 = vsel %vm62_vm0, %v3607_v19, 0.0 }
 0x376   :  { %v3622_v26 = vadd.f32 %v3621_v34, %v3620_v9  ;;  %v3627_v25 = vsel %vm62_vm0, %v3608_v35, 0.0  ;;  %v3629_v33 = vsel %vm62_vm0, %v3609_v42, 0.0  ;;  %v3612_v4 = vmul.f32 %v6780_v58, %v6780_v58 }
 0x377   :  { %v3631_v52 = vsel %vm62_vm0, %v3610_v32, 0.0  ;;  %v3613_v45 = vmul.f32 %v6782_v43, %v6782_v43  ;;  %v3633_v11 = vsel %vm62_vm0, %v3611_v46, 0.0  ;;  %v3614_v51 = vmul.f32 %v6784_v62, %v6784_v62  ;;  %v4291_v46 = vld [vmem:[%s6991_s7] ss:$0 sm:$0xff] }
 0x378   :  { %v3624_v17 = vadd.f32 %v3623_v38, %v3622_v26  ;;  %v3635_v30 = vsel %vm62_vm0, %v3612_v4, 0.0  ;;  %v3615_v22 = vmul.f32 %v6786_v27, %v6786_v27  ;;  %v3616_v47 = vmul.f32 %v6788_v61, %v6788_v61 }
 0x379   :  { %v3637_v53 = vsel %vm62_vm0, %v3613_v45, 0.0  ;;  %v3639_v59 = vsel %vm62_vm0, %v3614_v51, 0.0  ;;  %v3617_v0 = vmul.f32 %v6790_v13, %v6790_v13  ;;  %v3618_v18 = vmul.f32 %v6792_v57, %v6792_v57 }
 0x37a   :  { %v3626_v54 = vadd.f32 %v3625_v56, %v3624_v17  ;;  %v3641_v39 = vsel %vm62_vm0, %v3615_v22, 0.0  ;;  %v3643_v7 = vsel %vm62_vm0, %v3616_v47, 0.0  ;;  %v3619_v63 = vmul.f32 %v6794_v44, %v6794_v44 }
 0x37b   :  { %v3645_v49 = vsel %vm62_vm0, %v3617_v0, 0.0  ;;  %v3647_v40 = vsel %vm62_vm0, %v3618_v18, 0.0 }
 0x37c   :  { %v3628_v23 = vadd.f32 %v3627_v25, %v3626_v54  ;;  %v3649_v5 = vsel %vm62_vm0, %v3619_v63, 0.0 }
 0x37e   :  { %v3630_v15 = vadd.f32 %v3629_v33, %v3628_v23  ;;  %v4292_v33 = vld [vmem:[%s6992_s8] ss:$0 sm:$0xff] }
 0x380   :  { %v3632_v1 = vadd.f32 %v3631_v52, %v3630_v15 }
 0x382   :  { %v3634_v10 = vadd.f32 %v3633_v11, %v3632_v1 }
 0x384   :  { %v3636_v36 = vadd.f32 %v3635_v30, %v3634_v10 }
 0x386   :  { %v3638_v48 = vadd.f32 %v3637_v53, %v3636_v36 }
 0x388   :  { %v3640_v41 = vadd.f32 %v3639_v59, %v3638_v48 }
 0x38a   :  { %v3642_v60 = vadd.f32 %v3641_v39, %v3640_v41 }
 0x38c   :  { %v3644_v2 = vadd.f32 %v3643_v7, %v3642_v60 }
 0x38e   :  { %v3646_v6 = vadd.f32 %v3645_v49, %v3644_v2 }
 0x390   :  { %v3648_v37 = vadd.f32 %v3647_v40, %v3646_v6 }
 0x392   :  { %v3650_v50 = vadd.f32 %v3649_v5, %v3648_v37 }
 0x394   :  { %v3651_v55 = vrot.slane %v3650_v50, 4 }
 0x396   :  { %v3652_v12 = vadd.f32 %v3651_v55, %v3650_v50 }
 0x398   :  { %v3653_v31 = vrot.slane %v3652_v12, 2 }
 0x39a   :  { %v3654_v16 = vadd.f32 %v3653_v31, %v3652_v12 }
 0x39c   :  { %v3655_v19 = vrot.slane %v3654_v16, 1 }
 0x39e   :  { %v3656_v9 = vadd.f32 %v3655_v19, %v3654_v16 }
 0x3a0   :  { %v3657_v34 = vmul.f32 0.0078125, %v3656_v9 }
 0x3a2   :  { %v3658_v26 = vadd.f32 1e-05, %v3657_v34 }
 0x3a4   :  { %4906 = vrsqrt.f32 %v3658_v26 }
 0x3b1   :  { %v4907_v35 = vpop.eup %4906 }
 0x3b2   :  { %v3660_v38 = vmul.f32 %v4907_v35, %v6756_v14  ;;  %v3661_v17 = vmul.f32 %v4907_v35, %v6759_v21  ;;  %v3662_v42 = vmul.f32 %v4907_v35, %v6762_v20  ;;  %v3663_v56 = vmul.f32 %v4907_v35, %v6765_v3 }
 0x3b3   :  { %v3664_v54 = vmul.f32 %v4907_v35, %v6768_v29  ;;  %v3665_v32 = vmul.f32 %v4907_v35, %v6771_v24  ;;  %v3666_v25 = vmul.f32 %v4907_v35, %v6774_v28  ;;  %v3667_v23 = vmul.f32 %v4907_v35, %v6777_v8 }
 0x3b4   :  { %v3668_v14 = vmul.f32 %v4907_v35, %v6780_v58  ;;  %v3669_v21 = vmul.f32 %v4907_v35, %v6782_v43  ;;  %v3670_v20 = vmul.f32 %v4907_v35, %v6784_v62  ;;  %v3671_v3 = vmul.f32 %v4907_v35, %v6786_v27 }
 0x3b5   :  { %v3672_v29 = vmul.f32 %v4907_v35, %v6788_v61  ;;  %v3673_v24 = vmul.f32 %v4907_v35, %v6790_v13  ;;  %v3674_v28 = vmul.f32 %v4907_v35, %v6792_v57  ;;  %v3675_v8 = vmul.f32 %v4907_v35, %v6794_v44 }
 0x3b6   :  { %v3691_v15 = vmul.f32 %v4291_v46, %v3668_v14  ;;  %v3692_v58 = vmul.f32 %v4291_v46, %v3669_v21  ;;  %v3693_v4 = vmul.f32 %v4291_v46, %v3670_v20  ;;  %v3694_v43 = vmul.f32 %v4291_v46, %v3671_v3 }
 0x3b7   :  { %v3695_v52 = vmul.f32 %v4291_v46, %v3672_v29  ;;  %v3696_v13 = vmul.f32 %v4291_v46, %v3673_v24  ;;  %v3697_v45 = vmul.f32 %v4291_v46, %v3674_v28  ;;  %v3683_v30 = vmul.f32 %v4291_v46, %v3660_v38 }
 0x3b8   :  { %v6866_v62 = vadd.f32 %v4292_v33, %v3691_v15  ;;  %v6868_v27 = vadd.f32 %v4292_v33, %v3692_v58  ;;  %v6870_v61 = vadd.f32 %v4292_v33, %v3693_v4  ;;  %v6872_v1 = vadd.f32 %v4292_v33, %v3694_v43 }
 0x3b9   :  { %v6878_v11 = vadd.f32 %v4292_v33, %v3695_v52  ;;  %v3684_v36 = vmul.f32 %v4291_v46, %v3661_v17  ;;  %v3685_v22 = vmul.f32 %v4291_v46, %v3662_v42  ;;  %v3698_v53 = vmul.f32 %v4291_v46, %v3675_v8 }
 0x3ba   :  { %v3743_v57 = vsel %vm62_vm0, %v6866_v62, 0.0  ;;  %v3744_v44 = vsel %vm62_vm0, %v6868_v27, 0.0  ;;  %v3746_v51 = vsel %vm62_vm0, %v6870_v61, 0.0  ;;  %v3686_v47 = vmul.f32 %v4291_v46, %v3663_v56 }
 0x3bb   :  { %v3745_v10 = vadd.f32 %v3744_v44, %v3743_v57  ;;  %v6882_v59 = vadd.f32 %v4292_v33, %v3696_v13  ;;  %v3748_v41 = vsel %vm62_vm0, %v6872_v1, 0.0  ;;  %v6886_v0 = vadd.f32 %v4292_v33, %v3683_v30 }
 0x3bc   :  { %v6888_v39 = vadd.f32 %v4292_v33, %v3684_v36  ;;  %v3687_v18 = vmul.f32 %v4291_v46, %v3664_v54  ;;  %v6890_v7 = vadd.f32 %v4292_v33, %v3685_v22  ;;  %v6892_v2 = vadd.f32 %v4292_v33, %v3697_v45  ;;  %v4293_v22 = vld [vmem:[%s6994_s10] ss:$0 sm:$0xff]  ;;  %s4937_s10 = smov [#allocation3]  }
 0x3bd   :  { %v3747_v48 = vadd.f32 %v3746_v51, %v3745_v10  ;;  %v3750_v63 = vsel %vm62_vm0, %v6878_v11, 0.0  ;;  %v3722_v49 = vsel %vm62_vm0, %v6886_v0, 0.0  ;;  %v3688_v40 = vmul.f32 %v4291_v46, %v3665_v32 }
 0x3be   :  { %v6898_v37 = vadd.f32 %v4292_v33, %v3686_v47  ;;  %v3723_v5 = vsel %vm62_vm0, %v6888_v39, 0.0  ;;  %v6902_v50 = vadd.f32 %v4292_v33, %v3698_v53  ;;  %v3752_v55 = vsel %vm62_vm0, %v6882_v59, 0.0 }
 0x3bf   :  { %v3749_v60 = vadd.f32 %v3748_v41, %v3747_v48  ;;  %v3724_v12 = vadd.f32 %v3723_v5, %v3722_v49  ;;  %v3689_v16 = vmul.f32 %v4291_v46, %v3666_v25  ;;  %v6906_v19 = vadd.f32 %v4292_v33, %v3687_v18 }
 0x3c0   :  { %v3725_v9 = vsel %vm62_vm0, %v6890_v7, 0.0  ;;  %v3754_v34 = vsel %vm62_vm0, %v6892_v2, 0.0  ;;  %v3690_v38 = vmul.f32 %v4291_v46, %v3667_v23  ;;  %v6912_v17 = vadd.f32 %v4292_v33, %v3688_v40 }
 0x3c1   :  { %v3751_v6 = vadd.f32 %v3750_v63, %v3749_v60  ;;  %v3726_v26 = vadd.f32 %v3725_v9, %v3724_v12  ;;  %v3727_v42 = vsel %vm62_vm0, %v6898_v37, 0.0  ;;  %v3756_v56 = vsel %vm62_vm0, %v6902_v50, 0.0  ;;  %v4295_v60 = vld [vmem:[%s6996_s12] ss:$0 sm:$0xff]  ;;  %s4032_s12 = sshll.u32 %s4937_s10, 4  ;;  %s4033_s12 = int_to_ptr.vmem [resolvable:$true] %s4032_s12 }
 0x3c2   :  { %v6918_v25 = vadd.f32 %v4292_v33, %v3689_v16  ;;  %v3729_v14 = vsel %vm62_vm0, %v6906_v19, 0.0  ;;  %v3713_v3 = vadd.f32 %v4292_v33, %v3690_v38  ;;  %v3731_v23 = vsel %vm62_vm0, %v6912_v17, 0.0  ;;  %s4912_s16 = scalar_lea.vmem %s4033_s12, 2048  ;;  %p4917_p1 = scmp.lt.s32.totalorder %s4033_s12, %s4033_s12 }
 0x3c3   :  { %v3753_v31 = vadd.f32 %v3752_v55, %v3751_v6  ;;  %v3728_v54 = vadd.f32 %v3727_v42, %v3726_v26  ;;  %v4936_v55 = vmov 1966171168   ;;  %p4913_p0 = scmp.ne.s32.totalorder %s4033_s12, %s4912_s16  ;;  %p4918_p2 = scmp.lt.s32.totalorder %s4912_s16, %s4912_s16 }
 0x3c4   :  { %v3733_v24 = vsel %vm62_vm0, %v6918_v25, 0.0  ;;  %v3735_v8 = vsel %vm62_vm0, %v3713_v3, 0.0  ;;  %v3948_v12 = vunpack.c.l.s4 %v4936_v55 }
 0x3c5   :  { %v3755_v35 = vadd.f32 %v3754_v34, %v3753_v31  ;;  %v3730_v21 = vadd.f32 %v3729_v14, %v3728_v54  ;;  %v3950_v31 = vlaneseq  ;;  %p4919_p3 = por %p4918_p2, %p4917_p1 }
 0x3c6   :  { %v3949_v16 = vunpack.c.0.s8 %v3948_v12 }
 0x3c7   :  { %v3757_v32 = vadd.f32 %v3756_v56, %v3755_v35  ;;  %v3732_v46 = vadd.f32 %v3731_v23, %v3730_v21  ;;  %v3951_v9 = vshrl.u32 %v3950_v31, 7  ;;  %p4920_p4 = pnand %p4919_p3, %p4913_p0 }
 0x3c9   :  { %v3758_v20 = vrot.slane %v3757_v32, 4  ;;  %v3734_v28 = vadd.f32 %v3733_v24, %v3732_v46  ;;  %v3952_v34 = vsub.s32 %v3949_v16, %v3951_v9  ;;  %v3971_v38 = vsub.s32 0, %v3951_v9 }
 0x3cb   :  { %v3759_v29 = vadd.f32 %v3758_v20, %v3757_v32  ;;  %v3736_v58 = vadd.f32 %v3735_v8, %v3734_v28 }
 0x3cd   :  { %v3760_v15 = vrot.slane %v3759_v29, 2  ;;  %v3737_v43 = vrot.slane %v3736_v58, 4 }
 0x3cf   :  { %v3761_v4 = vadd.f32 %v3760_v15, %v3759_v29  ;;  %v3738_v52 = vadd.f32 %v3737_v43, %v3736_v58 }
 0x3d1   :  { %v3762_v13 = vrot.slane %v3761_v4, 1  ;;  %v3739_v57 = vrot.slane %v3738_v52, 2 }
 0x3d3   :  { %v3740_v44 = vadd.f32 %v3739_v57, %v3738_v52  ;;  %v3763_v33 = vadd.f32 %v3762_v13, %v3761_v4  ;;  %v7165_v52 = vld [vmem:[#allocation8_spill] sm:$0xff]  ;;  %v7167_v13 = vld [vmem:[#allocation10_spill] sm:$0xff]  ;;  %v7168_v57 = vld [vmem:[#allocation11_spill] sm:$0xff] }
 0x3d5   :  { %v3741_v45 = vrot.slane %v3740_v44, 1  ;;  %v3765_v51 = vmul.f32 0.015625, %v3763_v33  ;;  %v7170_v33 = vld [vmem:[#allocation22_spill] sm:$0xff] }
 0x3d7   :  { %v3742_v10 = vadd.f32 %v3741_v45, %v3740_v44  ;;  %v7169_v44 = vld [vmem:[#allocation12_spill] sm:$0xff]  ;;  %v7171_v45 = vld [vmem:[#allocation13_spill] sm:$0xff] }
 0x3d9   :  { %v3764_v30 = vmul.f32 0.015625, %v3742_v10  ;;  %v7172_v10 = vld [vmem:[#allocation14_spill] sm:$0xff] }
 0x3db   :  { %v3780_v36 = vsel %vm3779_vm4, %v3765_v51, %v3764_v30  ;;  %v7173_v30 = vld [vmem:[#allocation15_spill] sm:$0xff] }
 0x3dc   :  { %4855 = vmatmul.mubr.msk.f32.vlgmr.msra.gmra.mxu0 %vm62_vm0, %v3780_v36 }
 0x49c   :  { %v3849_v53 = vpop.f32.mrf.mxu0 }
 0x49d   :  { %v3850_v48 = vadd.f32 %v4293_v22, %v3849_v53  ;;  %v7174_v22 = vld [vmem:[#allocation16_spill] sm:$0xff] }
 0x49e   :  { %v4856_v47 = vpop.f32.mrf.mxu0 }
 0x49f   :  { %v3853_v41 = vmax.f32 %v3850_v48, 0.0  ;;  %v7175_v48 = vld [vmem:[#allocation17_spill] sm:$0xff] }
 0x4a1   :  { %4860 = vmatmul.mubr.msk.f32.vlgmr.msra.gmra.mxu1 %vm3862_vm5, %v3853_v41  ;;  %v7176_v41 = vld [vmem:[#allocation18_spill] sm:$0xff] }
 0x561   :  { %v3936_v18 = vpop.f32.mrf.mxu1 }
 0x562   :  { %v3937_v63 = vadd.f32 %v4295_v60, %v3936_v18  ;;  %v7177_v18 = vld [vmem:[#allocation19_spill] sm:$0xff] }
 0x563   :  { %v4861_v49 = vpop.f32.mrf.mxu1 }
 0x564   :  { %v4298_v6 = vmul.f32 -1.442695, %v3937_v63  ;;  %v7178_v49 = vld [vmem:[#allocation27_spill] sm:$0xff] }
 0x566   :  { %4908 = vpow2.f32 %v4298_v6 }
 0x573   :  { %v4909_v40 = vpop.eup %4908 }
 0x574   :  { %v3943_v5 = vadd.f32 1.0, %v4909_v40 }
 0x576   :  { %4910 = vrcp.f32 %v3943_v5 }
 0x583   :  { %v4911_v26 = vpop.eup %4910 }
 0x584   :  { %v3953_v35 = vrot.slane %v4911_v26, %v3952_v34 }
 0x586   :  { %v3954_v42 = vcombine.high %v3953_v35, %v3953_v35  ;;  %v3961_v56 = vrot.slane %v3953_v35, %v3952_v34 }
 0x588   :  { %v3968_v54 = vrot.slane %v3954_v42, %v3952_v34  ;;  %v3972_v32 = vrot.slane %v3961_v56, %v3971_v38 }
 0x58a   :  { %v3976_v14 = vrot.slane %v3968_v54, %v3971_v38  ;;  %v3979_v21 = vmul.f32 %v3972_v32, %v6886_v0  ;;  %v3980_v20 = vmul.f32 %v3972_v32, %v6888_v39  ;;  %v3981_v23 = vmul.f32 %v3972_v32, %v6890_v7 }
 0x58b   :  { %v3982_v46 = vmul.f32 %v3972_v32, %v6898_v37  ;;  %v3983_v29 = vmul.f32 %v3972_v32, %v6906_v19  ;;  %v3984_v24 = vmul.f32 %v3972_v32, %v6912_v17  ;;  %v3985_v28 = vmul.f32 %v3972_v32, %v6918_v25  ;;  %v7163_v17 = vld [vmem:[#allocation6_spill] sm:$0xff]  ;;  %v7164_v25 = vld [vmem:[#allocation7_spill] sm:$0xff] }
 0x58c   :  { %v3986_v8 = vmul.f32 %v3972_v32, %v3713_v3  ;;  %v3987_v15 = vmul.f32 %v3976_v14, %v6866_v62  ;;  %v3988_v58 = vmul.f32 %v3976_v14, %v6868_v27  ;;  %v3989_v4 = vmul.f32 %v3976_v14, %v6870_v61  ;;  %v7166_v27 = vld [vmem:[#allocation9_spill] sm:$0xff] }
 0x58d   :  { %v3990_v0 = vmul.f32 %v3976_v14, %v6872_v1  ;;  %v3991_v39 = vmul.f32 %v3976_v14, %v6878_v11  ;;  %v3992_v7 = vmul.f32 %v3976_v14, %v6882_v59  ;;  %v3993_v37 = vmul.f32 %v3976_v14, %v6892_v2 }
 0x58e   :  { %v3994_v19 = vmul.f32 %v3976_v14, %v6902_v50  ;;  %v3995_v43 = vadd.f32 %v3979_v21, %v7163_v17  ;;  %v3996_v3 = vadd.f32 %v3980_v20, %v7164_v25  ;;  %v3997_v62 = vadd.f32 %v3981_v23, %v7165_v52 }
 0x58f   :  { %v3998_v61 = vadd.f32 %v3982_v46, %v7166_v27  ;;  %v3999_v1 = vadd.f32 %v3983_v29, %v7167_v13  ;;  %v4000_v11 = vadd.f32 %v3984_v24, %v7168_v57  ;;  %v4001_v59 = vadd.f32 %v3985_v28, %v7169_v44 }
 0x590   :  { %v4002_v2 = vadd.f32 %v3986_v8, %v7170_v33  ;;  %v4003_v50 = vadd.f32 %v3987_v15, %v7171_v45  ;;  %v4004_v51 = vadd.f32 %v3988_v58, %v7172_v10  ;;  %v4005_v36 = vadd.f32 %v3989_v4, %v7173_v30  ;;  %4011 = vst.msk [vmem:[#allocation3] sm:$0xff] %vm62_vm0, %v3995_v43 }
 0x591   :  { %4012 = vst.msk [vmem:[#allocation3 + $0x8] sm:$0xff] %vm62_vm0, %v3996_v3  ;;  %4013 = vst.msk [vmem:[#allocation3 + $0x10] sm:$0xff] %vm62_vm0, %v3997_v62  ;;  %v4006_v53 = vadd.f32 %v3990_v0, %v7174_v22  ;;  %v4007_v47 = vadd.f32 %v3991_v39, %v7175_v48  ;;  %v4008_v60 = vadd.f32 %v3992_v7, %v7176_v41 }
 0x592   :  { %v4009_v63 = vadd.f32 %v3993_v37, %v7177_v18  ;;  %4014 = vst.msk [vmem:[#allocation3 + $0x18] sm:$0xff] %vm62_vm0, %v3998_v61  ;;  %4015 = vst.msk [vmem:[#allocation3 + $0x20] sm:$0xff] %vm62_vm0, %v3999_v1  ;;  %v4010_v6 = vadd.f32 %v3994_v19, %v7178_v49 }
 0x593   :  { %4016 = vst.msk [vmem:[#allocation3 + $0x28] sm:$0xff] %vm62_vm0, %v4000_v11  ;;  %4017 = vst.msk [vmem:[#allocation3 + $0x30] sm:$0xff] %vm62_vm0, %v4001_v59 }
 0x594   :  { %4018 = vst.msk [vmem:[#allocation3 + $0x38] sm:$0xff] %vm62_vm0, %v4002_v2  ;;  %4019 = vst.msk [vmem:[#allocation3 + $0x40] sm:$0xff] %vm62_vm0, %v4003_v50 }
 0x595   :  { %4020 = vst.msk [vmem:[#allocation3 + $0x48] sm:$0xff] %vm62_vm0, %v4004_v51  ;;  %4021 = vst.msk [vmem:[#allocation3 + $0x50] sm:$0xff] %vm62_vm0, %v4005_v36 }
 0x596   :  { %4022 = vst.msk [vmem:[#allocation3 + $0x58] sm:$0xff] %vm62_vm0, %v4006_v53  ;;  %4023 = vst.msk [vmem:[#allocation3 + $0x60] sm:$0xff] %vm62_vm0, %v4007_v47 }
 0x597   :  { %4024 = vst.msk [vmem:[#allocation3 + $0x68] sm:$0xff] %vm62_vm0, %v4008_v60  ;;  %4025 = vst.msk [vmem:[#allocation3 + $0x70] sm:$0xff] %vm62_vm0, %v4009_v63 }
 0x598   :  { %4026 = vst.msk [vmem:[#allocation3 + $0x78] sm:$0xff] %vm62_vm0, %v4010_v6 }
 0x599   :  { %4923 = shalt.err (!%p4920_p4)
}
 0x59a   :  { %s4938_s17 = smov 128   ;;  %s4939_s18 = smov 8  }
 0x59b   :  { %4038 = dma.vmem_to_hbm [thread:$0]  %s4033_s12, 2048, %s6997_s13, [#allocation4], %s4938_s17, %s4938_s17, %s4939_s18  }
 0x59c   :  { %4932 = dma.done.wait [#allocation4], 2048  }
 0x59d   :  { %4933 = vsyncadd [#allocation4], 4294965248 }
 0x59e   :  { %4042 = vsyncpa [#allocation4], 1 }

</bundles_post_ra>
